<compile_context>
chip_gen: v6e
topology: v6e:2x2x1
jax: 0.10.0
libtpu: 0.0.40
codegen_flags: <defaults>
</compile_context>

<pallas_src>
import jax
import jax.numpy as jnp
from jax import lax
from jax.experimental import pallas as pl
from jax.experimental.pallas import tpu as pltpu

EPS = 1e-5


def _pick_bm(m):
    """Row block for K1: biggest pow2 <= 2048 dividing m, leaving >=2 steps if possible."""
    target = min(2048, max(8, m // 2))
    for cand in (2048, 1024, 512, 256, 128, 64, 32, 16, 8):
        if cand <= target and m % cand == 0:
            return cand
    return m


def _pick_dblk(d, cap=8):
    for cand in range(min(d, cap), 0, -1):
        if d % cand == 0:
            return cand
    return 1


def banded_conv_weight(w, width):
    """Fold the KW (width) tap axis and its zero padding (pad = KW//2) of a conv
    weight (KD, KH, KW, Cin, Cout) into a banded (width*Cin, width*Cout) matrix
    per (kd, kh), so W-axis convolution becomes one matmul on merged (x, c) lanes."""
    KD, KH, KW, Cin, Cout = w.shape
    xin = jnp.arange(width)[:, None]
    xo = jnp.arange(width)[None, :]
    b = jnp.zeros((KD, KH, width, Cin, width, Cout), w.dtype)
    for kx in range(KW):
        m = (xin == xo + (kx - KW // 2)).astype(w.dtype)                  # (W, W)
        b = b + m[None, None, :, None, :, None] * w[:, :, kx][:, :, None, :, None, :]
    return b.reshape(KD, KH, width * Cin, width * Cout)


# ---------------------------------------------------------------------------
# Kernel 1: fused pointwise chain (lane-packed: r voxels -> 128 lanes)
#   a = relu(bn_m1( x + conv_i2(relu(bn_i2(conv_i1(relu(bn_i1(x)))))) ))
# ---------------------------------------------------------------------------

def _pointwise_kernel(x_ref, s1_ref, b1_ref, w1_ref, s2_ref, b2_ref, w2_ref,
                      sm_ref, bm_ref, o_ref):
    x = x_ref[...]                                                    # (bm, r*Cin) f32
    h = jnp.maximum(x * s1_ref[...] + b1_ref[...], 0.0)
    z1 = jnp.dot(h.astype(jnp.bfloat16), w1_ref[...],
                 preferred_element_type=jnp.float32)                  # (bm, r*Cix)
    h2 = jnp.maximum(z1 * s2_ref[...] + b2_ref[...], 0.0)
    z2 = jnp.dot(h2.astype(jnp.bfloat16), w2_ref[...],
                 preferred_element_type=jnp.float32)                  # (bm, r*Cin)
    a = jnp.maximum((x + z2) * sm_ref[...] + bm_ref[...], 0.0)        # + BN/ReLU of conv_m1
    o_ref[...] = a.astype(o_ref.dtype)


def fused_pointwise(x_ndhwc, P, r):
    Cin = x_ndhwc.shape[-1]
    M = x_ndhwc.size // Cin
    Cix = P["i1_w"].shape[1]
    Mp = M // r
    C1, C2 = r * Cin, r * Cix
    xp = x_ndhwc.reshape(Mp, C1)                                      # lane-dense view (free)
    bm = _pick_bm(Mp)

    eye = jnp.eye(r, dtype=jnp.float32)
    w1 = jnp.kron(eye, P["i1_w"]).astype(jnp.bfloat16)                # block-diagonal (C1, C2)
    w2 = jnp.kron(eye, P["i2_w"]).astype(jnp.bfloat16)                # block-diagonal (C2, C1)
    tile = lambda v: jnp.tile(v, r).reshape(1, -1)
    const = lambda i: (0, 0)

    return pl.pallas_call(
        _pointwise_kernel,
        out_shape=jax.ShapeDtypeStruct((Mp, C1), jnp.bfloat16),
        grid=(Mp // bm,),
        in_specs=[
            pl.BlockSpec((bm, C1), lambda i: (i, 0)),
            pl.BlockSpec((1, C1), const), pl.BlockSpec((1, C1), const),
            pl.BlockSpec((C1, C2), const),
            pl.BlockSpec((1, C2), const), pl.BlockSpec((1, C2), const),
            pl.BlockSpec((C2, C1), const),
            pl.BlockSpec((1, C1), const), pl.BlockSpec((1, C1), const),
        ],
        out_specs=pl.BlockSpec((bm, C1), lambda i: (i, 0)),
        compiler_params=pltpu.CompilerParams(dimension_semantics=("parallel",)),
    )(xp, tile(P["i1_scale"]), tile(P["i1_shift"]), w1,
      tile(P["i2_scale"]), tile(P["i2_shift"]), w2,
      tile(P["m1_scale"]), tile(P["m1_shift"]))


# ---------------------------------------------------------------------------
# Kernel 2: conv_m1 (3x3x3) + BN/ReLU(m2) + conv_m2 (1x3x3) + residual, fused.
# Merged-lane layout: rows = (depth, h), lanes = (w, channel).
# ---------------------------------------------------------------------------

def _make_conv_block_kernel(D, Dblk, H, WCin, WCmid, WCout):
    def kernel(a_ref, w1_ref, s2_ref, b2_ref, w2_ref, x_ref, o_ref,
               A_ref, h1_ref):
        d0 = pl.program_id(1) * Dblk

        # Stage depth slices d0-1 .. d0+Dblk into VMEM with a zero depth halo
        # (replaces the old out-of-kernel jnp.pad HBM round trip).
        for ri in range(Dblk + 2):
            di = d0 + ri - 1
            di_c = jnp.clip(di, 0, D - 1)
            valid = jnp.logical_and(di >= 0, di < D)
            v = a_ref[0, pl.ds(di_c, 1), :, :]                        # (1, H, WCin) bf16
            keep = jnp.where(valid, 1.0, 0.0).astype(v.dtype)
            A_ref[pl.ds(ri, 1), :, :] = v * keep

        A = A_ref[...].reshape((Dblk + 2) * H, WCin)                  # bf16

        # conv_m1 (3x3x3): 9 banded matmuls; depth taps picked by row-block
        # offset, height taps by +-1 row-shifted accumulation, width taps
        # (with zero pad) folded into the banded weights.
        h1_ref[...] = jnp.zeros_like(h1_ref)
        for kd in range(3):
            for ky in range(3):
                z = jnp.dot(A, w1_ref[kd, ky],
                            preferred_element_type=jnp.float32)       # ((Dblk+2)*H, WCmid)
                z = z.reshape(Dblk + 2, H, WCmid)[kd:kd + Dblk]
                if ky == 0:
                    h1_ref[:, 1:, :] += z[:, :H - 1, :]
                elif ky == 1:
                    h1_ref[...] += z
                else:
                    h1_ref[:, :H - 1, :] += z[:, 1:, :]

        # conv_m2's BN + ReLU, then its 1x3x3 conv (3 banded matmuls) with the
        # final `+ x` residual fused; o_ref doubles as the accumulator.
        h2 = jnp.maximum(h1_ref[...] * s2_ref[...] + b2_ref[...], 0.0)
        h2 = h2.astype(jnp.bfloat16).reshape(Dblk * H, WCmid)

        o_ref[...] = x_ref[...]
        for ky in range(3):
            z = jnp.dot(h2, w2_ref[ky], preferred_element_type=jnp.float32)
            z = z.reshape(1, Dblk, H, WCout)
            if ky == 0:
                o_ref[:, :, 1:, :] += z[:, :, :H - 1, :]
            elif ky == 1:
                o_ref[...] += z
            else:
                o_ref[:, :, :H - 1, :] += z[:, :, 1:, :]
    return kernel


def conv_block(a4, x4, P, width):
    """a4: (N, D, H, W*Cin) bf16 = relu(bn_m1(x_in));  x4: (N, D, H, W*Cout) f32.
    Returns conv_m2(relu(bn_m2(conv_m1(a)))) + x  as (N, D, H, W*Cout) f32."""
    N, D, H, WCin = a4.shape
    Cmid = P["m1_w"].shape[-1]
    Cout = P["m2_w"].shape[-1]
    WCmid, WCout = width * Cmid, width * Cout
    Dblk = _pick_dblk(D)
    nDb = D // Dblk

    w1b = banded_conv_weight(P["m1_w"], width).astype(jnp.bfloat16)      # (3,3,WCin,WCmid)
    w2b = banded_conv_weight(P["m2_w"], width).astype(jnp.bfloat16)[0]   # (3,WCmid,WCout)
    s2 = jnp.tile(P["m2_scale"], width).reshape(1, WCmid)
    b2 = jnp.tile(P["m2_shift"], width).reshape(1, WCmid)

    return pl.pallas_call(
        _make_conv_block_kernel(D, Dblk, H, WCin, WCmid, WCout),
        out_shape=jax.ShapeDtypeStruct((N, D, H, WCout), jnp.float32),
        grid=(N, nDb),
        in_specs=[
            # full-depth input block; index constant over db -> DMA'd once per n
            pl.BlockSpec((1, D, H, WCin), lambda n, db: (n, 0, 0, 0)),
            # weights / BN params resident (constant index maps -> loaded once)
            pl.BlockSpec((3, 3, WCin, WCmid), lambda n, db: (0, 0, 0, 0)),
            pl.BlockSpec((1, WCmid), lambda n, db: (0, 0)),
            pl.BlockSpec((1, WCmid), lambda n, db: (0, 0)),
            pl.BlockSpec((3, WCmid, WCout), lambda n, db: (0, 0, 0)),
            # residual block
            pl.BlockSpec((1, Dblk, H, WCout), lambda n, db: (n, db, 0, 0)),
        ],
        out_specs=pl.BlockSpec((1, Dblk, H, WCout), lambda n, db: (n, db, 0, 0)),
        scratch_shapes=[
            pltpu.VMEM((Dblk + 2, H, WCin), jnp.bfloat16),   # depth-halo staging
            pltpu.VMEM((Dblk, H, WCmid), jnp.float32),       # conv_m1 accumulator
        ],
        compiler_params=pltpu.CompilerParams(
            dimension_semantics=("parallel", "arbitrary")),
    )(a4, w1b, s2, b2, w2b, x4)


# ---------------------------------------------------------------------------
# MF_UNIT forward (Pallas)
# ---------------------------------------------------------------------------

def mf_unit_forward(x_ndhwc, P):
    N, D, H, W, Cin = x_ndhwc.shape
    Cout = P["m2_w"].shape[-1]
    assert Cout == Cin, "first_block=False path requires num_out == num_in (h + x)"
    M = N * D * H * W
    r = 128 // Cin if (Cin <= 128 and 128 % Cin == 0
                       and M % max(1, 128 // Cin) == 0) else 1

    a = fused_pointwise(x_ndhwc, P, r)                        # (M//r, r*Cin) bf16
    a4 = a.reshape(N, D, H, W * Cin)                          # free re-view (contiguous)
    x4 = x_ndhwc.reshape(N, D, H, W * Cout)
    out4 = conv_block(a4, x4, P, W)                           # (N, D, H, W*Cout) f32
    return out4.reshape(N, D, H, W, Cout)


# ---------------------------------------------------------------------------
# Pure-JAX reference (same bf16-operand / f32-accumulate precision)
# ---------------------------------------------------------------------------

def ref_forward(x, P):
    bf = jnp.bfloat16

    def bnrelu(v, s, b):
        return jnp.maximum(v * s + b, 0.0)

    dn = ("NDHWC", "DHWIO", "NDHWC")
    h = bnrelu(x, P["i1_scale"], P["i1_shift"])
    h = jnp.einsum("ndhwc,co->ndhwo", h.astype(bf), P["i1_w"].astype(bf),
                   preferred_element_type=jnp.float32)
    h = bnrelu(h, P["i2_scale"], P["i2_shift"])
    h = jnp.einsum("ndhwc,co->ndhwo", h.astype(bf), P["i2_w"].astype(bf),
                   preferred_element_type=jnp.float32)
    x_in = x + h
    a = bnrelu(x_in, P["m1_scale"], P["m1_shift"]).astype(bf)
    h = lax.conv_general_dilated(a, P["m1_w"].astype(bf), (1, 1, 1),
                                 [(1, 1), (1, 1), (1, 1)], dimension_numbers=dn,
                                 preferred_element_type=jnp.float32)
    a = bnrelu(h, P["m2_scale"], P["m2_shift"]).astype(bf)
    h = lax.conv_general_dilated(a, P["m2_w"].astype(bf), (1, 1, 1),
                                 [(0, 0), (1, 1), (1, 1)], dimension_numbers=dn,
                                 preferred_element_type=jnp.float32)
    return h + x


# ---------------------------------------------------------------------------
# Deterministic parameter init
# ---------------------------------------------------------------------------

def init_params(key, num_in, num_mid, num_out):
    num_ix = num_mid // 4
    keys = jax.random.split(key, 8)

    def bn_affine(k, c):
        k1, k2, k3, k4 = jax.random.split(k, 4)
        gamma = 1.0 + 0.1 * jax.random.normal(k1, (c,), jnp.float32)
        beta = 0.1 * jax.random.normal(k2, (c,), jnp.float32)
        mean = 0.1 * jax.random.normal(k3, (c,), jnp.float32)
        var = 1.0 + 0.1 * jnp.abs(jax.random.normal(k4, (c,), jnp.float32))
        scale = gamma * lax.rsqrt(var + EPS)
        shift = beta - mean * scale
        return scale, shift

    def conv_w(k, shape):
        fan_in = 1
        for s in shape[:-1]:
            fan_in *= s
        return jax.random.normal(k, shape, jnp.float32) / jnp.sqrt(float(fan_in))

    P = {}
    P["i1_scale"], P["i1_shift"] = bn_affine(keys[0], num_in)
    P["i1_w"] = conv_w(keys[1], (num_in, num_ix))
    P["i2_scale"], P["i2_shift"] = bn_affine(keys[2], num_ix)
    P["i2_w"] = conv_w(keys[3], (num_ix, num_in))
    P["m1_scale"], P["m1_shift"] = bn_affine(keys[4], num_in)
    P["m1_w"] = conv_w(keys[5], (3, 3, 3, num_in, num_mid))
    P["m2_scale"], P["m2_shift"] = bn_affine(keys[6], num_mid)
    P["m2_w"] = conv_w(keys[7], (1, 3, 3, num_mid, num_out))
    return P


if __name__ == "__main__":
    num_in, num_mid, num_out = 32, 32, 32   # first_block=False => num_out == num_in
    N, Dd, Hh, Ww = 2, 4, 8, 8

    key = jax.random.PRNGKey(0)
    kx, kp = jax.random.split(key)
    x_ncdhw = jax.random.normal(kx, (N, num_in, Dd, Hh, Ww), jnp.float32)  # PyTorch NCDHW
    x = jnp.transpose(x_ncdhw, (0, 2, 3, 4, 1))                            # kernel layout NDHWC
    P = init_params(kp, num_in, num_mid, num_out)

    out = jax.block_until_ready(jax.jit(mf_unit_forward)(x, P))
    ref = jax.block_until_ready(ref_forward(x, P))

    assert out.shape == (N, Dd, Hh, Ww, num_out)
    max_err = float(jnp.max(jnp.abs(out - ref)))
    # Both paths use identically bf16-rounded matmul operands with f32 accumulation;
    # remaining difference is reduction-order only.
    assert jnp.allclose(out, ref, atol=2e-2, rtol=2e-2), f"max_err={max_err}"
    print("KERNEL_OK")
</pallas_src>

<mosaic_0001>
module attributes {stable_mosaic.version = 11 : i64} {
  func.func @_pointwise_kernel(%arg0: i32, %arg1: memref<64x128xf32, #tpu.memory_space<vmem>>, %arg2: memref<1x128xf32, #tpu.memory_space<vmem>>, %arg3: memref<1x128xf32, #tpu.memory_space<vmem>>, %arg4: memref<128x32xbf16, #tpu.memory_space<vmem>>, %arg5: memref<1x32xf32, #tpu.memory_space<vmem>>, %arg6: memref<1x32xf32, #tpu.memory_space<vmem>>, %arg7: memref<32x128xbf16, #tpu.memory_space<vmem>>, %arg8: memref<1x128xf32, #tpu.memory_space<vmem>>, %arg9: memref<1x128xf32, #tpu.memory_space<vmem>>, %arg10: memref<64x128xbf16, #tpu.memory_space<vmem>>) attributes {dimension_semantics = [#tpu.dimension_semantics<parallel>], iteration_bounds = array<i64: 2>, scalar_prefetch = 0 : i64, scratch_operands = 0 : i64, tpu.core_type = #tpu.core_type<tc>, window_params = [{transform_indices = @transform_0, window_bounds = array<i64: 64, 128>}, {pipeline_mode = #tpu.pipeline_mode<synchronous>, transform_indices = @transform_1, window_bounds = array<i64: 1, 128>}, {pipeline_mode = #tpu.pipeline_mode<synchronous>, transform_indices = @transform_2, window_bounds = array<i64: 1, 128>}, {pipeline_mode = #tpu.pipeline_mode<synchronous>, transform_indices = @transform_3, window_bounds = array<i64: 128, 32>}, {pipeline_mode = #tpu.pipeline_mode<synchronous>, transform_indices = @transform_4, window_bounds = array<i64: 1, 32>}, {pipeline_mode = #tpu.pipeline_mode<synchronous>, transform_indices = @transform_5, window_bounds = array<i64: 1, 32>}, {pipeline_mode = #tpu.pipeline_mode<synchronous>, transform_indices = @transform_6, window_bounds = array<i64: 32, 128>}, {pipeline_mode = #tpu.pipeline_mode<synchronous>, transform_indices = @transform_7, window_bounds = array<i64: 1, 128>}, {pipeline_mode = #tpu.pipeline_mode<synchronous>, transform_indices = @transform_8, window_bounds = array<i64: 1, 128>}, {transform_indices = @transform_9, window_bounds = array<i64: 64, 128>}]} {
    %c0 = arith.constant 0 : index
    %c0_0 = arith.constant 0 : index
    %0 = vector.load %arg1[%c0, %c0_0] : memref<64x128xf32, #tpu.memory_space<vmem>>, vector<64x128xf32>
    %c0_1 = arith.constant 0 : index
    %c0_2 = arith.constant 0 : index
    %1 = vector.load %arg2[%c0_1, %c0_2] : memref<1x128xf32, #tpu.memory_space<vmem>>, vector<1x128xf32>
    %2 = vector.broadcast %1 : vector<1x128xf32> to vector<64x128xf32>
    %3 = arith.mulf %0, %2 : vector<64x128xf32>
    %c0_3 = arith.constant 0 : index
    %c0_4 = arith.constant 0 : index
    %4 = vector.load %arg3[%c0_3, %c0_4] : memref<1x128xf32, #tpu.memory_space<vmem>>, vector<1x128xf32>
    %5 = vector.broadcast %4 : vector<1x128xf32> to vector<64x128xf32>
    %6 = arith.addf %3, %5 : vector<64x128xf32>
    %cst = arith.constant 0.000000e+00 : f32
    %7 = vector.broadcast %cst : f32 to vector<64x128xf32>
    %8 = arith.maximumf %6, %7 : vector<64x128xf32>
    %9 = arith.truncf %8 : vector<64x128xf32> to vector<64x128xbf16>
    %c0_5 = arith.constant 0 : index
    %c0_6 = arith.constant 0 : index
    %10 = vector.load %arg4[%c0_5, %c0_6] : memref<128x32xbf16, #tpu.memory_space<vmem>>, vector<128x32xbf16>
    %cst_7 = arith.constant dense<0.000000e+00> : vector<64x32xf32>
    %11 = tpu.matmul %9, %10, %cst_7 {dimension_numbers = #tpu.dot_dimension_numbers<[1], [0], [0], [1], [0, 0, 1, 1], [], []>} : vector<64x128xbf16>, vector<128x32xbf16>, vector<64x32xf32> -> vector<64x32xf32>
    %c0_8 = arith.constant 0 : index
    %c0_9 = arith.constant 0 : index
    %12 = vector.load %arg5[%c0_8, %c0_9] : memref<1x32xf32, #tpu.memory_space<vmem>>, vector<1x32xf32>
    %13 = vector.broadcast %12 : vector<1x32xf32> to vector<64x32xf32>
    %14 = arith.mulf %11, %13 : vector<64x32xf32>
    %c0_10 = arith.constant 0 : index
    %c0_11 = arith.constant 0 : index
    %15 = vector.load %arg6[%c0_10, %c0_11] : memref<1x32xf32, #tpu.memory_space<vmem>>, vector<1x32xf32>
    %16 = vector.broadcast %15 : vector<1x32xf32> to vector<64x32xf32>
    %17 = arith.addf %14, %16 : vector<64x32xf32>
    %cst_12 = arith.constant 0.000000e+00 : f32
    %18 = vector.broadcast %cst_12 : f32 to vector<64x32xf32>
    %19 = arith.maximumf %17, %18 : vector<64x32xf32>
    %20 = arith.truncf %19 : vector<64x32xf32> to vector<64x32xbf16>
    %c0_13 = arith.constant 0 : index
    %c0_14 = arith.constant 0 : index
    %21 = vector.load %arg7[%c0_13, %c0_14] : memref<32x128xbf16, #tpu.memory_space<vmem>>, vector<32x128xbf16>
    %cst_15 = arith.constant dense<0.000000e+00> : vector<64x128xf32>
    %22 = tpu.matmul %20, %21, %cst_15 {dimension_numbers = #tpu.dot_dimension_numbers<[1], [0], [0], [1], [0, 0, 1, 1], [], []>} : vector<64x32xbf16>, vector<32x128xbf16>, vector<64x128xf32> -> vector<64x128xf32>
    %23 = arith.addf %0, %22 : vector<64x128xf32>
    %c0_16 = arith.constant 0 : index
    %c0_17 = arith.constant 0 : index
    %24 = vector.load %arg8[%c0_16, %c0_17] : memref<1x128xf32, #tpu.memory_space<vmem>>, vector<1x128xf32>
    %25 = vector.broadcast %24 : vector<1x128xf32> to vector<64x128xf32>
    %26 = arith.mulf %23, %25 : vector<64x128xf32>
    %c0_18 = arith.constant 0 : index
    %c0_19 = arith.constant 0 : index
    %27 = vector.load %arg9[%c0_18, %c0_19] : memref<1x128xf32, #tpu.memory_space<vmem>>, vector<1x128xf32>
    %28 = vector.broadcast %27 : vector<1x128xf32> to vector<64x128xf32>
    %29 = arith.addf %26, %28 : vector<64x128xf32>
    %cst_20 = arith.constant 0.000000e+00 : f32
    %30 = vector.broadcast %cst_20 : f32 to vector<64x128xf32>
    %31 = arith.maximumf %29, %30 : vector<64x128xf32>
    %32 = arith.truncf %31 : vector<64x128xf32> to vector<64x128xbf16>
    %c0_21 = arith.constant 0 : index
    %c0_22 = arith.constant 0 : index
    %33 = vector.load %arg10[%c0_21, %c0_22] : memref<64x128xbf16, #tpu.memory_space<vmem>>, vector<64x128xbf16>
    tpu.vector_store %arg10[%c0_21, %c0_22], %32 {strides = array<i32>} : memref<64x128xbf16, #tpu.memory_space<vmem>>, vector<64x128xbf16>,
    return
  }
  func.func @transform_0(%arg0: i32) -> (i32, i32) {
    %c0_i32 = arith.constant 0 : i32
    %c0_i32_0 = arith.constant 0 : i32
    return %arg0, %c0_i32 : i32, i32
  }
  func.func @transform_1(%arg0: i32) -> (i32, i32) {
    %c0_i32 = arith.constant 0 : i32
    %c0_i32_0 = arith.constant 0 : i32
    %c0_i32_1 = arith.constant 0 : i32
    return %c0_i32, %c0_i32_0 : i32, i32
  }
  func.func @transform_2(%arg0: i32) -> (i32, i32) {
    %c0_i32 = arith.constant 0 : i32
    %c0_i32_0 = arith.constant 0 : i32
    %c0_i32_1 = arith.constant 0 : i32
    return %c0_i32, %c0_i32_0 : i32, i32
  }
  func.func @transform_3(%arg0: i32) -> (i32, i32) {
    %c0_i32 = arith.constant 0 : i32
    %c0_i32_0 = arith.constant 0 : i32
    %c0_i32_1 = arith.constant 0 : i32
    return %c0_i32, %c0_i32_0 : i32, i32
  }
  func.func @transform_4(%arg0: i32) -> (i32, i32) {
    %c0_i32 = arith.constant 0 : i32
    %c0_i32_0 = arith.constant 0 : i32
    %c0_i32_1 = arith.constant 0 : i32
    return %c0_i32, %c0_i32_0 : i32, i32
  }
  func.func @transform_5(%arg0: i32) -> (i32, i32) {
    %c0_i32 = arith.constant 0 : i32
    %c0_i32_0 = arith.constant 0 : i32
    %c0_i32_1 = arith.constant 0 : i32
    return %c0_i32, %c0_i32_0 : i32, i32
  }
  func.func @transform_6(%arg0: i32) -> (i32, i32) {
    %c0_i32 = arith.constant 0 : i32
    %c0_i32_0 = arith.constant 0 : i32
    %c0_i32_1 = arith.constant 0 : i32
    return %c0_i32, %c0_i32_0 : i32, i32
  }
  func.func @transform_7(%arg0: i32) -> (i32, i32) {
    %c0_i32 = arith.constant 0 : i32
    %c0_i32_0 = arith.constant 0 : i32
    %c0_i32_1 = arith.constant 0 : i32
    return %c0_i32, %c0_i32_0 : i32, i32
  }
  func.func @transform_8(%arg0: i32) -> (i32, i32) {
    %c0_i32 = arith.constant 0 : i32
    %c0_i32_0 = arith.constant 0 : i32
    %c0_i32_1 = arith.constant 0 : i32
    return %c0_i32, %c0_i32_0 : i32, i32
  }
  func.func @transform_9(%arg0: i32) -> (i32, i32) {
    %c0_i32 = arith.constant 0 : i32
    %c0_i32_0 = arith.constant 0 : i32
    return %arg0, %c0_i32 : i32, i32
  }
}

module attributes {stable_mosaic.version = 11 : i64} {
  func.func @kernel(%arg0: i32, %arg1: i32, %arg2: memref<1x4x8x256xbf16, #tpu.memory_space<vmem>>, %arg3: memref<3x3x256x256xbf16, #tpu.memory_space<vmem>>, %arg4: memref<1x256xf32, #tpu.memory_space<vmem>>, %arg5: memref<1x256xf32, #tpu.memory_space<vmem>>, %arg6: memref<3x256x256xbf16, #tpu.memory_space<vmem>>, %arg7: memref<1x4x8x256xf32, #tpu.memory_space<vmem>>, %arg8: memref<1x4x8x256xf32, #tpu.memory_space<vmem>>, %arg9: memref<6x8x256xbf16, #tpu.memory_space<vmem>>, %arg10: memref<4x8x256xf32, #tpu.memory_space<vmem>>) attributes {dimension_semantics = [#tpu.dimension_semantics<parallel>, #tpu.dimension_semantics<arbitrary>], iteration_bounds = array<i64: 2, 1>, scalar_prefetch = 0 : i64, scratch_operands = 2 : i64, tpu.core_type = #tpu.core_type<tc>, window_params = [{transform_indices = @transform_0, window_bounds = array<i64: 1, 4, 8, 256>}, {pipeline_mode = #tpu.pipeline_mode<synchronous>, transform_indices = @transform_1, window_bounds = array<i64: 3, 3, 256, 256>}, {pipeline_mode = #tpu.pipeline_mode<synchronous>, transform_indices = @transform_2, window_bounds = array<i64: 1, 256>}, {pipeline_mode = #tpu.pipeline_mode<synchronous>, transform_indices = @transform_3, window_bounds = array<i64: 1, 256>}, {pipeline_mode = #tpu.pipeline_mode<synchronous>, transform_indices = @transform_4, window_bounds = array<i64: 3, 256, 256>}, {transform_indices = @transform_5, window_bounds = array<i64: 1, 4, 8, 256>}, {transform_indices = @transform_6, window_bounds = array<i64: 1, 4, 8, 256>}]} {
    %c4_i32 = arith.constant 4 : i32
    %0 = arith.muli %arg1, %c4_i32 : i32
    %c0_i32 = arith.constant 0 : i32
    %1 = arith.addi %0, %c0_i32 : i32
    %c1_i32 = arith.constant 1 : i32
    %2 = arith.subi %1, %c1_i32 : i32
    %c0_i32_0 = arith.constant 0 : i32
    %c3_i32 = arith.constant 3 : i32
    %3 = arith.maxsi %c0_i32_0, %2 : i32
    %4 = arith.minsi %c3_i32, %3 : i32
    %c0_i32_1 = arith.constant 0 : i32
    %5 = arith.cmpi sge, %2, %c0_i32_1 : i32
    %c4_i32_2 = arith.constant 4 : i32
    %6 = arith.cmpi slt, %2, %c4_i32_2 : i32
    %7 = arith.andi %5, %6 : i1
    %c0 = arith.constant 0 : index
    %8 = arith.index_cast %4 : i32 to index
    %c0_3 = arith.constant 0 : index
    %c0_4 = arith.constant 0 : index
    %9 = vector.load %arg2[%c0, %8, %c0_3, %c0_4] : memref<1x4x8x256xbf16, #tpu.memory_space<vmem>>, vector<1x1x8x256xbf16>
    %10 = vector.shape_cast %9 : vector<1x1x8x256xbf16> to vector<1x8x256xbf16>
    %cst = arith.constant 1.000000e+00 : f32
    %cst_5 = arith.constant 0.000000e+00 : f32
    %11 = arith.select %7, %cst, %cst_5 : f32
    %12 = arith.truncf %11 : f32 to bf16
    %13 = vector.broadcast %12 : bf16 to vector<1x8x256xbf16>
    %14 = arith.mulf %10, %13 : vector<1x8x256xbf16>
    %c0_6 = arith.constant 0 : index
    %c0_7 = arith.constant 0 : index
    %c0_8 = arith.constant 0 : index
    %15 = vector.load %arg9[%c0_6, %c0_7, %c0_8] : memref<6x8x256xbf16, #tpu.memory_space<vmem>>, vector<1x8x256xbf16>
    tpu.vector_store %arg9[%c0_6, %c0_7, %c0_8], %14 {strides = array<i32>} : memref<6x8x256xbf16, #tpu.memory_space<vmem>>, vector<1x8x256xbf16>,
    %c1_i32_9 = arith.constant 1 : i32
    %16 = arith.addi %0, %c1_i32_9 : i32
    %c1_i32_10 = arith.constant 1 : i32
    %17 = arith.subi %16, %c1_i32_10 : i32
    %c0_i32_11 = arith.constant 0 : i32
    %c3_i32_12 = arith.constant 3 : i32
    %18 = arith.maxsi %c0_i32_11, %17 : i32
    %19 = arith.minsi %c3_i32_12, %18 : i32
    %c0_i32_13 = arith.constant 0 : i32
    %20 = arith.cmpi sge, %17, %c0_i32_13 : i32
    %c4_i32_14 = arith.constant 4 : i32
    %21 = arith.cmpi slt, %17, %c4_i32_14 : i32
    %22 = arith.andi %20, %21 : i1
    %c0_15 = arith.constant 0 : index
    %23 = arith.index_cast %19 : i32 to index
    %c0_16 = arith.constant 0 : index
    %c0_17 = arith.constant 0 : index
    %24 = vector.load %arg2[%c0_15, %23, %c0_16, %c0_17] : memref<1x4x8x256xbf16, #tpu.memory_space<vmem>>, vector<1x1x8x256xbf16>
    %25 = vector.shape_cast %24 : vector<1x1x8x256xbf16> to vector<1x8x256xbf16>
    %cst_18 = arith.constant 1.000000e+00 : f32
    %cst_19 = arith.constant 0.000000e+00 : f32
    %26 = arith.select %22, %cst_18, %cst_19 : f32
    %27 = arith.truncf %26 : f32 to bf16
    %28 = vector.broadcast %27 : bf16 to vector<1x8x256xbf16>
    %29 = arith.mulf %25, %28 : vector<1x8x256xbf16>
    %c1 = arith.constant 1 : index
    %c0_20 = arith.constant 0 : index
    %c0_21 = arith.constant 0 : index
    %30 = vector.load %arg9[%c1, %c0_20, %c0_21] : memref<6x8x256xbf16, #tpu.memory_space<vmem>>, vector<1x8x256xbf16>
    tpu.vector_store %arg9[%c1, %c0_20, %c0_21], %29 {strides = array<i32>} : memref<6x8x256xbf16, #tpu.memory_space<vmem>>, vector<1x8x256xbf16>,
    %c2_i32 = arith.constant 2 : i32
    %31 = arith.addi %0, %c2_i32 : i32
    %c1_i32_22 = arith.constant 1 : i32
    %32 = arith.subi %31, %c1_i32_22 : i32
    %c0_i32_23 = arith.constant 0 : i32
    %c3_i32_24 = arith.constant 3 : i32
    %33 = arith.maxsi %c0_i32_23, %32 : i32
    %34 = arith.minsi %c3_i32_24, %33 : i32
    %c0_i32_25 = arith.constant 0 : i32
    %35 = arith.cmpi sge, %32, %c0_i32_25 : i32
    %c4_i32_26 = arith.constant 4 : i32
    %36 = arith.cmpi slt, %32, %c4_i32_26 : i32
    %37 = arith.andi %35, %36 : i1
    %c0_27 = arith.constant 0 : index
    %38 = arith.index_cast %34 : i32 to index
    %c0_28 = arith.constant 0 : index
    %c0_29 = arith.constant 0 : index
    %39 = vector.load %arg2[%c0_27, %38, %c0_28, %c0_29] : memref<1x4x8x256xbf16, #tpu.memory_space<vmem>>, vector<1x1x8x256xbf16>
    %40 = vector.shape_cast %39 : vector<1x1x8x256xbf16> to vector<1x8x256xbf16>
    %cst_30 = arith.constant 1.000000e+00 : f32
    %cst_31 = arith.constant 0.000000e+00 : f32
    %41 = arith.select %37, %cst_30, %cst_31 : f32
    %42 = arith.truncf %41 : f32 to bf16
    %43 = vector.broadcast %42 : bf16 to vector<1x8x256xbf16>
    %44 = arith.mulf %40, %43 : vector<1x8x256xbf16>
    %c2 = arith.constant 2 : index
    %c0_32 = arith.constant 0 : index
    %c0_33 = arith.constant 0 : index
    %45 = vector.load %arg9[%c2, %c0_32, %c0_33] : memref<6x8x256xbf16, #tpu.memory_space<vmem>>, vector<1x8x256xbf16>
    tpu.vector_store %arg9[%c2, %c0_32, %c0_33], %44 {strides = array<i32>} : memref<6x8x256xbf16, #tpu.memory_space<vmem>>, vector<1x8x256xbf16>,
    %c3_i32_34 = arith.constant 3 : i32
    %46 = arith.addi %0, %c3_i32_34 : i32
    %c1_i32_35 = arith.constant 1 : i32
    %47 = arith.subi %46, %c1_i32_35 : i32
    %c0_i32_36 = arith.constant 0 : i32
    %c3_i32_37 = arith.constant 3 : i32
    %48 = arith.maxsi %c0_i32_36, %47 : i32
    %49 = arith.minsi %c3_i32_37, %48 : i32
    %c0_i32_38 = arith.constant 0 : i32
    %50 = arith.cmpi sge, %47, %c0_i32_38 : i32
    %c4_i32_39 = arith.constant 4 : i32
    %51 = arith.cmpi slt, %47, %c4_i32_39 : i32
    %52 = arith.andi %50, %51 : i1
    %c0_40 = arith.constant 0 : index
    %53 = arith.index_cast %49 : i32 to index
    %c0_41 = arith.constant 0 : index
    %c0_42 = arith.constant 0 : index
    %54 = vector.load %arg2[%c0_40, %53, %c0_41, %c0_42] : memref<1x4x8x256xbf16, #tpu.memory_space<vmem>>, vector<1x1x8x256xbf16>
    %55 = vector.shape_cast %54 : vector<1x1x8x256xbf16> to vector<1x8x256xbf16>
    %cst_43 = arith.constant 1.000000e+00 : f32
    %cst_44 = arith.constant 0.000000e+00 : f32
    %56 = arith.select %52, %cst_43, %cst_44 : f32
    %57 = arith.truncf %56 : f32 to bf16
    %58 = vector.broadcast %57 : bf16 to vector<1x8x256xbf16>
    %59 = arith.mulf %55, %58 : vector<1x8x256xbf16>
    %c3 = arith.constant 3 : index
    %c0_45 = arith.constant 0 : index
    %c0_46 = arith.constant 0 : index
    %60 = vector.load %arg9[%c3, %c0_45, %c0_46] : memref<6x8x256xbf16, #tpu.memory_space<vmem>>, vector<1x8x256xbf16>
    tpu.vector_store %arg9[%c3, %c0_45, %c0_46], %59 {strides = array<i32>} : memref<6x8x256xbf16, #tpu.memory_space<vmem>>, vector<1x8x256xbf16>,
    %c4_i32_47 = arith.constant 4 : i32
    %61 = arith.addi %0, %c4_i32_47 : i32
    %c1_i32_48 = arith.constant 1 : i32
    %62 = arith.subi %61, %c1_i32_48 : i32
    %c0_i32_49 = arith.constant 0 : i32
    %c3_i32_50 = arith.constant 3 : i32
    %63 = arith.maxsi %c0_i32_49, %62 : i32
    %64 = arith.minsi %c3_i32_50, %63 : i32
    %c0_i32_51 = arith.constant 0 : i32
    %65 = arith.cmpi sge, %62, %c0_i32_51 : i32
    %c4_i32_52 = arith.constant 4 : i32
    %66 = arith.cmpi slt, %62, %c4_i32_52 : i32
    %67 = arith.andi %65, %66 : i1
    %c0_53 = arith.constant 0 : index
    %68 = arith.index_cast %64 : i32 to index
    %c0_54 = arith.constant 0 : index
    %c0_55 = arith.constant 0 : index
    %69 = vector.load %arg2[%c0_53, %68, %c0_54, %c0_55] : memref<1x4x8x256xbf16, #tpu.memory_space<vmem>>, vector<1x1x8x256xbf16>
    %70 = vector.shape_cast %69 : vector<1x1x8x256xbf16> to vector<1x8x256xbf16>
    %cst_56 = arith.constant 1.000000e+00 : f32
    %cst_57 = arith.constant 0.000000e+00 : f32
    %71 = arith.select %67, %cst_56, %cst_57 : f32
    %72 = arith.truncf %71 : f32 to bf16
    %73 = vector.broadcast %72 : bf16 to vector<1x8x256xbf16>
    %74 = arith.mulf %70, %73 : vector<1x8x256xbf16>
    %c4 = arith.constant 4 : index
    %c0_58 = arith.constant 0 : index
    %c0_59 = arith.constant 0 : index
    %75 = vector.load %arg9[%c4, %c0_58, %c0_59] : memref<6x8x256xbf16, #tpu.memory_space<vmem>>, vector<1x8x256xbf16>
    tpu.vector_store %arg9[%c4, %c0_58, %c0_59], %74 {strides = array<i32>} : memref<6x8x256xbf16, #tpu.memory_space<vmem>>, vector<1x8x256xbf16>,
    %c5_i32 = arith.constant 5 : i32
    %76 = arith.addi %0, %c5_i32 : i32
    %c1_i32_60 = arith.constant 1 : i32
    %77 = arith.subi %76, %c1_i32_60 : i32
    %c0_i32_61 = arith.constant 0 : i32
    %c3_i32_62 = arith.constant 3 : i32
    %78 = arith.maxsi %c0_i32_61, %77 : i32
    %79 = arith.minsi %c3_i32_62, %78 : i32
    %c0_i32_63 = arith.constant 0 : i32
    %80 = arith.cmpi sge, %77, %c0_i32_63 : i32
    %c4_i32_64 = arith.constant 4 : i32
    %81 = arith.cmpi slt, %77, %c4_i32_64 : i32
    %82 = arith.andi %80, %81 : i1
    %c0_65 = arith.constant 0 : index
    %83 = arith.index_cast %79 : i32 to index
    %c0_66 = arith.constant 0 : index
    %c0_67 = arith.constant 0 : index
    %84 = vector.load %arg2[%c0_65, %83, %c0_66, %c0_67] : memref<1x4x8x256xbf16, #tpu.memory_space<vmem>>, vector<1x1x8x256xbf16>
    %85 = vector.shape_cast %84 : vector<1x1x8x256xbf16> to vector<1x8x256xbf16>
    %cst_68 = arith.constant 1.000000e+00 : f32
    %cst_69 = arith.constant 0.000000e+00 : f32
    %86 = arith.select %82, %cst_68, %cst_69 : f32
    %87 = arith.truncf %86 : f32 to bf16
    %88 = vector.broadcast %87 : bf16 to vector<1x8x256xbf16>
    %89 = arith.mulf %85, %88 : vector<1x8x256xbf16>
    %c5 = arith.constant 5 : index
    %c0_70 = arith.constant 0 : index
    %c0_71 = arith.constant 0 : index
    %90 = vector.load %arg9[%c5, %c0_70, %c0_71] : memref<6x8x256xbf16, #tpu.memory_space<vmem>>, vector<1x8x256xbf16>
    tpu.vector_store %arg9[%c5, %c0_70, %c0_71], %89 {strides = array<i32>} : memref<6x8x256xbf16, #tpu.memory_space<vmem>>, vector<1x8x256xbf16>,
    %c0_72 = arith.constant 0 : index
    %c0_73 = arith.constant 0 : index
    %c0_74 = arith.constant 0 : index
    %91 = vector.load %arg9[%c0_72, %c0_73, %c0_74] : memref<6x8x256xbf16, #tpu.memory_space<vmem>>, vector<6x8x256xbf16>
    %92 = vector.shape_cast %91 : vector<6x8x256xbf16> to vector<48x256xbf16>
    %cst_75 = arith.constant 0.000000e+00 : f32
    %93 = vector.broadcast %cst_75 : f32 to vector<4x8x256xf32>
    %c0_76 = arith.constant 0 : index
    %c0_77 = arith.constant 0 : index
    %c0_78 = arith.constant 0 : index
    %94 = vector.load %arg10[%c0_76, %c0_77, %c0_78] : memref<4x8x256xf32, #tpu.memory_space<vmem>>, vector<4x8x256xf32>
    tpu.vector_store %arg10[%c0_76, %c0_77, %c0_78], %93 {strides = array<i32>} : memref<4x8x256xf32, #tpu.memory_space<vmem>>, vector<4x8x256xf32>,
    %c0_79 = arith.constant 0 : index
    %c0_80 = arith.constant 0 : index
    %c0_81 = arith.constant 0 : index
    %c0_82 = arith.constant 0 : index
    %95 = vector.load %arg3[%c0_79, %c0_80, %c0_81, %c0_82] : memref<3x3x256x256xbf16, #tpu.memory_space<vmem>>, vector<1x1x256x256xbf16>
    %96 = vector.shape_cast %95 : vector<1x1x256x256xbf16> to vector<256x256xbf16>
    %cst_83 = arith.constant dense<0.000000e+00> : vector<48x256xf32>
    %97 = tpu.matmul %92, %96, %cst_83 {dimension_numbers = #tpu.dot_dimension_numbers<[1], [0], [0], [1], [0, 0, 1, 1], [], []>} : vector<48x256xbf16>, vector<256x256xbf16>, vector<48x256xf32> -> vector<48x256xf32>
    %98 = vector.shape_cast %97 : vector<48x256xf32> to vector<6x8x256xf32>
    %99 = vector.extract_strided_slice %98 {offsets = [0, 0, 0], sizes = [4, 8, 256], strides = [1, 1, 1]} : vector<6x8x256xf32> to vector<4x8x256xf32>
    %c0_84 = arith.constant 0 : index
    %c1_85 = arith.constant 1 : index
    %c0_86 = arith.constant 0 : index
    %100 = vector.load %arg10[%c0_84, %c1_85, %c0_86] : memref<4x8x256xf32, #tpu.memory_space<vmem>>, vector<4x7x256xf32>
    %101 = vector.extract_strided_slice %99 {offsets = [0, 0, 0], sizes = [4, 7, 256], strides = [1, 1, 1]} : vector<4x8x256xf32> to vector<4x7x256xf32>
    %102 = arith.addf %100, %101 : vector<4x7x256xf32>
    %c0_87 = arith.constant 0 : index
    %c1_88 = arith.constant 1 : index
    %c0_89 = arith.constant 0 : index
    %103 = vector.load %arg10[%c0_87, %c1_88, %c0_89] : memref<4x8x256xf32, #tpu.memory_space<vmem>>, vector<4x7x256xf32>
    tpu.vector_store %arg10[%c0_87, %c1_88, %c0_89], %102 {strides = array<i32>} : memref<4x8x256xf32, #tpu.memory_space<vmem>>, vector<4x7x256xf32>,
    %c0_90 = arith.constant 0 : index
    %c1_91 = arith.constant 1 : index
    %c0_92 = arith.constant 0 : index
    %c0_93 = arith.constant 0 : index
    %104 = vector.load %arg3[%c0_90, %c1_91, %c0_92, %c0_93] : memref<3x3x256x256xbf16, #tpu.memory_space<vmem>>, vector<1x1x256x256xbf16>
    %105 = vector.shape_cast %104 : vector<1x1x256x256xbf16> to vector<256x256xbf16>
    %cst_94 = arith.constant dense<0.000000e+00> : vector<48x256xf32>
    %106 = tpu.matmul %92, %105, %cst_94 {dimension_numbers = #tpu.dot_dimension_numbers<[1], [0], [0], [1], [0, 0, 1, 1], [], []>} : vector<48x256xbf16>, vector<256x256xbf16>, vector<48x256xf32> -> vector<48x256xf32>
    %107 = vector.shape_cast %106 : vector<48x256xf32> to vector<6x8x256xf32>
    %108 = vector.extract_strided_slice %107 {offsets = [0, 0, 0], sizes = [4, 8, 256], strides = [1, 1, 1]} : vector<6x8x256xf32> to vector<4x8x256xf32>
    %c0_95 = arith.constant 0 : index
    %c0_96 = arith.constant 0 : index
    %c0_97 = arith.constant 0 : index
    %109 = vector.load %arg10[%c0_95, %c0_96, %c0_97] : memref<4x8x256xf32, #tpu.memory_space<vmem>>, vector<4x8x256xf32>
    %110 = arith.addf %109, %108 : vector<4x8x256xf32>
    %c0_98 = arith.constant 0 : index
    %c0_99 = arith.constant 0 : index
    %c0_100 = arith.constant 0 : index
    %111 = vector.load %arg10[%c0_98, %c0_99, %c0_100] : memref<4x8x256xf32, #tpu.memory_space<vmem>>, vector<4x8x256xf32>
    tpu.vector_store %arg10[%c0_98, %c0_99, %c0_100], %110 {strides = array<i32>} : memref<4x8x256xf32, #tpu.memory_space<vmem>>, vector<4x8x256xf32>,
    %c0_101 = arith.constant 0 : index
    %c2_102 = arith.constant 2 : index
    %c0_103 = arith.constant 0 : index
    %c0_104 = arith.constant 0 : index
    %112 = vector.load %arg3[%c0_101, %c2_102, %c0_103, %c0_104] : memref<3x3x256x256xbf16, #tpu.memory_space<vmem>>, vector<1x1x256x256xbf16>
    %113 = vector.shape_cast %112 : vector<1x1x256x256xbf16> to vector<256x256xbf16>
    %cst_105 = arith.constant dense<0.000000e+00> : vector<48x256xf32>
    %114 = tpu.matmul %92, %113, %cst_105 {dimension_numbers = #tpu.dot_dimension_numbers<[1], [0], [0], [1], [0, 0, 1, 1], [], []>} : vector<48x256xbf16>, vector<256x256xbf16>, vector<48x256xf32> -> vector<48x256xf32>
    %115 = vector.shape_cast %114 : vector<48x256xf32> to vector<6x8x256xf32>
    %116 = vector.extract_strided_slice %115 {offsets = [0, 0, 0], sizes = [4, 8, 256], strides = [1, 1, 1]} : vector<6x8x256xf32> to vector<4x8x256xf32>
    %c0_106 = arith.constant 0 : index
    %c0_107 = arith.constant 0 : index
    %c0_108 = arith.constant 0 : index
    %117 = vector.load %arg10[%c0_106, %c0_107, %c0_108] : memref<4x8x256xf32, #tpu.memory_space<vmem>>, vector<4x7x256xf32>
    %118 = vector.extract_strided_slice %116 {offsets = [0, 1, 0], sizes = [4, 7, 256], strides = [1, 1, 1]} : vector<4x8x256xf32> to vector<4x7x256xf32>
    %119 = arith.addf %117, %118 : vector<4x7x256xf32>
    %c0_109 = arith.constant 0 : index
    %c0_110 = arith.constant 0 : index
    %c0_111 = arith.constant 0 : index
    %120 = vector.load %arg10[%c0_109, %c0_110, %c0_111] : memref<4x8x256xf32, #tpu.memory_space<vmem>>, vector<4x7x256xf32>
    tpu.vector_store %arg10[%c0_109, %c0_110, %c0_111], %119 {strides = array<i32>} : memref<4x8x256xf32, #tpu.memory_space<vmem>>, vector<4x7x256xf32>,
    %c1_112 = arith.constant 1 : index
    %c0_113 = arith.constant 0 : index
    %c0_114 = arith.constant 0 : index
    %c0_115 = arith.constant 0 : index
    %121 = vector.load %arg3[%c1_112, %c0_113, %c0_114, %c0_115] : memref<3x3x256x256xbf16, #tpu.memory_space<vmem>>, vector<1x1x256x256xbf16>
    %122 = vector.shape_cast %121 : vector<1x1x256x256xbf16> to vector<256x256xbf16>
    %cst_116 = arith.constant dense<0.000000e+00> : vector<48x256xf32>
    %123 = tpu.matmul %92, %122, %cst_116 {dimension_numbers = #tpu.dot_dimension_numbers<[1], [0], [0], [1], [0, 0, 1, 1], [], []>} : vector<48x256xbf16>, vector<256x256xbf16>, vector<48x256xf32> -> vector<48x256xf32>
    %124 = vector.shape_cast %123 : vector<48x256xf32> to vector<6x8x256xf32>
    %125 = vector.extract_strided_slice %124 {offsets = [1, 0, 0], sizes = [4, 8, 256], strides = [1, 1, 1]} : vector<6x8x256xf32> to vector<4x8x256xf32>
    %c0_117 = arith.constant 0 : index
    %c1_118 = arith.constant 1 : index
    %c0_119 = arith.constant 0 : index
    %126 = vector.load %arg10[%c0_117, %c1_118, %c0_119] : memref<4x8x256xf32, #tpu.memory_space<vmem>>, vector<4x7x256xf32>
    %127 = vector.extract_strided_slice %125 {offsets = [0, 0, 0], sizes = [4, 7, 256], strides = [1, 1, 1]} : vector<4x8x256xf32> to vector<4x7x256xf32>
    %128 = arith.addf %126, %127 : vector<4x7x256xf32>
    %c0_120 = arith.constant 0 : index
    %c1_121 = arith.constant 1 : index
    %c0_122 = arith.constant 0 : index
    %129 = vector.load %arg10[%c0_120, %c1_121, %c0_122] : memref<4x8x256xf32, #tpu.memory_space<vmem>>, vector<4x7x256xf32>
    tpu.vector_store %arg10[%c0_120, %c1_121, %c0_122], %128 {strides = array<i32>} : memref<4x8x256xf32, #tpu.memory_space<vmem>>, vector<4x7x256xf32>,
    %c1_123 = arith.constant 1 : index
    %c1_124 = arith.constant 1 : index
    %c0_125 = arith.constant 0 : index
    %c0_126 = arith.constant 0 : index
    %130 = vector.load %arg3[%c1_123, %c1_124, %c0_125, %c0_126] : memref<3x3x256x256xbf16, #tpu.memory_space<vmem>>, vector<1x1x256x256xbf16>
    %131 = vector.shape_cast %130 : vector<1x1x256x256xbf16> to vector<256x256xbf16>
    %cst_127 = arith.constant dense<0.000000e+00> : vector<48x256xf32>
    %132 = tpu.matmul %92, %131, %cst_127 {dimension_numbers = #tpu.dot_dimension_numbers<[1], [0], [0], [1], [0, 0, 1, 1], [], []>} : vector<48x256xbf16>, vector<256x256xbf16>, vector<48x256xf32> -> vector<48x256xf32>
    %133 = vector.shape_cast %132 : vector<48x256xf32> to vector<6x8x256xf32>
    %134 = vector.extract_strided_slice %133 {offsets = [1, 0, 0], sizes = [4, 8, 256], strides = [1, 1, 1]} : vector<6x8x256xf32> to vector<4x8x256xf32>
    %c0_128 = arith.constant 0 : index
    %c0_129 = arith.constant 0 : index
    %c0_130 = arith.constant 0 : index
    %135 = vector.load %arg10[%c0_128, %c0_129, %c0_130] : memref<4x8x256xf32, #tpu.memory_space<vmem>>, vector<4x8x256xf32>
    %136 = arith.addf %135, %134 : vector<4x8x256xf32>
    %c0_131 = arith.constant 0 : index
    %c0_132 = arith.constant 0 : index
    %c0_133 = arith.constant 0 : index
    %137 = vector.load %arg10[%c0_131, %c0_132, %c0_133] : memref<4x8x256xf32, #tpu.memory_space<vmem>>, vector<4x8x256xf32>
    tpu.vector_store %arg10[%c0_131, %c0_132, %c0_133], %136 {strides = array<i32>} : memref<4x8x256xf32, #tpu.memory_space<vmem>>, vector<4x8x256xf32>,
    %c1_134 = arith.constant 1 : index
    %c2_135 = arith.constant 2 : index
    %c0_136 = arith.constant 0 : index
    %c0_137 = arith.constant 0 : index
    %138 = vector.load %arg3[%c1_134, %c2_135, %c0_136, %c0_137] : memref<3x3x256x256xbf16, #tpu.memory_space<vmem>>, vector<1x1x256x256xbf16>
    %139 = vector.shape_cast %138 : vector<1x1x256x256xbf16> to vector<256x256xbf16>
    %cst_138 = arith.constant dense<0.000000e+00> : vector<48x256xf32>
    %140 = tpu.matmul %92, %139, %cst_138 {dimension_numbers = #tpu.dot_dimension_numbers<[1], [0], [0], [1], [0, 0, 1, 1], [], []>} : vector<48x256xbf16>, vector<256x256xbf16>, vector<48x256xf32> -> vector<48x256xf32>
    %141 = vector.shape_cast %140 : vector<48x256xf32> to vector<6x8x256xf32>
    %142 = vector.extract_strided_slice %141 {offsets = [1, 0, 0], sizes = [4, 8, 256], strides = [1, 1, 1]} : vector<6x8x256xf32> to vector<4x8x256xf32>
    %c0_139 = arith.constant 0 : index
    %c0_140 = arith.constant 0 : index
    %c0_141 = arith.constant 0 : index
    %143 = vector.load %arg10[%c0_139, %c0_140, %c0_141] : memref<4x8x256xf32, #tpu.memory_space<vmem>>, vector<4x7x256xf32>
    %144 = vector.extract_strided_slice %142 {offsets = [0, 1, 0], sizes = [4, 7, 256], strides = [1, 1, 1]} : vector<4x8x256xf32> to vector<4x7x256xf32>
    %145 = arith.addf %143, %144 : vector<4x7x256xf32>
    %c0_142 = arith.constant 0 : index
    %c0_143 = arith.constant 0 : index
    %c0_144 = arith.constant 0 : index
    %146 = vector.load %arg10[%c0_142, %c0_143, %c0_144] : memref<4x8x256xf32, #tpu.memory_space<vmem>>, vector<4x7x256xf32>
    tpu.vector_store %arg10[%c0_142, %c0_143, %c0_144], %145 {strides = array<i32>} : memref<4x8x256xf32, #tpu.memory_space<vmem>>, vector<4x7x256xf32>,
    %c2_145 = arith.constant 2 : index
    %c0_146 = arith.constant 0 : index
    %c0_147 = arith.constant 0 : index
    %c0_148 = arith.constant 0 : index
    %147 = vector.load %arg3[%c2_145, %c0_146, %c0_147, %c0_148] : memref<3x3x256x256xbf16, #tpu.memory_space<vmem>>, vector<1x1x256x256xbf16>
    %148 = vector.shape_cast %147 : vector<1x1x256x256xbf16> to vector<256x256xbf16>
    %cst_149 = arith.constant dense<0.000000e+00> : vector<48x256xf32>
    %149 = tpu.matmul %92, %148, %cst_149 {dimension_numbers = #tpu.dot_dimension_numbers<[1], [0], [0], [1], [0, 0, 1, 1], [], []>} : vector<48x256xbf16>, vector<256x256xbf16>, vector<48x256xf32> -> vector<48x256xf32>
    %150 = vector.shape_cast %149 : vector<48x256xf32> to vector<6x8x256xf32>
    %151 = vector.extract_strided_slice %150 {offsets = [2, 0, 0], sizes = [4, 8, 256], strides = [1, 1, 1]} : vector<6x8x256xf32> to vector<4x8x256xf32>
    %c0_150 = arith.constant 0 : index
    %c1_151 = arith.constant 1 : index
    %c0_152 = arith.constant 0 : index
    %152 = vector.load %arg10[%c0_150, %c1_151, %c0_152] : memref<4x8x256xf32, #tpu.memory_space<vmem>>, vector<4x7x256xf32>
    %153 = vector.extract_strided_slice %151 {offsets = [0, 0, 0], sizes = [4, 7, 256], strides = [1, 1, 1]} : vector<4x8x256xf32> to vector<4x7x256xf32>
    %154 = arith.addf %152, %153 : vector<4x7x256xf32>
    %c0_153 = arith.constant 0 : index
    %c1_154 = arith.constant 1 : index
    %c0_155 = arith.constant 0 : index
    %155 = vector.load %arg10[%c0_153, %c1_154, %c0_155] : memref<4x8x256xf32, #tpu.memory_space<vmem>>, vector<4x7x256xf32>
    tpu.vector_store %arg10[%c0_153, %c1_154, %c0_155], %154 {strides = array<i32>} : memref<4x8x256xf32, #tpu.memory_space<vmem>>, vector<4x7x256xf32>,
    %c2_156 = arith.constant 2 : index
    %c1_157 = arith.constant 1 : index
    %c0_158 = arith.constant 0 : index
    %c0_159 = arith.constant 0 : index
    %156 = vector.load %arg3[%c2_156, %c1_157, %c0_158, %c0_159] : memref<3x3x256x256xbf16, #tpu.memory_space<vmem>>, vector<1x1x256x256xbf16>
    %157 = vector.shape_cast %156 : vector<1x1x256x256xbf16> to vector<256x256xbf16>
    %cst_160 = arith.constant dense<0.000000e+00> : vector<48x256xf32>
    %158 = tpu.matmul %92, %157, %cst_160 {dimension_numbers = #tpu.dot_dimension_numbers<[1], [0], [0], [1], [0, 0, 1, 1], [], []>} : vector<48x256xbf16>, vector<256x256xbf16>, vector<48x256xf32> -> vector<48x256xf32>
    %159 = vector.shape_cast %158 : vector<48x256xf32> to vector<6x8x256xf32>
    %160 = vector.extract_strided_slice %159 {offsets = [2, 0, 0], sizes = [4, 8, 256], strides = [1, 1, 1]} : vector<6x8x256xf32> to vector<4x8x256xf32>
    %c0_161 = arith.constant 0 : index
    %c0_162 = arith.constant 0 : index
    %c0_163 = arith.constant 0 : index
    %161 = vector.load %arg10[%c0_161, %c0_162, %c0_163] : memref<4x8x256xf32, #tpu.memory_space<vmem>>, vector<4x8x256xf32>
    %162 = arith.addf %161, %160 : vector<4x8x256xf32>
    %c0_164 = arith.constant 0 : index
    %c0_165 = arith.constant 0 : index
    %c0_166 = arith.constant 0 : index
    %163 = vector.load %arg10[%c0_164, %c0_165, %c0_166] : memref<4x8x256xf32, #tpu.memory_space<vmem>>, vector<4x8x256xf32>
    tpu.vector_store %arg10[%c0_164, %c0_165, %c0_166], %162 {strides = array<i32>} : memref<4x8x256xf32, #tpu.memory_space<vmem>>, vector<4x8x256xf32>,
    %c2_167 = arith.constant 2 : index
    %c2_168 = arith.constant 2 : index
    %c0_169 = arith.constant 0 : index
    %c0_170 = arith.constant 0 : index
    %164 = vector.load %arg3[%c2_167, %c2_168, %c0_169, %c0_170] : memref<3x3x256x256xbf16, #tpu.memory_space<vmem>>, vector<1x1x256x256xbf16>
    %165 = vector.shape_cast %164 : vector<1x1x256x256xbf16> to vector<256x256xbf16>
    %cst_171 = arith.constant dense<0.000000e+00> : vector<48x256xf32>
    %166 = tpu.matmul %92, %165, %cst_171 {dimension_numbers = #tpu.dot_dimension_numbers<[1], [0], [0], [1], [0, 0, 1, 1], [], []>} : vector<48x256xbf16>, vector<256x256xbf16>, vector<48x256xf32> -> vector<48x256xf32>
    %167 = vector.shape_cast %166 : vector<48x256xf32> to vector<6x8x256xf32>
    %168 = vector.extract_strided_slice %167 {offsets = [2, 0, 0], sizes = [4, 8, 256], strides = [1, 1, 1]} : vector<6x8x256xf32> to vector<4x8x256xf32>
    %c0_172 = arith.constant 0 : index
    %c0_173 = arith.constant 0 : index
    %c0_174 = arith.constant 0 : index
    %169 = vector.load %arg10[%c0_172, %c0_173, %c0_174] : memref<4x8x256xf32, #tpu.memory_space<vmem>>, vector<4x7x256xf32>
    %170 = vector.extract_strided_slice %168 {offsets = [0, 1, 0], sizes = [4, 7, 256], strides = [1, 1, 1]} : vector<4x8x256xf32> to vector<4x7x256xf32>
    %171 = arith.addf %169, %170 : vector<4x7x256xf32>
    %c0_175 = arith.constant 0 : index
    %c0_176 = arith.constant 0 : index
    %c0_177 = arith.constant 0 : index
    %172 = vector.load %arg10[%c0_175, %c0_176, %c0_177] : memref<4x8x256xf32, #tpu.memory_space<vmem>>, vector<4x7x256xf32>
    tpu.vector_store %arg10[%c0_175, %c0_176, %c0_177], %171 {strides = array<i32>} : memref<4x8x256xf32, #tpu.memory_space<vmem>>, vector<4x7x256xf32>,
    %c0_178 = arith.constant 0 : index
    %c0_179 = arith.constant 0 : index
    %c0_180 = arith.constant 0 : index
    %173 = vector.load %arg10[%c0_178, %c0_179, %c0_180] : memref<4x8x256xf32, #tpu.memory_space<vmem>>, vector<4x8x256xf32>
    %c0_181 = arith.constant 0 : index
    %c0_182 = arith.constant 0 : index
    %174 = vector.load %arg4[%c0_181, %c0_182] : memref<1x256xf32, #tpu.memory_space<vmem>>, vector<1x256xf32>
    %175 = vector.shape_cast %174 : vector<1x256xf32> to vector<1x1x256xf32>
    %176 = vector.broadcast %175 : vector<1x1x256xf32> to vector<4x8x256xf32>
    %177 = arith.mulf %173, %176 : vector<4x8x256xf32>
    %c0_183 = arith.constant 0 : index
    %c0_184 = arith.constant 0 : index
    %178 = vector.load %arg5[%c0_183, %c0_184] : memref<1x256xf32, #tpu.memory_space<vmem>>, vector<1x256xf32>
    %179 = vector.shape_cast %178 : vector<1x256xf32> to vector<1x1x256xf32>
    %180 = vector.broadcast %179 : vector<1x1x256xf32> to vector<4x8x256xf32>
    %181 = arith.addf %177, %180 : vector<4x8x256xf32>
    %cst_185 = arith.constant 0.000000e+00 : f32
    %182 = vector.broadcast %cst_185 : f32 to vector<4x8x256xf32>
    %183 = arith.maximumf %181, %182 : vector<4x8x256xf32>
    %184 = arith.truncf %183 : vector<4x8x256xf32> to vector<4x8x256xbf16>
    %185 = vector.shape_cast %184 : vector<4x8x256xbf16> to vector<32x256xbf16>
    %c0_186 = arith.constant 0 : index
    %c0_187 = arith.constant 0 : index
    %c0_188 = arith.constant 0 : index
    %c0_189 = arith.constant 0 : index
    %186 = vector.load %arg7[%c0_186, %c0_187, %c0_188, %c0_189] : memref<1x4x8x256xf32, #tpu.memory_space<vmem>>, vector<1x4x8x256xf32>
    %c0_190 = arith.constant 0 : index
    %c0_191 = arith.constant 0 : index
    %c0_192 = arith.constant 0 : index
    %c0_193 = arith.constant 0 : index
    %187 = vector.load %arg8[%c0_190, %c0_191, %c0_192, %c0_193] : memref<1x4x8x256xf32, #tpu.memory_space<vmem>>, vector<1x4x8x256xf32>
    tpu.vector_store %arg8[%c0_190, %c0_191, %c0_192, %c0_193], %186 {strides = array<i32>} : memref<1x4x8x256xf32, #tpu.memory_space<vmem>>, vector<1x4x8x256xf32>,
    %c0_194 = arith.constant 0 : index
    %c0_195 = arith.constant 0 : index
    %c0_196 = arith.constant 0 : index
    %188 = vector.load %arg6[%c0_194, %c0_195, %c0_196] : memref<3x256x256xbf16, #tpu.memory_space<vmem>>, vector<1x256x256xbf16>
    %189 = vector.shape_cast %188 : vector<1x256x256xbf16> to vector<256x256xbf16>
    %cst_197 = arith.constant dense<0.000000e+00> : vector<32x256xf32>
    %190 = tpu.matmul %185, %189, %cst_197 {dimension_numbers = #tpu.dot_dimension_numbers<[1], [0], [0], [1], [0, 0, 1, 1], [], []>} : vector<32x256xbf16>, vector<256x256xbf16>, vector<32x256xf32> -> vector<32x256xf32>
    %191 = vector.shape_cast %190 : vector<32x256xf32> to vector<1x4x8x256xf32>
    %c0_198 = arith.constant 0 : index
    %c0_199 = arith.constant 0 : index
    %c1_200 = arith.constant 1 : index
    %c0_201 = arith.constant 0 : index
    %192 = vector.load %arg8[%c0_198, %c0_199, %c1_200, %c0_201] : memref<1x4x8x256xf32, #tpu.memory_space<vmem>>, vector<1x4x7x256xf32>
    %193 = vector.extract_strided_slice %191 {offsets = [0, 0, 0, 0], sizes = [1, 4, 7, 256], strides = [1, 1, 1, 1]} : vector<1x4x8x256xf32> to vector<1x4x7x256xf32>
    %194 = arith.addf %192, %193 : vector<1x4x7x256xf32>
    %c0_202 = arith.constant 0 : index
    %c0_203 = arith.constant 0 : index
    %c1_204 = arith.constant 1 : index
    %c0_205 = arith.constant 0 : index
    %195 = vector.load %arg8[%c0_202, %c0_203, %c1_204, %c0_205] : memref<1x4x8x256xf32, #tpu.memory_space<vmem>>, vector<1x4x7x256xf32>
    tpu.vector_store %arg8[%c0_202, %c0_203, %c1_204, %c0_205], %194 {strides = array<i32>} : memref<1x4x8x256xf32, #tpu.memory_space<vmem>>, vector<1x4x7x256xf32>,
    %c1_206 = arith.constant 1 : index
    %c0_207 = arith.constant 0 : index
    %c0_208 = arith.constant 0 : index
    %196 = vector.load %arg6[%c1_206, %c0_207, %c0_208] : memref<3x256x256xbf16, #tpu.memory_space<vmem>>, vector<1x256x256xbf16>
    %197 = vector.shape_cast %196 : vector<1x256x256xbf16> to vector<256x256xbf16>
    %cst_209 = arith.constant dense<0.000000e+00> : vector<32x256xf32>
    %198 = tpu.matmul %185, %197, %cst_209 {dimension_numbers = #tpu.dot_dimension_numbers<[1], [0], [0], [1], [0, 0, 1, 1], [], []>} : vector<32x256xbf16>, vector<256x256xbf16>, vector<32x256xf32> -> vector<32x256xf32>
    %199 = vector.shape_cast %198 : vector<32x256xf32> to vector<1x4x8x256xf32>
    %c0_210 = arith.constant 0 : index
    %c0_211 = arith.constant 0 : index
    %c0_212 = arith.constant 0 : index
    %c0_213 = arith.constant 0 : index
    %200 = vector.load %arg8[%c0_210, %c0_211, %c0_212, %c0_213] : memref<1x4x8x256xf32, #tpu.memory_space<vmem>>, vector<1x4x8x256xf32>
    %201 = arith.addf %200, %199 : vector<1x4x8x256xf32>
    %c0_214 = arith.constant 0 : index
    %c0_215 = arith.constant 0 : index
    %c0_216 = arith.constant 0 : index
    %c0_217 = arith.constant 0 : index
    %202 = vector.load %arg8[%c0_214, %c0_215, %c0_216, %c0_217] : memref<1x4x8x256xf32, #tpu.memory_space<vmem>>, vector<1x4x8x256xf32>
    tpu.vector_store %arg8[%c0_214, %c0_215, %c0_216, %c0_217], %201 {strides = array<i32>} : memref<1x4x8x256xf32, #tpu.memory_space<vmem>>, vector<1x4x8x256xf32>,
    %c2_218 = arith.constant 2 : index
    %c0_219 = arith.constant 0 : index
    %c0_220 = arith.constant 0 : index
    %203 = vector.load %arg6[%c2_218, %c0_219, %c0_220] : memref<3x256x256xbf16, #tpu.memory_space<vmem>>, vector<1x256x256xbf16>
    %204 = vector.shape_cast %203 : vector<1x256x256xbf16> to vector<256x256xbf16>
    %cst_221 = arith.constant dense<0.000000e+00> : vector<32x256xf32>
    %205 = tpu.matmul %185, %204, %cst_221 {dimension_numbers = #tpu.dot_dimension_numbers<[1], [0], [0], [1], [0, 0, 1, 1], [], []>} : vector<32x256xbf16>, vector<256x256xbf16>, vector<32x256xf32> -> vector<32x256xf32>
    %206 = vector.shape_cast %205 : vector<32x256xf32> to vector<1x4x8x256xf32>
    %c0_222 = arith.constant 0 : index
    %c0_223 = arith.constant 0 : index
    %c0_224 = arith.constant 0 : index
    %c0_225 = arith.constant 0 : index
    %207 = vector.load %arg8[%c0_222, %c0_223, %c0_224, %c0_225] : memref<1x4x8x256xf32, #tpu.memory_space<vmem>>, vector<1x4x7x256xf32>
    %208 = vector.extract_strided_slice %206 {offsets = [0, 0, 1, 0], sizes = [1, 4, 7, 256], strides = [1, 1, 1, 1]} : vector<1x4x8x256xf32> to vector<1x4x7x256xf32>
    %209 = arith.addf %207, %208 : vector<1x4x7x256xf32>
    %c0_226 = arith.constant 0 : index
    %c0_227 = arith.constant 0 : index
    %c0_228 = arith.constant 0 : index
    %c0_229 = arith.constant 0 : index
    %210 = vector.load %arg8[%c0_226, %c0_227, %c0_228, %c0_229] : memref<1x4x8x256xf32, #tpu.memory_space<vmem>>, vector<1x4x7x256xf32>
    tpu.vector_store %arg8[%c0_226, %c0_227, %c0_228, %c0_229], %209 {strides = array<i32>} : memref<1x4x8x256xf32, #tpu.memory_space<vmem>>, vector<1x4x7x256xf32>,
    return
  }
  func.func @transform_0(%arg0: i32, %arg1: i32) -> (i32, i32, i32, i32) {
    %c0_i32 = arith.constant 0 : i32
    %c0_i32_0 = arith.constant 0 : i32
    %c0_i32_1 = arith.constant 0 : i32
    %c0_i32_2 = arith.constant 0 : i32
    return %arg0, %c0_i32, %c0_i32_0, %c0_i32_1 : i32, i32, i32, i32
  }
  func.func @transform_1(%arg0: i32, %arg1: i32) -> (i32, i32, i32, i32) {
    %c0_i32 = arith.constant 0 : i32
    %c0_i32_0 = arith.constant 0 : i32
    %c0_i32_1 = arith.constant 0 : i32
    %c0_i32_2 = arith.constant 0 : i32
    %c0_i32_3 = arith.constant 0 : i32
    return %c0_i32, %c0_i32_0, %c0_i32_1, %c0_i32_2 : i32, i32, i32, i32
  }
  func.func @transform_2(%arg0: i32, %arg1: i32) -> (i32, i32) {
    %c0_i32 = arith.constant 0 : i32
    %c0_i32_0 = arith.constant 0 : i32
    %c0_i32_1 = arith.constant 0 : i32
    return %c0_i32, %c0_i32_0 : i32, i32
  }
  func.func @transform_3(%arg0: i32, %arg1: i32) -> (i32, i32) {
    %c0_i32 = arith.constant 0 : i32
    %c0_i32_0 = arith.constant 0 : i32
    %c0_i32_1 = arith.constant 0 : i32
    return %c0_i32, %c0_i32_0 : i32, i32
  }
  func.func @transform_4(%arg0: i32, %arg1: i32) -> (i32, i32, i32) {
    %c0_i32 = arith.constant 0 : i32
    %c0_i32_0 = arith.constant 0 : i32
    %c0_i32_1 = arith.constant 0 : i32
    %c0_i32_2 = arith.constant 0 : i32
    return %c0_i32, %c0_i32_0, %c0_i32_1 : i32, i32, i32
  }
  func.func @transform_5(%arg0: i32, %arg1: i32) -> (i32, i32, i32, i32) {
    %c0_i32 = arith.constant 0 : i32
    %c0_i32_0 = arith.constant 0 : i32
    %c0_i32_1 = arith.constant 0 : i32
    return %arg0, %arg1, %c0_i32, %c0_i32_0 : i32, i32, i32, i32
  }
  func.func @transform_6(%arg0: i32, %arg1: i32) -> (i32, i32, i32, i32) {
    %c0_i32 = arith.constant 0 : i32
    %c0_i32_0 = arith.constant 0 : i32
    %c0_i32_1 = arith.constant 0 : i32
    return %arg0, %arg1, %c0_i32, %c0_i32_0 : i32, i32, i32, i32
  }
}

</mosaic_0001>

<bundles_post_ra>
// kernel: tile.43
= control target key start
LH: loop header
LB: loop body
LE: loop exit
PB: predicated region body
PF: predicated region fallthrough
CT: control target
= control target key end

     0   :  { %s22_s0 = inlined_call_operand.vmem [shape: f32[32], index: 0, kind: input, shape index: {}]   ;;  %s23_s1 = inlined_call_operand.vmem [shape: f32[4,32], index: 1, kind: output, shape index: {}]  }
   0x1   :  { %v4_v0 = vld [vmem:[%s22_s0] ss:$0 sm:$0xff] }
   0x2   :  { %5 = vst [vmem:[%s23_s1] sm:$0xf] %v4_v0 }

// kernel: tile.44
= control target key start
LH: loop header
LB: loop body
LE: loop exit
PB: predicated region body
PF: predicated region fallthrough
CT: control target
= control target key end

     0   :  { %vm8_vm0 = vcmask 261120   ;;  %s40_s8 = smov 32   ;;  %s41_s9 = smov 64   ;;  %vm14_vm1 = vcmask 1048320   ;;  %vm20_vm2 = vcmask 785920   ;;  %vm26_vm3 = vcmask 523520   ;;  %s58_s0 = inlined_call_operand.vmem [shape: f32[4,32], index: 0, kind: input, shape index: {}]   ;;  %s59_s1 = inlined_call_operand.vmem [shape: f32[1,128], index: 1, kind: output, shape index: {}]  }
   0x1   :  { %v5_v0 = vld [vmem:[%s58_s0] sm:$0xf]  ;;  %s39_s0 = smov 96  }
   0x2   :  { %6 = vst [vmem:[#allocation1] sm:$0xf] %v5_v0 }
   0x9   :  { %v11_v1 = vld [vmem:[#allocation1 + $0x3] sm:$0x1]   ;;  %v23_v2 = vld [vmem:[#allocation1 + $0x1] sm:$0x1]   ;;  %v7_v3 = vld [vmem:[#allocation1] sm:$0x1]  }
   0xa   :  { %12 = vrot.lane.b32.xlu0 %v11_v1, %s39_s0  ;;  %24 = vrot.lane.b32.xlu1 %v23_v2, %s40_s8  ;;  %v17_v4 = vld [vmem:[#allocation1 + $0x2] sm:$0x1]   ;;  %9 = vst.msk [vmem:[#allocation0] sm:$0x1] %vm8_vm0, %v7_v3  }
   0xe   :  { %18 = vrot.lane.b32.xlu0 %v17_v4, %s41_s9 }
  0x7c   :  { %v13_v5 = vpop.permute.xlu0 %12   ;;  %v25_v6 = vpop.permute.xlu1 %24  }
  0x7d   :  { %15 = vst.msk [vmem:[#allocation0] sm:$0x1] %vm14_vm1, %v13_v5  }
  0x80   :  { %v19_v7 = vpop.permute.xlu0 %18  }
  0x81   :  { %21 = vst.msk [vmem:[#allocation0] sm:$0x1] %vm20_vm2, %v19_v7  }
  0x82   :  { %27 = vst.msk [vmem:[#allocation0] sm:$0x1] %vm26_vm3, %v25_v6  }
  0x89   :  { %v32_v8 = vld [vmem:[#allocation0] sm:$0x1] }
  0x8a   :  { %35 = vst [vmem:[%s59_s1] sm:$0x1] %v32_v8 }

// kernel: tile.53
= control target key start
LH: loop header
LB: loop body
LE: loop exit
PB: predicated region body
PF: predicated region fallthrough
CT: control target
= control target key end

     0   :  { %s22_s0 = inlined_call_operand.vmem [shape: f32[8], index: 0, kind: input, shape index: {}]   ;;  %s23_s1 = inlined_call_operand.vmem [shape: f32[4,8], index: 1, kind: output, shape index: {}]  }
   0x1   :  { %v4_v0 = vld [vmem:[%s22_s0] ss:$0 sm:$0xff] }
   0x2   :  { %5 = vst [vmem:[%s23_s1] sm:$0xf] %v4_v0 }

// kernel: tile.54
= control target key start
LH: loop header
LB: loop body
LE: loop exit
PB: predicated region body
PF: predicated region fallthrough
CT: control target
= control target key end

     0   :  { %vm8_vm0 = vcmask 64512   ;;  %s40_s8 = smov 8   ;;  %s41_s9 = smov 16   ;;  %vm14_vm1 = vcmask 261312   ;;  %vm20_vm2 = vcmask 195712   ;;  %vm26_vm3 = vcmask 130112   ;;  %s58_s0 = inlined_call_operand.vmem [shape: f32[4,8], index: 0, kind: input, shape index: {}]   ;;  %s59_s1 = inlined_call_operand.vmem [shape: f32[1,32], index: 1, kind: output, shape index: {}]  }
   0x1   :  { %v5_v0 = vld [vmem:[%s58_s0] sm:$0xf]  ;;  %s39_s0 = smov 24  }
   0x2   :  { %6 = vst [vmem:[#allocation1] sm:$0xf] %v5_v0 }
   0x9   :  { %v11_v1 = vld [vmem:[#allocation1 + $0x3] sm:$0x1]   ;;  %v23_v2 = vld [vmem:[#allocation1 + $0x1] sm:$0x1]   ;;  %v7_v3 = vld [vmem:[#allocation1] sm:$0x1]  }
   0xa   :  { %12 = vrot.lane.b32.xlu0 %v11_v1, %s39_s0  ;;  %24 = vrot.lane.b32.xlu1 %v23_v2, %s40_s8  ;;  %v17_v4 = vld [vmem:[#allocation1 + $0x2] sm:$0x1]   ;;  %9 = vst.msk [vmem:[#allocation0] sm:$0x1] %vm8_vm0, %v7_v3  }
   0xe   :  { %18 = vrot.lane.b32.xlu0 %v17_v4, %s41_s9 }
  0x7c   :  { %v13_v5 = vpop.permute.xlu0 %12   ;;  %v25_v6 = vpop.permute.xlu1 %24  }
  0x7d   :  { %15 = vst.msk [vmem:[#allocation0] sm:$0x1] %vm14_vm1, %v13_v5  }
  0x80   :  { %v19_v7 = vpop.permute.xlu0 %18  }
  0x81   :  { %21 = vst.msk [vmem:[#allocation0] sm:$0x1] %vm20_vm2, %v19_v7  }
  0x82   :  { %27 = vst.msk [vmem:[#allocation0] sm:$0x1] %vm26_vm3, %v25_v6  }
  0x89   :  { %v32_v8 = vld [vmem:[#allocation0] sm:$0x1] }
  0x8a   :  { %35 = vst [vmem:[%s59_s1] sm:$0x1] %v32_v8 }

// kernel: tile.73
= control target key start
LH: loop header
LB: loop body
LE: loop exit
PB: predicated region body
PF: predicated region fallthrough
CT: control target
= control target key end

     0   :  { %s22_s0 = inlined_call_operand.vmem [shape: f32[32], index: 0, kind: input, shape index: {}]   ;;  %s23_s1 = inlined_call_operand.vmem [shape: f32[8,32], index: 1, kind: output, shape index: {}]  }
   0x1   :  { %v4_v0 = vld [vmem:[%s22_s0] ss:$0 sm:$0xff] }
   0x2   :  { %5 = vst [vmem:[%s23_s1] sm:$0xff] %v4_v0 }

// kernel: mf_unit_forward.2
= control target key start
LH: loop header
LB: loop body
LE: loop exit
PB: predicated region body
PF: predicated region fallthrough
CT: control target
= control target key end

     0   :  { %s994_s30 = smov 0   ;;  %s1109_s0 = inlined_call_operand.vmem [shape: f32[128,128], index: 0, kind: input, shape index: {}]   ;;  %s1110_s1 = inlined_call_operand.vmem [shape: f32[1,128], index: 1, kind: input, shape index: {}]   ;;  %s1111_s2 = inlined_call_operand.vmem [shape: f32[1,128], index: 2, kind: input, shape index: {}]   ;;  %s1112_s3 = inlined_call_operand.vmem [shape: bf16[128,32], index: 3, kind: input, shape index: {}]   ;;  %s1113_s4 = inlined_call_operand.vmem [shape: f32[1,32], index: 4, kind: input, shape index: {}]   ;;  %s1114_s5 = inlined_call_operand.vmem [shape: f32[1,32], index: 5, kind: input, shape index: {}]   ;;  %s1115_s6 = inlined_call_operand.vmem [shape: bf16[32,128], index: 6, kind: input, shape index: {}]   ;;  %s1116_s7 = inlined_call_operand.vmem [shape: f32[1,128], index: 7, kind: input, shape index: {}]   ;;  %s1117_s8 = inlined_call_operand.vmem [shape: f32[1,128], index: 8, kind: input, shape index: {}]   ;;  %s1118_s9 = inlined_call_operand.vmem [shape: bf16[128,128], index: 9, kind: output, shape index: {}]  }
   0x1 LB: > { %s794_s10 = sadd.s32 4294967295, %s942_s30   ;;  %p798_p0 = scmp.ge.s32.totalorder %s942_s30, 1  ;;  %s942_s30 = sphi %s994_s30, %s19_s30  }
   0x2   : > { %p288_p1 = scmp.lt.s32.totalorder %s942_s30, 3 }
   0x4   : > { %p289_p2 = pnand %p798_p0, %p288_p1 }
   0x5   : > { %s799_s13 = sshll.u32 (!%p289_p2), %s794_s10, 3 }
   0x6   : > { %292 = sbr.rel (%p289_p2) target bundleno = 470 (0x1d6), region = 56  ;;  %p325_p3 = scmp.lt.s32.totalorder (!%p289_p2), %s799_s13, 15 }
   0xb   : > { %v926_v0 = vld [vmem:[%s1112_s3 + $0x38] sm:$0xff]   ;;  %v927_v1 = vld [vmem:[%s1112_s3 + $0x30] sm:$0xff]   ;;  %s1120_s13 = smov (!%p325_p3, %s799_s13), 15  ;;  %v928_v2 = vld [vmem:[%s1112_s3 + $0x28] sm:$0xff]   ;;  %vm574_vm0 = vcmask 261120  }
   0xc   : > { %882 = vmatprep.subr.bf16.mxu0 %v926_v0  ;;  %s800_s18 = sshll.u32 %s1120_s13, 3  ;;  %v929_v3 = vld [vmem:[%s1112_s3 + $0x20] sm:$0xff]   ;;  %v930_v12 = vld [vmem:[%s1112_s3 + $0x18] sm:$0xff]   ;;  %v931_v18 = vld [vmem:[%s1112_s3 + $0x10] sm:$0xff]   ;;  %s802_s29 = sshll.u32 %s1120_s13, 2 }
   0xd   : > { %883 = vmatpush3.bf16.msra.mxu0 %v926_v0  ;;  %s1017_s21 = scalar_lea.vmem %s1109_s0, %s800_s18  ;;  %v803_v6 = vld [vmem:[%s1110_s1] ss:$0 sm:$0xff]  ;;  %v932_v25 = vld [vmem:[%s1112_s3 + $0x8] sm:$0xff]   ;;  %s334_s12 = scalar_lea.vmem %s1118_s9, %s802_s29 }
   0xe   : > { %884 = vmatprep.subr.bf16.mxu0 %v927_v1  ;;  %v1023_v4 = vld [vmem:[%s1017_s21] sm:$0xff]  ;;  %v1026_v5 = vld [vmem:[%s1017_s21 + $0x8] sm:$0xff]  ;;  %v1040_v16 = vld [vmem:[%s1017_s21 + $0x10] sm:$0xff] }
   0xf   : > { %v352_v7 = vmul.f32 %v803_v6, %v1023_v4  ;;  %v353_v8 = vmul.f32 %v803_v6, %v1026_v5  ;;  %v804_v9 = vld [vmem:[%s1111_s2] ss:$0 sm:$0xff]  ;;  %v1043_v17 = vld [vmem:[%s1017_s21 + $0x18] sm:$0xff]  ;;  %v1052_v20 = vld [vmem:[%s1017_s21 + $0x28] sm:$0xff]  ;;  %v354_v21 = vmul.f32 %v803_v6, %v1040_v16 }
  0x10   : > { %v1049_v19 = vld [vmem:[%s1017_s21 + $0x20] sm:$0xff]  ;;  %v355_v22 = vmul.f32 %v803_v6, %v1043_v17  ;;  %v357_v24 = vmul.f32 %v803_v6, %v1052_v20  ;;  %v1062_v30 = vld [vmem:[%s1017_s21 + $0x30] sm:$0xff]  ;;  %v1065_v31 = vld [vmem:[%s1017_s21 + $0x38] sm:$0xff] }
  0x11   : > { %885 = vmatpush3.bf16.msra.mxu0 %v927_v1  ;;  %v367_v10 = vadd.f32 %v804_v9, %v352_v7  ;;  %v368_v11 = vadd.f32 %v804_v9, %v353_v8  ;;  %v356_v23 = vmul.f32 %v803_v6, %v1049_v19  ;;  %v369_v26 = vadd.f32 %v804_v9, %v354_v21  ;;  %v933_v32 = vld [vmem:[%s1112_s3] sm:$0xff]   ;;  %v934_v46 = vld [vmem:[%s1115_s6 + $0x8] sm:$0xff]  }
  0x12   : > { %886 = vmatprep.subr.bf16.mxu0 %v928_v2  ;;  %v370_v27 = vadd.f32 %v804_v9, %v355_v22  ;;  %v372_v29 = vadd.f32 %v804_v9, %v357_v24  ;;  %v358_v35 = vmul.f32 %v803_v6, %v1062_v30  ;;  %v359_v36 = vmul.f32 %v803_v6, %v1065_v31  ;;  %v935_v47 = vld [vmem:[%s1115_s6] sm:$0xff]  }
  0x13   : > { %v375_v13 = vmax.f32 %v367_v10, 0.0  ;;  %v376_v14 = vmax.f32 %v368_v11, 0.0  ;;  %v371_v28 = vadd.f32 %v804_v9, %v356_v23  ;;  %v377_v33 = vmax.f32 %v369_v26, 0.0  ;;  %906 = vmatprep.subr.bf16.mxu1 %v934_v46  ;;  %v813_v49 = vld [vmem:[%s1113_s4] ss:$0 sm:$0xff] }
  0x14   : > { %v378_v34 = vmax.f32 %v370_v27, 0.0  ;;  %v380_v38 = vmax.f32 %v372_v29, 0.0  ;;  %v373_v40 = vadd.f32 %v804_v9, %v358_v35  ;;  %v374_v41 = vadd.f32 %v804_v9, %v359_v36  ;;  %907 = vmatpush3.bf16.msra.mxu1 %v934_v46  ;;  %v814_v54 = vld [vmem:[%s1114_s5] ss:$0 sm:$0xff] }
  0x15   : > { %887 = vmatpush3.bf16.msra.mxu0 %v928_v2  ;;  %v383_v15 = vpack.c.bf16 %v376_v14, %v375_v13  ;;  %v379_v37 = vmax.f32 %v371_v28, 0.0  ;;  %908 = vmatprep.subr.bf16.mxu1 %v935_v47  ;;  %v821_v29 = vld [vmem:[%s1116_s7] ss:$0 sm:$0xff] }
  0x16   : > { %888 = vmatprep.subr.bf16.mxu0 %v929_v3  ;;  %v384_v39 = vpack.c.bf16 %v378_v34, %v377_v33  ;;  %v381_v43 = vmax.f32 %v373_v40, 0.0  ;;  %v382_v44 = vmax.f32 %v374_v41, 0.0  ;;  %v822_v36 = vld [vmem:[%s1117_s8] ss:$0 sm:$0xff] }
  0x17   : > { %898 = vmatprep.mubr.bf16.mxu0 %v383_v15  ;;  %v385_v42 = vpack.c.bf16 %v380_v38, %v379_v37 }
  0x18   : > { %v386_v45 = vpack.c.bf16 %v382_v44, %v381_v43  ;;  %909 = vmatpush3.bf16.msra.mxu1 %v935_v47 }
  0x19   : > { %889 = vmatpush3.bf16.msra.mxu0 %v929_v3 }
  0x1a   : > { %890 = vmatprep.subr.bf16.mxu0 %v930_v12 }
  0x1d   : > { %891 = vmatpush3.bf16.msra.mxu0 %v930_v12 }
  0x1e   : > { %892 = vmatprep.subr.bf16.mxu0 %v931_v18 }
  0x21   : > { %893 = vmatpush3.bf16.msra.mxu0 %v931_v18 }
  0x22   : > { %894 = vmatprep.subr.bf16.mxu0 %v932_v25 }
  0x25   : > { %895 = vmatpush3.bf16.msra.mxu0 %v932_v25 }
  0x26   : > { %896 = vmatprep.subr.bf16.mxu0 %v933_v32 }
  0x29   : > { %897 = vmatpush3.bf16.msra.mxu0 %v933_v32 }
  0x2c   : > { %899 = vmatmul.mubr.bf16.vlgmr.msra.gmra.mxu0 %v384_v39 }
  0x2d   : > { %902 = vmatprep.mubr.bf16.mxu0 %v385_v42 }
  0x34   : > { %903 = vmatmul.mubr.bf16.gmra.mxu0 %v386_v45 }
  0xec   : > { %v900_v48 = vpop.f32.mrf.mxu0 }
  0xed   : > { %v525_v52 = vmul.f32 %v900_v48, %v813_v49 }
  0xee   : > { %v485_v50 = vpop.f32.mrf.mxu0 }
  0xef   : > { %v523_v51 = vmul.f32 %v813_v49, %v485_v50  ;;  %v540_v60 = vadd.f32 %v814_v54, %v525_v52 }
  0xf0   : > { %v901_v53 = vpop.f32.mrf.mxu0 }
  0xf1   : > { %v526_v55 = vmul.f32 %v901_v53, %v813_v49  ;;  %v538_v57 = vadd.f32 %v814_v54, %v523_v51  ;;  %v548_v6 = vmax.f32 %v540_v60, 0.0 }
  0xf2   : > { %v488_v56 = vpop.f32.mrf.mxu0 }
  0xf3   : > { %v541_v58 = vadd.f32 %v814_v54, %v526_v55  ;;  %v524_v59 = vmul.f32 %v813_v49, %v488_v56  ;;  %v546_v1 = vmax.f32 %v538_v57, 0.0 }
  0xf4   : > { %v904_v61 = vpop.f32.mrf.mxu0 }
  0xf5   : > { %v539_v62 = vadd.f32 %v814_v54, %v524_v59  ;;  %v549_v63 = vmax.f32 %v541_v58, 0.0  ;;  %v529_v7 = vmul.f32 %v904_v61, %v813_v49 }
  0xf6   : > { %v501_v0 = vpop.f32.mrf.mxu0 }
  0xf7   : > { %v547_v2 = vmax.f32 %v539_v62, 0.0  ;;  %v527_v3 = vmul.f32 %v813_v49, %v501_v0  ;;  %v555_v11 = vpack.c.bf16 %v549_v63, %v548_v6  ;;  %v544_v18 = vadd.f32 %v814_v54, %v529_v7 }
  0xf8   : > { %v905_v8 = vpop.f32.mrf.mxu0 }
  0xf9   : > { %v530_v9 = vmul.f32 %v905_v8, %v813_v49  ;;  %v554_v10 = vpack.c.bf16 %v547_v2, %v546_v1  ;;  %v542_v13 = vadd.f32 %v814_v54, %v527_v3  ;;  %v552_v25 = vmax.f32 %v544_v18, 0.0 }
  0xfa   : > { %v504_v12 = vpop.f32.mrf.mxu0 }
  0xfb   : > { %v545_v14 = vadd.f32 %v814_v54, %v530_v9  ;;  %v528_v15 = vmul.f32 %v813_v49, %v504_v12  ;;  %910 = vmatprep.mubr.msk.bf16.mxu1 %vm574_vm0, %v554_v10  ;;  %v550_v23 = vmax.f32 %v542_v13, 0.0 }
  0xfc   : > { %911 = vmatmul.mubr.msk.bf16.vlgmr.msra.gmra.mxu1 %vm574_vm0, %v555_v11 }
  0xfd   : > { %v543_v21 = vadd.f32 %v814_v54, %v528_v15  ;;  %v553_v22 = vmax.f32 %v545_v14, 0.0 }
  0xff   : > { %v551_v24 = vmax.f32 %v543_v21, 0.0  ;;  %v557_v27 = vpack.c.bf16 %v553_v22, %v552_v25 }
 0x101   : > { %v556_v26 = vpack.c.bf16 %v551_v24, %v550_v23 }
 0x103   : > { %914 = vmatprep.mubr.msk.bf16.mxu1 %vm574_vm0, %v556_v26 }
 0x104   : > { %915 = vmatmul.mubr.msk.bf16.gmra.mxu1 %vm574_vm0, %v557_v27 }
 0x1bc   : > { %v912_v28 = vpop.f32.mrf.mxu1 }
 0x1bd   : > { %v654_v32 = vadd.f32 %v912_v28, %v1040_v16 }
 0x1be   : > { %v621_v33 = vpop.f32.mrf.mxu1 }
 0x1bf   : > { %v669_v34 = vmul.f32 %v821_v29, %v654_v32  ;;  %v652_v35 = vadd.f32 %v621_v33, %v1023_v4 }
 0x1c0   : > { %v913_v37 = vpop.f32.mrf.mxu1 }
 0x1c1   : > { %v667_v38 = vmul.f32 %v821_v29, %v652_v35  ;;  %v655_v39 = vadd.f32 %v913_v37, %v1043_v17  ;;  %v684_v41 = vadd.f32 %v822_v36, %v669_v34 }
 0x1c2   : > { %v624_v40 = vpop.f32.mrf.mxu1 }
 0x1c3   : > { %v670_v42 = vmul.f32 %v821_v29, %v655_v39  ;;  %v653_v43 = vadd.f32 %v624_v40, %v1026_v5  ;;  %v682_v45 = vadd.f32 %v822_v36, %v667_v38  ;;  %v692_v48 = vmax.f32 %v684_v41, 0.0 }
 0x1c4   : > { %v916_v44 = vpop.f32.mrf.mxu1 }
 0x1c5   : > { %v685_v16 = vadd.f32 %v822_v36, %v670_v42  ;;  %v668_v46 = vmul.f32 %v821_v29, %v653_v43  ;;  %v658_v4 = vadd.f32 %v916_v44, %v1062_v30  ;;  %v690_v5 = vmax.f32 %v682_v45, 0.0 }
 0x1c6   : > { %v637_v47 = vpop.f32.mrf.mxu1 }
 0x1c7   : > { %v693_v49 = vmax.f32 %v685_v16, 0.0  ;;  %v683_v50 = vadd.f32 %v822_v36, %v668_v46  ;;  %v656_v51 = vadd.f32 %v637_v47, %v1049_v19  ;;  %v673_v17 = vmul.f32 %v821_v29, %v658_v4 }
 0x1c8   : > { %v917_v52 = vpop.f32.mrf.mxu1 }
 0x1c9   : > { %v849_v53 = vpack.c.bf16 %v693_v49, %v692_v48  ;;  %v691_v54 = vmax.f32 %v683_v50, 0.0  ;;  %v671_v55 = vmul.f32 %v821_v29, %v656_v51  ;;  %v659_v56 = vadd.f32 %v917_v52, %v1065_v31 }
 0x1ca   : > { %v640_v57 = vpop.f32.mrf.mxu1  ;;  %v688_v59 = vadd.f32 %v822_v36, %v673_v17 }
 0x1cb   : > { %861 = vst [vmem:[%s334_s12 + $0x8] sm:$0xff] %v849_v53   ;;  %v844_v30 = vpack.c.bf16 %v691_v54, %v690_v5  ;;  %v657_v58 = vadd.f32 %v640_v57, %v1052_v20  ;;  %v674_v60 = vmul.f32 %v821_v29, %v659_v56  ;;  %v686_v19 = vadd.f32 %v822_v36, %v671_v55 }
 0x1cc   : > { %v696_v0 = vmax.f32 %v688_v59, 0.0 }
 0x1cd   : > { %845 = vst [vmem:[%s334_s12] sm:$0xff] %v844_v30   ;;  %v672_v61 = vmul.f32 %v821_v29, %v657_v58  ;;  %v689_v62 = vadd.f32 %v822_v36, %v674_v60  ;;  %v694_v2 = vmax.f32 %v686_v19, 0.0 }
 0x1cf   : > { %v687_v63 = vadd.f32 %v822_v36, %v672_v61  ;;  %v697_v1 = vmax.f32 %v689_v62, 0.0 }
 0x1d1   : > { %v695_v3 = vmax.f32 %v687_v63, 0.0  ;;  %v859_v6 = vpack.c.bf16 %v697_v1, %v696_v0 }
 0x1d3   : > { %v854_v7 = vpack.c.bf16 %v695_v3, %v694_v2  ;;  %863 = vst [vmem:[%s334_s12 + $0x18] sm:$0xff] %v859_v6  }
 0x1d5   : > { %862 = vst [vmem:[%s334_s12 + $0x10] sm:$0xff] %v854_v7  }
 0x1d6 PF: > { %s19_s30 = sadd.s32 1, %s942_s30  }
 0x1d7   : > { %p16_p4 = scmp.ge.s32.totalorder %s19_s30, 4  }
 0x1d9   :  { %18 = sbr.rel (!%p16_p4) target bundleno = 1 (0x1), region = 86 }

// kernel: tile.74
= control target key start
LH: loop header
LB: loop body
LE: loop exit
PB: predicated region body
PF: predicated region fallthrough
CT: control target
= control target key end

     0   :  { %s7_s6 = smov 3  ;;  %s14_s9 = smov 3  ;;  %vm4_vm0 = vcmask 261120   ;;  %vm11_vm1 = vcmask 1048320   ;;  %vm18_vm2 = vcmask 785920   ;;  %vm25_vm3 = vcmask 523520   ;;  %s79_s0 = inlined_call_operand.vmem [shape: f32[8,32], index: 0, kind: input, shape index: {}]   ;;  %s80_s1 = inlined_call_operand.vmem [shape: f32[1,256], index: 1, kind: output, shape index: {}]  }
   0x1   :  { %v41_v0 = vld [vmem:[%s79_s0 + $0x3] ss:$4 sm:%s7_s6]   ;;  %s48_s10 = smov 96   ;;  %s21_s11 = smov 3  ;;  %v42_v1 = vld [vmem:[%s79_s0 + $0x2] ss:$4 sm:%s14_s9]  }
   0x2   :  { %9 = vrot.lane.b32.xlu0 %v41_v0, %s48_s10  ;;  %v43_v2 = vld [vmem:[%s79_s0 + $0x1] ss:$4 sm:%s21_s11]   ;;  %s2_s16 = smov 3  ;;  %s49_s17 = smov 32  }
   0x3   :  { %23 = vrot.lane.b32.xlu1 %v43_v2, %s49_s17  ;;  %v3_v3 = vld [vmem:[%s79_s0] ss:$4 sm:%s2_s16]   ;;  %s50_s0 = smov 64  }
   0x4   :  { %5 = vst.msk [vmem:[#allocation0] ss:$8 sm:$0x3] %vm4_vm0, %v3_v3  }
   0x6   :  { %16 = vrot.lane.b32.xlu0 %v42_v1, %s50_s0 }
  0x74   :  { %v10_v4 = vpop.permute.xlu0 %9  }
  0x75   :  { %12 = vst.msk [vmem:[#allocation0] ss:$8 sm:$0x3] %vm11_vm1, %v10_v4   ;;  %v24_v5 = vpop.permute.xlu1 %23  }
  0x78   :  { %v17_v6 = vpop.permute.xlu0 %16  }
  0x79   :  { %19 = vst.msk [vmem:[#allocation0] ss:$8 sm:$0x3] %vm18_vm2, %v17_v6  }
  0x7a   :  { %26 = vst.msk [vmem:[#allocation0] ss:$8 sm:$0x3] %vm25_vm3, %v24_v5  }
  0x81   :  { %v31_v7 = vld [vmem:[#allocation0] sm:$0x1]  ;;  %v36_v8 = vld [vmem:[#allocation0 + $0x8] sm:$0x1] }
  0x82   :  { %34 = vst [vmem:[%s80_s1] sm:$0x1] %v31_v7  ;;  %44 = vst [vmem:[%s80_s1 + $0x1] sm:$0x1] %v36_v8 }

// kernel: mf_unit_forward.3
= control target key start
LH: loop header
LB: loop body
LE: loop exit
PB: predicated region body
PF: predicated region fallthrough
CT: control target
= control target key end

     0   :  { %s5652_s21 = smov 0   ;;  %s5654_s22 = smov 0   ;;  %s7009_s0 = inlined_call_operand.vmem [shape: bf16[2,4,8,256], index: 0, kind: input, shape index: {}]   ;;  %s7010_s1 = inlined_call_operand.vmem [shape: bf16[3,3,256,256], index: 1, kind: input, shape index: {}]   ;;  %s7011_s2 = inlined_call_operand.vmem [shape: f32[1,256], index: 2, kind: input, shape index: {}]   ;;  %s7012_s3 = inlined_call_operand.vmem [shape: f32[1,256], index: 3, kind: input, shape index: {}]   ;;  %s7013_s4 = inlined_call_operand.vmem [shape: bf16[3,256,256], index: 4, kind: input, shape index: {}]   ;;  %s7014_s5 = inlined_call_operand.vmem [shape: f32[2,4,8,256], index: 5, kind: input, shape index: {}]   ;;  %s7015_s6 = inlined_call_operand.vmem [shape: f32[2,4,8,256], index: 6, kind: output, shape index: {}]  }
   0x1   :  { %s5656_s23 = smov 0  }
   0x2 LB: > { %s28_s24 = sadd.s32 1, %s5610_s22  ;;  %p4257_p0 = scmp.ge.s32.totalorder %s5614_s23, 1  ;;  %s5614_s23 = sphi %s5656_s23, %s16_s23   ;;  %s5610_s22 = sphi %s5654_s22, %s7017_s22   ;;  %s5606_s21 = sphi %s5652_s21, %s7016_s21  }
   0x3   : > { %p30_p1 = scmp.ge.s32.totalorder %s28_s24, 2  ;;  %p244_p2 = scmp.lt.s32.totalorder %s5614_s23, 3 }
   0x5   : > { %s7019_s24 = smov (%p30_p1, %s28_s24), 0  ;;  %p245_p3 = pnand %p4257_p0, %p244_p2 }
   0x6   : > { %p289_p4 = scmp.lt.s32.totalorder (!%p245_p3), %s5606_s21, 1 }
   0x7   : > { %248 = sbr.rel (%p245_p3) target bundleno = 837 (0x345), region = 44 }
   0xc   : > { %v5016_v0 = vld [vmem:[%s7010_s1 + $0x74] ss:$8 sps:$4 sm:$0xff]   ;;  %v5018_v1 = vld [vmem:[%s7010_s1 + $0x70] ss:$8 sps:$4 sm:$0xff]   ;;  %v5019_v2 = vld [vmem:[%s7010_s1 + $0x64] ss:$8 sps:$4 sm:$0xff]  }
   0xd   : > { %737 = vmatprep.subr.bf16.mxu0 %v5016_v0  ;;  %v5021_v3 = vld [vmem:[%s7010_s1 + $0x60] ss:$8 sps:$4 sm:$0xff]   ;;  %v5022_v4 = vld [vmem:[%s7010_s1 + $0x174] ss:$8 sps:$4 sm:$0xff]   ;;  %v5024_v5 = vld [vmem:[%s7010_s1 + $0x170] ss:$8 sps:$4 sm:$0xff]  }
   0xe   : > { %738 = vmatpush1.bf16.msra.mxu0 %v5018_v1  ;;  %v5025_v6 = vld [vmem:[%s7010_s1 + $0x54] ss:$8 sps:$4 sm:$0xff]   ;;  %1037 = vmatprep.subr.bf16.mxu1 %v5022_v4  ;;  %v5028_v7 = vld [vmem:[%s7010_s1 + $0x164] ss:$8 sps:$4 sm:$0xff]   ;;  %v5030_v8 = vld [vmem:[%s7010_s1 + $0x160] ss:$8 sps:$4 sm:$0xff]  }
   0xf   : > { %739 = vmatprep.subr.bf16.mxu0 %v5019_v2  ;;  %1038 = vmatpush1.bf16.msra.mxu1 %v5024_v5  ;;  %v5027_v9 = vld [vmem:[%s7010_s1 + $0x50] ss:$8 sps:$4 sm:$0xff]   ;;  %v5031_v10 = vld [vmem:[%s7010_s1 + $0x44] ss:$8 sps:$4 sm:$0xff]   ;;  %v5034_v11 = vld [vmem:[%s7010_s1 + $0x154] ss:$8 sps:$4 sm:$0xff]  }
  0x10   : > { %1039 = vmatprep.subr.bf16.mxu1 %v5028_v7  ;;  %v5036_v12 = vld [vmem:[%s7010_s1 + $0x150] ss:$8 sps:$4 sm:$0xff]   ;;  %v5033_v13 = vld [vmem:[%s7010_s1 + $0x40] ss:$8 sps:$4 sm:$0xff]   ;;  %v5040_v14 = vld [vmem:[%s7010_s1 + $0x144] ss:$8 sps:$4 sm:$0xff]  }
  0x11   : > { %v5037_v15 = vld [vmem:[%s7010_s1 + $0x34] ss:$8 sps:$4 sm:$0xff]   ;;  %v5042_v16 = vld [vmem:[%s7010_s1 + $0x140] ss:$8 sps:$4 sm:$0xff]   ;;  %v5039_v17 = vld [vmem:[%s7010_s1 + $0x30] ss:$8 sps:$4 sm:$0xff]  }
  0x12   : > { %740 = vmatpush1.bf16.msra.mxu0 %v5021_v3  ;;  %v5046_v18 = vld [vmem:[%s7010_s1 + $0x134] ss:$8 sps:$4 sm:$0xff]   ;;  %v5043_v19 = vld [vmem:[%s7010_s1 + $0x24] ss:$8 sps:$4 sm:$0xff]   ;;  %v5048_v20 = vld [vmem:[%s7010_s1 + $0x130] ss:$8 sps:$4 sm:$0xff]  }
  0x13   : > { %741 = vmatprep.subr.bf16.mxu0 %v5025_v6  ;;  %1040 = vmatpush1.bf16.msra.mxu1 %v5030_v8  ;;  %v5045_v21 = vld [vmem:[%s7010_s1 + $0x20] ss:$8 sps:$4 sm:$0xff]   ;;  %v5052_v22 = vld [vmem:[%s7010_s1 + $0x124] ss:$8 sps:$4 sm:$0xff]   ;;  %v5049_v23 = vld [vmem:[%s7010_s1 + $0x14] ss:$8 sps:$4 sm:$0xff]  }
  0x14   : > { %1041 = vmatprep.subr.bf16.mxu1 %v5034_v11  ;;  %v5054_v24 = vld [vmem:[%s7010_s1 + $0x120] ss:$8 sps:$4 sm:$0xff]   ;;  %v5051_v25 = vld [vmem:[%s7010_s1 + $0x10] ss:$8 sps:$4 sm:$0xff]   ;;  %v5058_v26 = vld [vmem:[%s7010_s1 + $0x114] ss:$8 sps:$4 sm:$0xff]  }
  0x15   : > { %v5055_v27 = vld [vmem:[%s7010_s1 + $0x4] ss:$8 sps:$4 sm:$0xff]   ;;  %v5060_v28 = vld [vmem:[%s7010_s1 + $0x110] ss:$8 sps:$4 sm:$0xff]   ;;  %v5057_v29 = vld [vmem:[%s7010_s1] ss:$8 sps:$4 sm:$0xff]  }
  0x16   : > { %742 = vmatpush1.bf16.msra.mxu0 %v5027_v9  ;;  %v5064_v30 = vld [vmem:[%s7010_s1 + $0x104] ss:$8 sps:$4 sm:$0xff]   ;;  %v5061_v31 = vld [vmem:[%s7010_s1 + $0xf4] ss:$8 sps:$4 sm:$0xff]   ;;  %v5066_v32 = vld [vmem:[%s7010_s1 + $0x100] ss:$8 sps:$4 sm:$0xff]  }
  0x17   : > { %743 = vmatprep.subr.bf16.mxu0 %v5031_v10  ;;  %1042 = vmatpush1.bf16.msra.mxu1 %v5036_v12  ;;  %v5063_v33 = vld [vmem:[%s7010_s1 + $0xf0] ss:$8 sps:$4 sm:$0xff]   ;;  %v5070_v34 = vld [vmem:[%s7010_s1 + $0x1f4] ss:$8 sps:$4 sm:$0xff]   ;;  %s7021_s21 = smov (!%p289_p4, %s5606_s21), 1 }
  0x18   : > { %1043 = vmatprep.subr.bf16.mxu1 %v5040_v14  ;;  %v5067_v35 = vld [vmem:[%s7010_s1 + $0xe4] ss:$8 sps:$4 sm:$0xff]   ;;  %v5072_v36 = vld [vmem:[%s7010_s1 + $0x1f0] ss:$8 sps:$4 sm:$0xff]   ;;  %v5069_v37 = vld [vmem:[%s7010_s1 + $0xe0] ss:$8 sps:$4 sm:$0xff]  }
  0x19   : > { %v5076_v38 = vld [vmem:[%s7010_s1 + $0x1e4] ss:$8 sps:$4 sm:$0xff]   ;;  %s4984_s19 = sshll.u32 %s7021_s21, 5  ;;  %v5073_v39 = vld [vmem:[%s7010_s1 + $0xd4] ss:$8 sps:$4 sm:$0xff]  }
  0x1a   : > { %744 = vmatpush1.bf16.msra.mxu0 %v5033_v13  ;;  %v5078_v40 = vld [vmem:[%s7010_s1 + $0x1e0] ss:$8 sps:$4 sm:$0xff]   ;;  %s5803_s30 = scalar_lea.vmem %s7009_s0, %s4984_s19  ;;  %v5075_v41 = vld [vmem:[%s7010_s1 + $0xd0] ss:$8 sps:$4 sm:$0xff]   ;;  %v5082_v42 = vld [vmem:[%s7010_s1 + $0x1d4] ss:$8 sps:$4 sm:$0xff]  }
  0x1b   : > { %745 = vmatprep.subr.bf16.mxu0 %v5037_v15  ;;  %1044 = vmatpush1.bf16.msra.mxu1 %v5042_v16  ;;  %v5079_v43 = vld [vmem:[%s7010_s1 + $0xc4] ss:$8 sps:$4 sm:$0xff]   ;;  %v5081_v44 = vld [vmem:[%s7010_s1 + $0xc0] ss:$8 sps:$4 sm:$0xff]   ;;  %v5084_v46 = vld [vmem:[%s7010_s1 + $0x1d0] ss:$8 sps:$4 sm:$0xff]  }
  0x1c   : > { %1045 = vmatprep.subr.bf16.mxu1 %v5046_v18  ;;  %v329_v45 = vld [vmem:[%s5803_s30] sm:$0xff]  ;;  %v5085_v50 = vld [vmem:[%s7010_s1 + $0xb4] ss:$8 sps:$4 sm:$0xff]   ;;  %v5087_v52 = vld [vmem:[%s7010_s1 + $0xb0] ss:$8 sps:$4 sm:$0xff]  }
  0x1d   : > { %v345_v47 = vmul.bf16 0.0, %v329_v45  ;;  %v374_v48 = vmul.bf16 1.0019379, %v329_v45  ;;  %v5088_v49 = vld [vmem:[%s7010_s1 + $0x1c4] ss:$8 sps:$4 sm:$0xff]  }
  0x1e   : > { %746 = vmatpush1.bf16.msra.mxu0 %v5039_v17  ;;  %v5090_v53 = vld [vmem:[%s7010_s1 + $0x1c0] ss:$8 sps:$4 sm:$0xff]   ;;  %v5094_v54 = vld [vmem:[%s7010_s1 + $0x1b4] ss:$8 sps:$4 sm:$0xff]   ;;  %v5091_v55 = vld [vmem:[%s7010_s1 + $0xa4] ss:$8 sps:$4 sm:$0xff]  }
  0x1f   : > { %747 = vmatprep.subr.bf16.mxu0 %v5043_v19  ;;  %1046 = vmatpush1.bf16.msra.mxu1 %v5048_v20  ;;  %v5827_v51 = vcombine.high %v345_v47, %v374_v48  ;;  %v5093_v56 = vld [vmem:[%s7010_s1 + $0xa0] ss:$8 sps:$4 sm:$0xff]   ;;  %v5096_v57 = vld [vmem:[%s7010_s1 + $0x1b0] ss:$8 sps:$4 sm:$0xff]   ;;  %v5100_v58 = vld [vmem:[%s7010_s1 + $0x1a4] ss:$8 sps:$4 sm:$0xff]   ;;  %v5882_v5 = vcombine.low %v345_v47, %v374_v48 }
  0x20   : > { %1047 = vmatprep.subr.bf16.mxu1 %v5052_v22  ;;  %v5097_v59 = vld [vmem:[%s7010_s1 + $0x94] ss:$8 sps:$4 sm:$0xff]   ;;  %v5099_v60 = vld [vmem:[%s7010_s1 + $0x90] ss:$8 sps:$4 sm:$0xff]   ;;  %v5102_v61 = vld [vmem:[%s7010_s1 + $0x1a0] ss:$8 sps:$4 sm:$0xff]  }
  0x21   : > { %769 = vmatprep.mubr.bf16.mxu0 %v5827_v51  ;;  %1069 = vmatprep.mubr.bf16.mxu1 %v5827_v51  ;;  %v5106_v62 = vld [vmem:[%s7010_s1 + $0x194] ss:$8 sps:$4 sm:$0xff]   ;;  %v5103_v63 = vld [vmem:[%s7010_s1 + $0x84] ss:$8 sps:$4 sm:$0xff]   ;;  %v5105_v0 = vld [vmem:[%s7010_s1 + $0x80] ss:$8 sps:$4 sm:$0xff]  }
  0x22   : > { %748 = vmatpush1.bf16.msra.mxu0 %v5045_v21  ;;  %v5108_v1 = vld [vmem:[%s7010_s1 + $0x190] ss:$8 sps:$4 sm:$0xff]   ;;  %v5112_v2 = vld [vmem:[%s7010_s1 + $0x184] ss:$8 sps:$4 sm:$0xff]   ;;  %v5111_v3 = vld [vmem:[%s7010_s1 + $0x274] ss:$8 sps:$4 sm:$0xff]  }
  0x23   : > { %749 = vmatprep.subr.bf16.mxu0 %v5049_v23  ;;  %1048 = vmatpush1.bf16.msra.mxu1 %v5054_v24  ;;  %v5109_v4 = vld [vmem:[%s7010_s1 + $0x270] ss:$8 sps:$4 sm:$0xff]   ;;  %v5114_v6 = vld [vmem:[%s7010_s1 + $0x180] ss:$8 sps:$4 sm:$0xff]   ;;  %v5120_v7 = vld [vmem:[%s7010_s1 + $0x374] ss:$8 sps:$4 sm:$0xff]  }
  0x24   : > { %1049 = vmatprep.subr.bf16.mxu1 %v5058_v26  ;;  %v5117_v8 = vld [vmem:[%s7010_s1 + $0x264] ss:$8 sps:$4 sm:$0xff]   ;;  %v5115_v9 = vld [vmem:[%s7010_s1 + $0x260] ss:$8 sps:$4 sm:$0xff]   ;;  %v5118_v10 = vld [vmem:[%s7010_s1 + $0x370] ss:$8 sps:$4 sm:$0xff]  }
  0x25   : > { %v5126_v11 = vld [vmem:[%s7010_s1 + $0x364] ss:$8 sps:$4 sm:$0xff]   ;;  %v5123_v12 = vld [vmem:[%s7010_s1 + $0x254] ss:$8 sps:$4 sm:$0xff]   ;;  %v5121_v13 = vld [vmem:[%s7010_s1 + $0x250] ss:$8 sps:$4 sm:$0xff]  }
  0x26   : > { %750 = vmatpush1.bf16.msra.mxu0 %v5051_v25  ;;  %v5124_v14 = vld [vmem:[%s7010_s1 + $0x360] ss:$8 sps:$4 sm:$0xff]   ;;  %v5132_v15 = vld [vmem:[%s7010_s1 + $0x354] ss:$8 sps:$4 sm:$0xff]   ;;  %v5129_v20 = vld [vmem:[%s7010_s1 + $0x244] ss:$8 sps:$4 sm:$0xff]  }
  0x27   : > { %751 = vmatprep.subr.bf16.mxu0 %v5055_v27  ;;  %1050 = vmatpush1.bf16.msra.mxu1 %v5060_v28  ;;  %v4264_v16 = vld [vmem:[%s5803_s30 + $0x8] sm:$0xff]  ;;  %v4265_v17 = vld [vmem:[%s5803_s30 + $0x10] sm:$0xff]  ;;  %v4266_v27 = vld [vmem:[%s5803_s30 + $0x18] sm:$0xff]  ;;  %s4985_s30 = sshll.u32 %s7021_s21, 6 }
  0x28   : > { %1051 = vmatprep.subr.bf16.mxu1 %v5064_v30  ;;  %v405_v18 = vmul.bf16 1.0019379, %v4264_v16  ;;  %v436_v19 = vmul.bf16 1.0019379, %v4265_v17  ;;  %v5127_v23 = vld [vmem:[%s7010_s1 + $0x240] ss:$8 sps:$4 sm:$0xff]   ;;  %s6815_s17 = scalar_lea.vmem %s7014_s5, %s4985_s30  ;;  %s6820_s20 = scalar_lea.vmem %s7015_s6, %s4985_s30 }
  0x29   : > { %v5130_v24 = vld [vmem:[%s7010_s1 + $0x350] ss:$8 sps:$4 sm:$0xff]   ;;  %v5138_v25 = vld [vmem:[%s7010_s1 + $0x344] ss:$8 sps:$4 sm:$0xff]   ;;  %v5135_v26 = vld [vmem:[%s7010_s1 + $0x234] ss:$8 sps:$4 sm:$0xff]  }
  0x2a   : > { %752 = vmatpush1.bf16.msra.mxu0 %v5057_v29  ;;  %v5921_v21 = vcombine.high %v405_v18, %v436_v19  ;;  %v5923_v22 = vcombine.low %v405_v18, %v436_v19  ;;  %v467_v28 = vmul.bf16 1.0019379, %v4266_v27  ;;  %v498_v29 = vmul.bf16 0.0, %v4266_v27  ;;  %v5136_v30 = vld [vmem:[%s7010_s1 + $0x340] ss:$8 sps:$4 sm:$0xff]  }
  0x2b   : > { %753 = vmatprep.subr.bf16.mxu0 %v5061_v31  ;;  %1052 = vmatpush1.bf16.msra.mxu1 %v5066_v32  ;;  %v5133_v31 = vld [vmem:[%s7010_s1 + $0x230] ss:$8 sps:$4 sm:$0xff]   ;;  %v5144_v32 = vld [vmem:[%s7010_s1 + $0x334] ss:$8 sps:$4 sm:$0xff]   ;;  %v5151_v45 = vld [vmem:[%s7010_s1 + $0x200] ss:$8 sps:$4 sm:$0xff]  }
  0x2c   : > { %1053 = vmatprep.subr.bf16.mxu1 %v5070_v34  ;;  %v5141_v34 = vld [vmem:[%s7010_s1 + $0x224] ss:$8 sps:$4 sm:$0xff]   ;;  %v5159_v47 = vld [vmem:[%s7010_s1 + $0x2f4] ss:$8 sps:$4 sm:$0xff]   ;;  %v5160_v48 = vld [vmem:[%s7010_s1 + $0x300] ss:$8 sps:$4 sm:$0xff]  }
  0x2d   : > { %v5210_v16 = vld [vmem:[%s7010_s1 + $0x384] ss:$8 sps:$4 sm:$0xff]   ;;  %v5207_v17 = vld [vmem:[%s7010_s1 + $0x474] ss:$8 sps:$4 sm:$0xff]   ;;  %v5208_v18 = vld [vmem:[%s7010_s1 + $0x380] ss:$8 sps:$4 sm:$0xff]  }
  0x2e   : > { %754 = vmatpush2.bf16.msra.mxu0 %v5063_v33  ;;  %v5950_v33 = vcombine.high %v467_v28, %v498_v29  ;;  %v5616_v19 = vmov 0.0   ;;  %v5225_v27 = vld [vmem:[%s7010_s1 + $0x564] ss:$8 sps:$4 sm:$0xff]  }
  0x2f   : > { %755 = vmatprep.subr.bf16.mxu0 %v5067_v35  ;;  %1054 = vmatpush2.bf16.msra.mxu1 %v5072_v36  ;;  %v5957_v35 = vcombine.low %v467_v28, %v498_v29  ;;  %v5142_v36 = vld [vmem:[%s7010_s1 + $0x330] ss:$8 sps:$4 sm:$0xff]   ;;  %507 = vst [vmem:[#allocation3 + $0x30] sm:$0xff] %v5616_v19  ;;  %508 = vst [vmem:[#allocation3] sm:$0xff] %v5616_v19  ;;  %v5216_v28 = vld [vmem:[%s7010_s1 + $0x454] ss:$8 sps:$4 sm:$0xff]  }
  0x30   : > { %1055 = vmatprep.subr.bf16.mxu1 %v5076_v38  ;;  %v5150_v38 = vld [vmem:[%s7010_s1 + $0x324] ss:$8 sps:$4 sm:$0xff]   ;;  %509 = vst [vmem:[#allocation3 + $0x18] sm:$0xff] %v5616_v19  ;;  %510 = vst [vmem:[#allocation3 + $0x10] sm:$0xff] %v5616_v19  ;;  %v5223_v29 = vld [vmem:[%s7010_s1 + $0x560] ss:$8 sps:$4 sm:$0xff]  }
  0x31   : > { %511 = vst [vmem:[#allocation3 + $0x8] sm:$0xff] %v5616_v19  ;;  %512 = vst [vmem:[#allocation3 + $0x20] sm:$0xff] %v5616_v19 }
  0x32   : > { %756 = vmatpush2.bf16.msra.mxu0 %v5069_v37  ;;  %v5139_v37 = vld [vmem:[%s7010_s1 + $0x220] ss:$8 sps:$4 sm:$0xff]   ;;  %513 = vst [vmem:[#allocation3 + $0x28] sm:$0xff] %v5616_v19  ;;  %514 = vst [vmem:[#allocation3 + $0x38] sm:$0xff] %v5616_v19  ;;  %v5300_v19 = vld [vmem:[%s7010_s1 + $0x594] ss:$8 sps:$4 sm:$0xff]  }
  0x33   : > { %757 = vmatprep.subr.bf16.mxu0 %v5073_v39  ;;  %1056 = vmatpush2.bf16.msra.mxu1 %v5078_v40  ;;  %v5147_v39 = vld [vmem:[%s7010_s1 + $0x214] ss:$8 sps:$4 sm:$0xff]   ;;  %v5148_v40 = vld [vmem:[%s7010_s1 + $0x320] ss:$8 sps:$4 sm:$0xff]  }
  0x34   : > { %1057 = vmatprep.subr.bf16.mxu1 %v5082_v42  ;;  %v5156_v42 = vld [vmem:[%s7010_s1 + $0x314] ss:$8 sps:$4 sm:$0xff]  }
  0x36   : > { %758 = vmatpush2.bf16.msra.mxu0 %v5075_v41  ;;  %v5145_v41 = vld [vmem:[%s7010_s1 + $0x210] ss:$8 sps:$4 sm:$0xff]  }
  0x37   : > { %759 = vmatprep.subr.bf16.mxu0 %v5079_v43  ;;  %1058 = vmatpush2.bf16.msra.mxu1 %v5084_v46  ;;  %v5153_v43 = vld [vmem:[%s7010_s1 + $0x204] ss:$8 sps:$4 sm:$0xff]  }
  0x38   : > { %1059 = vmatprep.subr.bf16.mxu1 %v5088_v49  ;;  %v5162_v46 = vld [vmem:[%s7010_s1 + $0x304] ss:$8 sps:$4 sm:$0xff]   ;;  %v5157_v49 = vld [vmem:[%s7010_s1 + $0x2f0] ss:$8 sps:$4 sm:$0xff]  }
  0x3a   : > { %760 = vmatpush2.bf16.msra.mxu0 %v5081_v44  ;;  %v5154_v44 = vld [vmem:[%s7010_s1 + $0x310] ss:$8 sps:$4 sm:$0xff]  }
  0x3b   : > { %761 = vmatprep.subr.bf16.mxu0 %v5085_v50  ;;  %1060 = vmatpush2.bf16.msra.mxu1 %v5090_v53  ;;  %v5168_v50 = vld [vmem:[%s7010_s1 + $0x3f4] ss:$8 sps:$4 sm:$0xff]   ;;  %v5166_v53 = vld [vmem:[%s7010_s1 + $0x3f0] ss:$8 sps:$4 sm:$0xff]  }
  0x3c   : > { %1061 = vmatprep.subr.bf16.mxu1 %v5094_v54  ;;  %v5163_v54 = vld [vmem:[%s7010_s1 + $0x2e0] ss:$8 sps:$4 sm:$0xff]  }
  0x3e   : > { %762 = vmatpush2.bf16.msra.mxu0 %v5087_v52  ;;  %v5165_v52 = vld [vmem:[%s7010_s1 + $0x2e4] ss:$8 sps:$4 sm:$0xff]  }
  0x3f   : > { %763 = vmatprep.subr.bf16.mxu0 %v5091_v55  ;;  %1062 = vmatpush2.bf16.msra.mxu1 %v5096_v57  ;;  %v5174_v55 = vld [vmem:[%s7010_s1 + $0x3e4] ss:$8 sps:$4 sm:$0xff]   ;;  %v5172_v57 = vld [vmem:[%s7010_s1 + $0x3e0] ss:$8 sps:$4 sm:$0xff]  }
  0x40   : > { %1063 = vmatprep.subr.bf16.mxu1 %v5100_v58  ;;  %v5169_v58 = vld [vmem:[%s7010_s1 + $0x2d0] ss:$8 sps:$4 sm:$0xff]  }
  0x42   : > { %764 = vmatpush2.bf16.msra.mxu0 %v5093_v56  ;;  %v5171_v56 = vld [vmem:[%s7010_s1 + $0x2d4] ss:$8 sps:$4 sm:$0xff]  }
  0x43   : > { %765 = vmatprep.subr.bf16.mxu0 %v5097_v59  ;;  %1064 = vmatpush2.bf16.msra.mxu1 %v5102_v61  ;;  %v5180_v59 = vld [vmem:[%s7010_s1 + $0x3d4] ss:$8 sps:$4 sm:$0xff]   ;;  %v5178_v61 = vld [vmem:[%s7010_s1 + $0x3d0] ss:$8 sps:$4 sm:$0xff]  }
  0x44   : > { %1065 = vmatprep.subr.bf16.mxu1 %v5106_v62  ;;  %v5175_v62 = vld [vmem:[%s7010_s1 + $0x2c0] ss:$8 sps:$4 sm:$0xff]  }
  0x46   : > { %766 = vmatpush2.bf16.msra.mxu0 %v5099_v60  ;;  %v5177_v60 = vld [vmem:[%s7010_s1 + $0x2c4] ss:$8 sps:$4 sm:$0xff]  }
  0x47   : > { %767 = vmatprep.subr.bf16.mxu0 %v5103_v63  ;;  %1066 = vmatpush2.bf16.msra.mxu1 %v5108_v1  ;;  %v5186_v63 = vld [vmem:[%s7010_s1 + $0x3c4] ss:$8 sps:$4 sm:$0xff]   ;;  %v5184_v1 = vld [vmem:[%s7010_s1 + $0x3c0] ss:$8 sps:$4 sm:$0xff]  }
  0x48   : > { %1067 = vmatprep.subr.bf16.mxu1 %v5112_v2  ;;  %v5181_v2 = vld [vmem:[%s7010_s1 + $0x2b0] ss:$8 sps:$4 sm:$0xff]  }
  0x4a   : > { %768 = vmatpush2.bf16.msra.mxu0 %v5105_v0  ;;  %v5183_v0 = vld [vmem:[%s7010_s1 + $0x2b4] ss:$8 sps:$4 sm:$0xff]  }
  0x4b   : > { %1313 = vmatprep.subr.bf16.mxu0 %v5111_v3  ;;  %1068 = vmatpush2.bf16.msra.mxu1 %v5114_v6  ;;  %v5192_v3 = vld [vmem:[%s7010_s1 + $0x3b4] ss:$8 sps:$4 sm:$0xff]   ;;  %v5190_v6 = vld [vmem:[%s7010_s1 + $0x3b0] ss:$8 sps:$4 sm:$0xff]  }
  0x4c   : > { %1613 = vmatprep.subr.bf16.mxu1 %v5120_v7  ;;  %v5187_v7 = vld [vmem:[%s7010_s1 + $0x2a0] ss:$8 sps:$4 sm:$0xff]  }
  0x4d   : > { %770 = vmatmul.mubr.bf16.vlgmr.msra.gmra.mxu0 %v5882_v5 }
  0x4e   : > { %1314 = vmatpush1.bf16.msra.mxu0 %v5109_v4  ;;  %1070 = vmatmul.mubr.bf16.vlgmr.msra.gmra.mxu1 %v5882_v5  ;;  %v5189_v4 = vld [vmem:[%s7010_s1 + $0x2a4] ss:$8 sps:$4 sm:$0xff]  }
  0x4f   : > { %1315 = vmatprep.subr.bf16.mxu0 %v5117_v8  ;;  %1614 = vmatpush1.bf16.msra.mxu1 %v5118_v10  ;;  %v5198_v8 = vld [vmem:[%s7010_s1 + $0x3a4] ss:$8 sps:$4 sm:$0xff]   ;;  %v5196_v10 = vld [vmem:[%s7010_s1 + $0x3a0] ss:$8 sps:$4 sm:$0xff]  }
  0x50   : > { %1615 = vmatprep.subr.bf16.mxu1 %v5126_v11  ;;  %779 = vmatprep.mubr.bf16.mxu0 %v5921_v21  ;;  %v5193_v11 = vld [vmem:[%s7010_s1 + $0x290] ss:$8 sps:$4 sm:$0xff]  }
  0x51   : > { %1079 = vmatprep.mubr.bf16.mxu1 %v5921_v21 }
  0x52   : > { %1316 = vmatpush1.bf16.msra.mxu0 %v5115_v9  ;;  %v5195_v9 = vld [vmem:[%s7010_s1 + $0x294] ss:$8 sps:$4 sm:$0xff]  }
  0x53   : > { %1317 = vmatprep.subr.bf16.mxu0 %v5123_v12  ;;  %1616 = vmatpush1.bf16.msra.mxu1 %v5124_v14  ;;  %v5204_v12 = vld [vmem:[%s7010_s1 + $0x394] ss:$8 sps:$4 sm:$0xff]   ;;  %v5202_v14 = vld [vmem:[%s7010_s1 + $0x390] ss:$8 sps:$4 sm:$0xff]  }
  0x54   : > { %1617 = vmatprep.subr.bf16.mxu1 %v5132_v15  ;;  %v5199_v15 = vld [vmem:[%s7010_s1 + $0x280] ss:$8 sps:$4 sm:$0xff]  }
  0x55   : > { %780 = vmatmul.mubr.bf16.gmra.mxu0 %v5923_v22 }
  0x56   : > { %1318 = vmatpush1.bf16.msra.mxu0 %v5121_v13  ;;  %1080 = vmatmul.mubr.bf16.gmra.mxu1 %v5923_v22  ;;  %v5201_v13 = vld [vmem:[%s7010_s1 + $0x284] ss:$8 sps:$4 sm:$0xff]  }
  0x57   : > { %1319 = vmatprep.subr.bf16.mxu0 %v5129_v20  ;;  %1618 = vmatpush1.bf16.msra.mxu1 %v5130_v24  ;;  %v5205_v20 = vld [vmem:[%s7010_s1 + $0x470] ss:$8 sps:$4 sm:$0xff]   ;;  %v5219_v24 = vld [vmem:[%s7010_s1 + $0x574] ss:$8 sps:$4 sm:$0xff]  }
  0x58   : > { %1619 = vmatprep.subr.bf16.mxu1 %v5138_v25  ;;  %789 = vmatprep.mubr.bf16.mxu0 %v5950_v33  ;;  %v5217_v25 = vld [vmem:[%s7010_s1 + $0x570] ss:$8 sps:$4 sm:$0xff]  }
  0x59   : > { %1089 = vmatprep.mubr.bf16.mxu1 %v5950_v33 }
  0x5a   : > { %1320 = vmatpush1.bf16.msra.mxu0 %v5127_v23  ;;  %v5213_v23 = vld [vmem:[%s7010_s1 + $0x464] ss:$8 sps:$4 sm:$0xff]  }
  0x5b   : > { %1321 = vmatprep.subr.bf16.mxu0 %v5135_v26  ;;  %1620 = vmatpush1.bf16.msra.mxu1 %v5136_v30  ;;  %v5211_v26 = vld [vmem:[%s7010_s1 + $0x460] ss:$8 sps:$4 sm:$0xff]   ;;  %v5214_v30 = vld [vmem:[%s7010_s1 + $0x450] ss:$8 sps:$4 sm:$0xff]  }
  0x5c   : > { %1621 = vmatprep.subr.bf16.mxu1 %v5144_v32  ;;  %v5222_v32 = vld [vmem:[%s7010_s1 + $0x444] ss:$8 sps:$4 sm:$0xff]  }
  0x5d   : > { %790 = vmatmul.mubr.bf16.gmra.mxu0 %v5957_v35 }
  0x5e   : > { %1322 = vmatpush1.bf16.msra.mxu0 %v5133_v31  ;;  %1345 = vmatprep.mubr.bf16.mxu0 %v5827_v51  ;;  %v5231_v31 = vld [vmem:[%s7010_s1 + $0x554] ss:$8 sps:$4 sm:$0xff]  }
  0x5f   : > { %1323 = vmatprep.subr.bf16.mxu0 %v5141_v34  ;;  %1622 = vmatpush1.bf16.msra.mxu1 %v5142_v36  ;;  %v5229_v34 = vld [vmem:[%s7010_s1 + $0x550] ss:$8 sps:$4 sm:$0xff]   ;;  %v5220_v36 = vld [vmem:[%s7010_s1 + $0x440] ss:$8 sps:$4 sm:$0xff]  }
  0x60   : > { %1623 = vmatprep.subr.bf16.mxu1 %v5150_v38  ;;  %1090 = vmatmul.mubr.bf16.gmra.mxu1 %v5957_v35  ;;  %v5228_v38 = vld [vmem:[%s7010_s1 + $0x434] ss:$8 sps:$4 sm:$0xff]  }
  0x61   : > { %1645 = vmatprep.mubr.bf16.mxu1 %v5827_v51 }
  0x62   : > { %1324 = vmatpush1.bf16.msra.mxu0 %v5139_v37  ;;  %v5237_v37 = vld [vmem:[%s7010_s1 + $0x544] ss:$8 sps:$4 sm:$0xff]  }
  0x63   : > { %1325 = vmatprep.subr.bf16.mxu0 %v5147_v39  ;;  %1624 = vmatpush1.bf16.msra.mxu1 %v5148_v40  ;;  %v5235_v39 = vld [vmem:[%s7010_s1 + $0x540] ss:$8 sps:$4 sm:$0xff]   ;;  %v5226_v40 = vld [vmem:[%s7010_s1 + $0x430] ss:$8 sps:$4 sm:$0xff]  }
  0x64   : > { %1625 = vmatprep.subr.bf16.mxu1 %v5156_v42  ;;  %v5234_v42 = vld [vmem:[%s7010_s1 + $0x424] ss:$8 sps:$4 sm:$0xff]  }
  0x66   : > { %1326 = vmatpush1.bf16.msra.mxu0 %v5145_v41  ;;  %v5243_v41 = vld [vmem:[%s7010_s1 + $0x534] ss:$8 sps:$4 sm:$0xff]  }
  0x67   : > { %1327 = vmatprep.subr.bf16.mxu0 %v5153_v43  ;;  %1626 = vmatpush1.bf16.msra.mxu1 %v5154_v44  ;;  %v5241_v43 = vld [vmem:[%s7010_s1 + $0x530] ss:$8 sps:$4 sm:$0xff]   ;;  %v5232_v44 = vld [vmem:[%s7010_s1 + $0x420] ss:$8 sps:$4 sm:$0xff]  }
  0x68   : > { %1627 = vmatprep.subr.bf16.mxu1 %v5162_v46  ;;  %v5240_v46 = vld [vmem:[%s7010_s1 + $0x414] ss:$8 sps:$4 sm:$0xff]  }
  0x6a   : > { %1328 = vmatpush1.bf16.msra.mxu0 %v5151_v45  ;;  %v5249_v45 = vld [vmem:[%s7010_s1 + $0x524] ss:$8 sps:$4 sm:$0xff]  }
  0x6b   : > { %1329 = vmatprep.subr.bf16.mxu0 %v5159_v47  ;;  %1628 = vmatpush1.bf16.msra.mxu1 %v5160_v48  ;;  %v5247_v47 = vld [vmem:[%s7010_s1 + $0x520] ss:$8 sps:$4 sm:$0xff]   ;;  %v5238_v48 = vld [vmem:[%s7010_s1 + $0x410] ss:$8 sps:$4 sm:$0xff]  }
  0x6c   : > { %1629 = vmatprep.subr.bf16.mxu1 %v5168_v50  ;;  %v5246_v50 = vld [vmem:[%s7010_s1 + $0x404] ss:$8 sps:$4 sm:$0xff]  }
  0x6e   : > { %1330 = vmatpush2.bf16.msra.mxu0 %v5157_v49  ;;  %v5255_v49 = vld [vmem:[%s7010_s1 + $0x514] ss:$8 sps:$4 sm:$0xff]  }
  0x6f   : > { %1331 = vmatprep.subr.bf16.mxu0 %v5165_v52  ;;  %1630 = vmatpush2.bf16.msra.mxu1 %v5166_v53  ;;  %v5253_v52 = vld [vmem:[%s7010_s1 + $0x510] ss:$8 sps:$4 sm:$0xff]   ;;  %v5244_v53 = vld [vmem:[%s7010_s1 + $0x400] ss:$8 sps:$4 sm:$0xff]  }
  0x70   : > { %1631 = vmatprep.subr.bf16.mxu1 %v5174_v55  ;;  %v5252_v55 = vld [vmem:[%s7010_s1 + $0x4f4] ss:$8 sps:$4 sm:$0xff]  }
  0x72   : > { %1332 = vmatpush2.bf16.msra.mxu0 %v5163_v54  ;;  %v5261_v54 = vld [vmem:[%s7010_s1 + $0x504] ss:$8 sps:$4 sm:$0xff]  }
  0x73   : > { %1333 = vmatprep.subr.bf16.mxu0 %v5171_v56  ;;  %1632 = vmatpush2.bf16.msra.mxu1 %v5172_v57  ;;  %v5259_v56 = vld [vmem:[%s7010_s1 + $0x500] ss:$8 sps:$4 sm:$0xff]   ;;  %v5250_v57 = vld [vmem:[%s7010_s1 + $0x4f0] ss:$8 sps:$4 sm:$0xff]  }
  0x74   : > { %1633 = vmatprep.subr.bf16.mxu1 %v5180_v59  ;;  %v5258_v59 = vld [vmem:[%s7010_s1 + $0x4e4] ss:$8 sps:$4 sm:$0xff]  }
  0x76   : > { %1334 = vmatpush2.bf16.msra.mxu0 %v5169_v58  ;;  %v5267_v58 = vld [vmem:[%s7010_s1 + $0x5f4] ss:$8 sps:$4 sm:$0xff]  }
  0x77   : > { %1335 = vmatprep.subr.bf16.mxu0 %v5177_v60  ;;  %1634 = vmatpush2.bf16.msra.mxu1 %v5178_v61  ;;  %v5265_v60 = vld [vmem:[%s7010_s1 + $0x5f0] ss:$8 sps:$4 sm:$0xff]   ;;  %v5256_v61 = vld [vmem:[%s7010_s1 + $0x4e0] ss:$8 sps:$4 sm:$0xff]  }
  0x78   : > { %1635 = vmatprep.subr.bf16.mxu1 %v5186_v63  ;;  %v5264_v63 = vld [vmem:[%s7010_s1 + $0x4d4] ss:$8 sps:$4 sm:$0xff]  }
  0x7a   : > { %1336 = vmatpush2.bf16.msra.mxu0 %v5175_v62  ;;  %v5273_v62 = vld [vmem:[%s7010_s1 + $0x5e4] ss:$8 sps:$4 sm:$0xff]  }
  0x7b   : > { %1337 = vmatprep.subr.bf16.mxu0 %v5183_v0  ;;  %1636 = vmatpush2.bf16.msra.mxu1 %v5184_v1  ;;  %v5271_v0 = vld [vmem:[%s7010_s1 + $0x5e0] ss:$8 sps:$4 sm:$0xff]   ;;  %v5262_v1 = vld [vmem:[%s7010_s1 + $0x4d0] ss:$8 sps:$4 sm:$0xff]  }
  0x7c   : > { %1637 = vmatprep.subr.bf16.mxu1 %v5192_v3  ;;  %v5270_v3 = vld [vmem:[%s7010_s1 + $0x4c4] ss:$8 sps:$4 sm:$0xff]  }
  0x7e   : > { %1338 = vmatpush2.bf16.msra.mxu0 %v5181_v2  ;;  %v5279_v2 = vld [vmem:[%s7010_s1 + $0x5d4] ss:$8 sps:$4 sm:$0xff]  }
  0x7f   : > { %1339 = vmatprep.subr.bf16.mxu0 %v5189_v4  ;;  %1638 = vmatpush2.bf16.msra.mxu1 %v5190_v6  ;;  %v5277_v4 = vld [vmem:[%s7010_s1 + $0x5d0] ss:$8 sps:$4 sm:$0xff]   ;;  %v5268_v6 = vld [vmem:[%s7010_s1 + $0x4c0] ss:$8 sps:$4 sm:$0xff]  }
  0x80   : > { %1639 = vmatprep.subr.bf16.mxu1 %v5198_v8  ;;  %v5276_v8 = vld [vmem:[%s7010_s1 + $0x4b4] ss:$8 sps:$4 sm:$0xff]  }
  0x82   : > { %1340 = vmatpush2.bf16.msra.mxu0 %v5187_v7  ;;  %v5285_v7 = vld [vmem:[%s7010_s1 + $0x5c4] ss:$8 sps:$4 sm:$0xff]  }
  0x83   : > { %1341 = vmatprep.subr.bf16.mxu0 %v5195_v9  ;;  %1640 = vmatpush2.bf16.msra.mxu1 %v5196_v10  ;;  %v5283_v9 = vld [vmem:[%s7010_s1 + $0x5c0] ss:$8 sps:$4 sm:$0xff]   ;;  %v5274_v10 = vld [vmem:[%s7010_s1 + $0x4b0] ss:$8 sps:$4 sm:$0xff]  }
  0x84   : > { %1641 = vmatprep.subr.bf16.mxu1 %v5204_v12  ;;  %v5282_v12 = vld [vmem:[%s7010_s1 + $0x4a4] ss:$8 sps:$4 sm:$0xff]  }
  0x86   : > { %1342 = vmatpush2.bf16.msra.mxu0 %v5193_v11  ;;  %v5291_v11 = vld [vmem:[%s7010_s1 + $0x5b4] ss:$8 sps:$4 sm:$0xff]  }
  0x87   : > { %1343 = vmatprep.subr.bf16.mxu0 %v5201_v13  ;;  %1642 = vmatpush2.bf16.msra.mxu1 %v5202_v14  ;;  %v5289_v13 = vld [vmem:[%s7010_s1 + $0x5b0] ss:$8 sps:$4 sm:$0xff]   ;;  %v5280_v14 = vld [vmem:[%s7010_s1 + $0x4a0] ss:$8 sps:$4 sm:$0xff]  }
  0x88   : > { %1643 = vmatprep.subr.bf16.mxu1 %v5210_v16  ;;  %v5288_v16 = vld [vmem:[%s7010_s1 + $0x494] ss:$8 sps:$4 sm:$0xff]  }
  0x8a   : > { %1344 = vmatpush2.bf16.msra.mxu0 %v5199_v15  ;;  %v5297_v15 = vld [vmem:[%s7010_s1 + $0x5a4] ss:$8 sps:$4 sm:$0xff]  }
  0x8b   : > { %1913 = vmatprep.subr.bf16.mxu0 %v5207_v17  ;;  %1644 = vmatpush2.bf16.msra.mxu1 %v5208_v18  ;;  %v5295_v17 = vld [vmem:[%s7010_s1 + $0x5a0] ss:$8 sps:$4 sm:$0xff]   ;;  %v5286_v18 = vld [vmem:[%s7010_s1 + $0x490] ss:$8 sps:$4 sm:$0xff]  }
  0x8c   : > { %2189 = vmatprep.subr.bf16.mxu1 %v5219_v24  ;;  %v5292_v24 = vld [vmem:[%s7010_s1 + $0x480] ss:$8 sps:$4 sm:$0xff]  }
  0x8d   : > { %1346 = vmatmul.mubr.bf16.vlgmr.msra.gmra.mxu0 %v5882_v5 }
  0x8e   : > { %1914 = vmatpush1.bf16.msra.mxu0 %v5205_v20  ;;  %1355 = vmatprep.mubr.bf16.mxu0 %v5921_v21  ;;  %v5294_v20 = vld [vmem:[%s7010_s1 + $0x484] ss:$8 sps:$4 sm:$0xff]  }
  0x8f   : > { %1915 = vmatprep.subr.bf16.mxu0 %v5213_v23  ;;  %1646 = vmatmul.mubr.bf16.vlgmr.msra.gmra.mxu1 %v5882_v5  ;;  %v5298_v23 = vld [vmem:[%s7010_s1 + $0x590] ss:$8 sps:$4 sm:$0xff]  }
  0x90   : > { %2190 = vmatpush1.bf16.msra.mxu1 %v5217_v25  ;;  %1653 = vmatprep.mubr.bf16.mxu1 %v5921_v21  ;;  %v5306_v25 = vld [vmem:[%s7010_s1 + $0x584] ss:$8 sps:$4 sm:$0xff]  }
  0x91   : > { %2191 = vmatprep.subr.bf16.mxu1 %v5225_v27  ;;  %v5304_v27 = vld [vmem:[%s7010_s1 + $0x580] ss:$8 sps:$4 sm:$0xff]  }
  0x92   : > { %1916 = vmatpush1.bf16.msra.mxu0 %v5211_v26  ;;  %v5303_v26 = vld [vmem:[%s7010_s1 + $0x674] ss:$8 sps:$4 sm:$0xff]  }
  0x93   : > { %1917 = vmatprep.subr.bf16.mxu0 %v5216_v28  ;;  %v5301_v28 = vld [vmem:[%s7010_s1 + $0x670] ss:$8 sps:$4 sm:$0xff]  }
  0x94   : > { %2192 = vmatpush1.bf16.msra.mxu1 %v5223_v29  ;;  %v5309_v29 = vld [vmem:[%s7010_s1 + $0x664] ss:$8 sps:$4 sm:$0xff]  }
  0x95   : > { %1356 = vmatmul.mubr.bf16.gmra.mxu0 %v5923_v22  ;;  %2193 = vmatprep.subr.bf16.mxu1 %v5231_v31  ;;  %v5316_v31 = vld [vmem:[%s7010_s1 + $0x770] ss:$8 sps:$4 sm:$0xff]  }
  0x96   : > { %1918 = vmatpush1.bf16.msra.mxu0 %v5214_v30  ;;  %1365 = vmatprep.mubr.bf16.mxu0 %v5950_v33  ;;  %v5318_v30 = vld [vmem:[%s7010_s1 + $0x774] ss:$8 sps:$4 sm:$0xff]  }
  0x97   : > { %1919 = vmatprep.subr.bf16.mxu0 %v5222_v32  ;;  %1654 = vmatmul.mubr.bf16.gmra.mxu1 %v5923_v22  ;;  %v5307_v32 = vld [vmem:[%s7010_s1 + $0x660] ss:$8 sps:$4 sm:$0xff]  }
  0x98   : > { %2194 = vmatpush1.bf16.msra.mxu1 %v5229_v34  ;;  %1663 = vmatprep.mubr.bf16.mxu1 %v5950_v33  ;;  %v5324_v34 = vld [vmem:[%s7010_s1 + $0x764] ss:$8 sps:$4 sm:$0xff]  }
  0x99   : > { %2195 = vmatprep.subr.bf16.mxu1 %v5237_v37  ;;  %v5322_v37 = vld [vmem:[%s7010_s1 + $0x760] ss:$8 sps:$4 sm:$0xff]  }
  0x9a   : > { %1920 = vmatpush1.bf16.msra.mxu0 %v5220_v36  ;;  %v5312_v36 = vld [vmem:[%s7010_s1 + $0x654] ss:$8 sps:$4 sm:$0xff]  }
  0x9b   : > { %1921 = vmatprep.subr.bf16.mxu0 %v5228_v38  ;;  %v5310_v38 = vld [vmem:[%s7010_s1 + $0x650] ss:$8 sps:$4 sm:$0xff]  }
  0x9c   : > { %2196 = vmatpush1.bf16.msra.mxu1 %v5235_v39  ;;  %v5315_v39 = vld [vmem:[%s7010_s1 + $0x644] ss:$8 sps:$4 sm:$0xff]  }
  0x9d   : > { %1366 = vmatmul.mubr.bf16.gmra.mxu0 %v5957_v35  ;;  %2197 = vmatprep.subr.bf16.mxu1 %v5243_v41  ;;  %v5328_v41 = vld [vmem:[%s7010_s1 + $0x750] ss:$8 sps:$4 sm:$0xff]  }
  0x9e   : > { %1922 = vmatpush1.bf16.msra.mxu0 %v5226_v40  ;;  %1945 = vmatprep.mubr.bf16.mxu0 %v5827_v51  ;;  %v5330_v40 = vld [vmem:[%s7010_s1 + $0x754] ss:$8 sps:$4 sm:$0xff]  }
  0x9f   : > { %1923 = vmatprep.subr.bf16.mxu0 %v5234_v42  ;;  %1664 = vmatmul.mubr.bf16.gmra.mxu1 %v5957_v35  ;;  %v5313_v42 = vld [vmem:[%s7010_s1 + $0x640] ss:$8 sps:$4 sm:$0xff]  }
  0xa0   : > { %2198 = vmatpush1.bf16.msra.mxu1 %v5241_v43  ;;  %2221 = vmatprep.mubr.bf16.mxu1 %v5827_v51  ;;  %v5336_v43 = vld [vmem:[%s7010_s1 + $0x744] ss:$8 sps:$4 sm:$0xff]  }
  0xa1   : > { %2199 = vmatprep.subr.bf16.mxu1 %v5249_v45  ;;  %v5334_v45 = vld [vmem:[%s7010_s1 + $0x740] ss:$8 sps:$4 sm:$0xff]  }
  0xa2   : > { %1924 = vmatpush1.bf16.msra.mxu0 %v5232_v44  ;;  %v5321_v44 = vld [vmem:[%s7010_s1 + $0x634] ss:$8 sps:$4 sm:$0xff]  }
  0xa3   : > { %1925 = vmatprep.subr.bf16.mxu0 %v5240_v46  ;;  %v5319_v46 = vld [vmem:[%s7010_s1 + $0x630] ss:$8 sps:$4 sm:$0xff]  }
  0xa4   : > { %2200 = vmatpush1.bf16.msra.mxu1 %v5247_v47  ;;  %v5342_v47 = vld [vmem:[%s7010_s1 + $0x734] ss:$8 sps:$4 sm:$0xff]  }
  0xa5   : > { %2201 = vmatprep.subr.bf16.mxu1 %v5255_v49  ;;  %v5340_v49 = vld [vmem:[%s7010_s1 + $0x730] ss:$8 sps:$4 sm:$0xff]  }
  0xa6   : > { %1926 = vmatpush1.bf16.msra.mxu0 %v5238_v48  ;;  %v5327_v48 = vld [vmem:[%s7010_s1 + $0x624] ss:$8 sps:$4 sm:$0xff]  }
  0xa7   : > { %1927 = vmatprep.subr.bf16.mxu0 %v5246_v50  ;;  %v5325_v50 = vld [vmem:[%s7010_s1 + $0x620] ss:$8 sps:$4 sm:$0xff]  }
  0xa8   : > { %2202 = vmatpush1.bf16.msra.mxu1 %v5253_v52  ;;  %v5348_v52 = vld [vmem:[%s7010_s1 + $0x724] ss:$8 sps:$4 sm:$0xff]  }
  0xa9   : > { %2203 = vmatprep.subr.bf16.mxu1 %v5261_v54  ;;  %v5346_v54 = vld [vmem:[%s7010_s1 + $0x720] ss:$8 sps:$4 sm:$0xff]  }
  0xaa   : > { %1928 = vmatpush1.bf16.msra.mxu0 %v5244_v53  ;;  %v5333_v53 = vld [vmem:[%s7010_s1 + $0x614] ss:$8 sps:$4 sm:$0xff]  }
  0xab   : > { %1929 = vmatprep.subr.bf16.mxu0 %v5252_v55  ;;  %v5331_v55 = vld [vmem:[%s7010_s1 + $0x610] ss:$8 sps:$4 sm:$0xff]  }
  0xac   : > { %2204 = vmatpush1.bf16.msra.mxu1 %v5259_v56  ;;  %v5354_v56 = vld [vmem:[%s7010_s1 + $0x714] ss:$8 sps:$4 sm:$0xff]  }
  0xad   : > { %2205 = vmatprep.subr.bf16.mxu1 %v5267_v58  ;;  %v5352_v58 = vld [vmem:[%s7010_s1 + $0x710] ss:$8 sps:$4 sm:$0xff]  }
  0xae   : > { %1930 = vmatpush2.bf16.msra.mxu0 %v5250_v57  ;;  %v5339_v57 = vld [vmem:[%s7010_s1 + $0x604] ss:$8 sps:$4 sm:$0xff]  }
  0xaf   : > { %1931 = vmatprep.subr.bf16.mxu0 %v5258_v59  ;;  %v5337_v59 = vld [vmem:[%s7010_s1 + $0x600] ss:$8 sps:$4 sm:$0xff]  }
  0xb0   : > { %2206 = vmatpush2.bf16.msra.mxu1 %v5265_v60  ;;  %v5360_v60 = vld [vmem:[%s7010_s1 + $0x704] ss:$8 sps:$4 sm:$0xff]  }
  0xb1   : > { %2207 = vmatprep.subr.bf16.mxu1 %v5273_v62  ;;  %v5358_v62 = vld [vmem:[%s7010_s1 + $0x700] ss:$8 sps:$4 sm:$0xff]  }
  0xb2   : > { %1932 = vmatpush2.bf16.msra.mxu0 %v5256_v61  ;;  %v5345_v61 = vld [vmem:[%s7010_s1 + $0x6f4] ss:$8 sps:$4 sm:$0xff]  }
  0xb3   : > { %1933 = vmatprep.subr.bf16.mxu0 %v5264_v63  ;;  %v5343_v63 = vld [vmem:[%s7010_s1 + $0x6f0] ss:$8 sps:$4 sm:$0xff]  }
  0xb4   : > { %2208 = vmatpush2.bf16.msra.mxu1 %v5271_v0  ;;  %v5366_v0 = vld [vmem:[%s7010_s1 + $0x7f4] ss:$8 sps:$4 sm:$0xff]  }
  0xb5   : > { %2209 = vmatprep.subr.bf16.mxu1 %v5279_v2  ;;  %v5364_v2 = vld [vmem:[%s7010_s1 + $0x7f0] ss:$8 sps:$4 sm:$0xff]  }
  0xb6   : > { %1934 = vmatpush2.bf16.msra.mxu0 %v5262_v1  ;;  %v5351_v1 = vld [vmem:[%s7010_s1 + $0x6e4] ss:$8 sps:$4 sm:$0xff]  }
  0xb7   : > { %1935 = vmatprep.subr.bf16.mxu0 %v5270_v3  ;;  %v5349_v3 = vld [vmem:[%s7010_s1 + $0x6e0] ss:$8 sps:$4 sm:$0xff]  }
  0xb8   : > { %2210 = vmatpush2.bf16.msra.mxu1 %v5277_v4  ;;  %v5372_v4 = vld [vmem:[%s7010_s1 + $0x7e4] ss:$8 sps:$4 sm:$0xff]  }
  0xb9   : > { %2211 = vmatprep.subr.bf16.mxu1 %v5285_v7  ;;  %v5370_v7 = vld [vmem:[%s7010_s1 + $0x7e0] ss:$8 sps:$4 sm:$0xff]  }
  0xba   : > { %1936 = vmatpush2.bf16.msra.mxu0 %v5268_v6  ;;  %v5357_v6 = vld [vmem:[%s7010_s1 + $0x6d4] ss:$8 sps:$4 sm:$0xff]  }
  0xbb   : > { %1937 = vmatprep.subr.bf16.mxu0 %v5276_v8  ;;  %v5355_v8 = vld [vmem:[%s7010_s1 + $0x6d0] ss:$8 sps:$4 sm:$0xff]  }
  0xbc   : > { %2212 = vmatpush2.bf16.msra.mxu1 %v5283_v9  ;;  %v5378_v9 = vld [vmem:[%s7010_s1 + $0x7d4] ss:$8 sps:$4 sm:$0xff]  }
  0xbd   : > { %2213 = vmatprep.subr.bf16.mxu1 %v5291_v11  ;;  %v5376_v11 = vld [vmem:[%s7010_s1 + $0x7d0] ss:$8 sps:$4 sm:$0xff]  }
  0xbe   : > { %1938 = vmatpush2.bf16.msra.mxu0 %v5274_v10  ;;  %v5363_v10 = vld [vmem:[%s7010_s1 + $0x6c4] ss:$8 sps:$4 sm:$0xff]  }
  0xbf   : > { %1939 = vmatprep.subr.bf16.mxu0 %v5282_v12  ;;  %v5361_v12 = vld [vmem:[%s7010_s1 + $0x6c0] ss:$8 sps:$4 sm:$0xff]  }
  0xc0   : > { %2214 = vmatpush2.bf16.msra.mxu1 %v5289_v13  ;;  %v5384_v13 = vld [vmem:[%s7010_s1 + $0x7c4] ss:$8 sps:$4 sm:$0xff]  }
  0xc1   : > { %2215 = vmatprep.subr.bf16.mxu1 %v5297_v15  ;;  %v5382_v15 = vld [vmem:[%s7010_s1 + $0x7c0] ss:$8 sps:$4 sm:$0xff]  }
  0xc2   : > { %1940 = vmatpush2.bf16.msra.mxu0 %v5280_v14  ;;  %v5369_v14 = vld [vmem:[%s7010_s1 + $0x6b4] ss:$8 sps:$4 sm:$0xff]  }
  0xc3   : > { %1941 = vmatprep.subr.bf16.mxu0 %v5288_v16  ;;  %v5367_v16 = vld [vmem:[%s7010_s1 + $0x6b0] ss:$8 sps:$4 sm:$0xff]  }
  0xc4   : > { %2216 = vmatpush2.bf16.msra.mxu1 %v5295_v17  ;;  %v5390_v17 = vld [vmem:[%s7010_s1 + $0x7b4] ss:$8 sps:$4 sm:$0xff]  }
  0xc5   : > { %2217 = vmatprep.subr.bf16.mxu1 %v5300_v19  ;;  %v5388_v19 = vld [vmem:[%s7010_s1 + $0x7b0] ss:$8 sps:$4 sm:$0xff]  }
  0xc6   : > { %1942 = vmatpush2.bf16.msra.mxu0 %v5286_v18  ;;  %v5375_v18 = vld [vmem:[%s7010_s1 + $0x6a4] ss:$8 sps:$4 sm:$0xff]  }
  0xc7   : > { %1943 = vmatprep.subr.bf16.mxu0 %v5294_v20  ;;  %v5373_v20 = vld [vmem:[%s7010_s1 + $0x6a0] ss:$8 sps:$4 sm:$0xff]  }
  0xc8   : > { %2218 = vmatpush2.bf16.msra.mxu1 %v5298_v23  ;;  %v5393_v23 = vld [vmem:[%s7010_s1 + $0x7a4] ss:$8 sps:$4 sm:$0xff]  }
  0xc9   : > { %2219 = vmatprep.subr.bf16.mxu1 %v5306_v25  ;;  %v5391_v25 = vld [vmem:[%s7010_s1 + $0x7a0] ss:$8 sps:$4 sm:$0xff]  }
  0xca   : > { %1944 = vmatpush2.bf16.msra.mxu0 %v5292_v24  ;;  %v5381_v24 = vld [vmem:[%s7010_s1 + $0x694] ss:$8 sps:$4 sm:$0xff]  }
  0xcb   : > { %2489 = vmatprep.subr.bf16.mxu0 %v5303_v26  ;;  %v5379_v26 = vld [vmem:[%s7010_s1 + $0x690] ss:$8 sps:$4 sm:$0xff]  }
  0xcc   : > { %2220 = vmatpush2.bf16.msra.mxu1 %v5304_v27  ;;  %v5399_v27 = vld [vmem:[%s7010_s1 + $0x794] ss:$8 sps:$4 sm:$0xff]  }
  0xcd   : > { %1946 = vmatmul.mubr.bf16.vlgmr.msra.gmra.mxu0 %v5882_v5  ;;  %2789 = vmatprep.subr.bf16.mxu1 %v5318_v30  ;;  %v5385_v30 = vld [vmem:[%s7010_s1 + $0x680] ss:$8 sps:$4 sm:$0xff]  }
  0xce   : > { %2490 = vmatpush1.bf16.msra.mxu0 %v5301_v28  ;;  %1953 = vmatprep.mubr.bf16.mxu0 %v5921_v21  ;;  %v5387_v28 = vld [vmem:[%s7010_s1 + $0x684] ss:$8 sps:$4 sm:$0xff]  }
  0xcf   : > { %2491 = vmatprep.subr.bf16.mxu0 %v5309_v29  ;;  %2222 = vmatmul.mubr.bf16.vlgmr.msra.gmra.mxu1 %v5882_v5  ;;  %v5397_v29 = vld [vmem:[%s7010_s1 + $0x790] ss:$8 sps:$4 sm:$0xff]  }
  0xd0   : > { %2790 = vmatpush1.bf16.msra.mxu1 %v5316_v31  ;;  %2229 = vmatprep.mubr.bf16.mxu1 %v5921_v21  ;;  %v5405_v31 = vld [vmem:[%s7010_s1 + $0x784] ss:$8 sps:$4 sm:$0xff]  }
  0xd1   : > { %2791 = vmatprep.subr.bf16.mxu1 %v5324_v34  ;;  %v5403_v34 = vld [vmem:[%s7010_s1 + $0x780] ss:$8 sps:$4 sm:$0xff]  }
  0xd2   : > { %2492 = vmatpush1.bf16.msra.mxu0 %v5307_v32  ;;  %v5396_v32 = vld [vmem:[%s7010_s1 + $0x874] ss:$8 sps:$4 sm:$0xff]  }
  0xd3   : > { %2493 = vmatprep.subr.bf16.mxu0 %v5312_v36  ;;  %v5394_v36 = vld [vmem:[%s7010_s1 + $0x870] ss:$8 sps:$4 sm:$0xff]  }
  0xd4   : > { %2792 = vmatpush1.bf16.msra.mxu1 %v5322_v37  ;;  %v5402_v37 = vld [vmem:[%s7010_s1 + $0x864] ss:$8 sps:$4 sm:$0xff]  }
  0xd5   : > { %1954 = vmatmul.mubr.bf16.gmra.mxu0 %v5923_v22  ;;  %2793 = vmatprep.subr.bf16.mxu1 %v5330_v40 }
  0xd6   : > { %2494 = vmatpush1.bf16.msra.mxu0 %v5310_v38  ;;  %1963 = vmatprep.mubr.bf16.mxu0 %v5950_v33 }
  0xd7   : > { %2495 = vmatprep.subr.bf16.mxu0 %v5315_v39  ;;  %2230 = vmatmul.mubr.bf16.gmra.mxu1 %v5923_v22  ;;  %v796_v39 = vld [vmem:[#allocation3 + $0x30] sm:$0xfe] }
  0xd8   : > { %2794 = vmatpush1.bf16.msra.mxu1 %v5328_v41  ;;  %2239 = vmatprep.mubr.bf16.mxu1 %v5950_v33  ;;  %v5400_v41 = vld [vmem:[%s7010_s1 + $0x860] ss:$8 sps:$4 sm:$0xff]  }
  0xd9   : > { %2795 = vmatprep.subr.bf16.mxu1 %v5336_v43  ;;  %v797_v43 = vld [vmem:[#allocation3] sm:$0xfe] }
  0xda   : > { %2496 = vmatpush1.bf16.msra.mxu0 %v5313_v42 }
  0xdb   : > { %2497 = vmatprep.subr.bf16.mxu0 %v5321_v44  ;;  %v5408_v44 = vld [vmem:[%s7010_s1 + $0x854] ss:$8 sps:$4 sm:$0xff]  }
  0xdc   : > { %2796 = vmatpush1.bf16.msra.mxu1 %v5334_v45 }
  0xdd   : > { %1964 = vmatmul.mubr.bf16.gmra.mxu0 %v5957_v35  ;;  %2797 = vmatprep.subr.bf16.mxu1 %v5342_v47 }
  0xde   : > { %2498 = vmatpush1.bf16.msra.mxu0 %v5319_v46  ;;  %2521 = vmatprep.mubr.bf16.mxu0 %v5827_v51 }
  0xdf   : > { %2499 = vmatprep.subr.bf16.mxu0 %v5327_v48  ;;  %2240 = vmatmul.mubr.bf16.gmra.mxu1 %v5957_v35 }
  0xe0   : > { %2798 = vmatpush1.bf16.msra.mxu1 %v5340_v49  ;;  %2821 = vmatprep.mubr.bf16.mxu1 %v5827_v51  ;;  %v798_v49 = vld [vmem:[#allocation3 + $0x18] sm:$0xfe] }
  0xe1   : > { %2799 = vmatprep.subr.bf16.mxu1 %v5348_v52 }
  0xe2   : > { %2500 = vmatpush1.bf16.msra.mxu0 %v5325_v50 }
  0xe3   : > { %2501 = vmatprep.subr.bf16.mxu0 %v5333_v53  ;;  %v5406_v53 = vld [vmem:[%s7010_s1 + $0x850] ss:$8 sps:$4 sm:$0xff]  }
  0xe4   : > { %2800 = vmatpush1.bf16.msra.mxu1 %v5346_v54 }
  0xe5   : > { %2801 = vmatprep.subr.bf16.mxu1 %v5354_v56  ;;  %v799_v56 = vld [vmem:[#allocation3 + $0x10] sm:$0xfe] }
  0xe6   : > { %2502 = vmatpush1.bf16.msra.mxu0 %v5331_v55 }
  0xe7   : > { %2503 = vmatprep.subr.bf16.mxu0 %v5339_v57  ;;  %v5411_v57 = vld [vmem:[%s7010_s1 + $0x844] ss:$8 sps:$4 sm:$0xff]  }
  0xe8   : > { %2802 = vmatpush1.bf16.msra.mxu1 %v5352_v58 }
  0xe9   : > { %2803 = vmatprep.subr.bf16.mxu1 %v5360_v60 }
  0xea   : > { %2504 = vmatpush1.bf16.msra.mxu0 %v5337_v59 }
  0xeb   : > { %2505 = vmatprep.subr.bf16.mxu0 %v5345_v61 }
  0xec   : > { %2804 = vmatpush1.bf16.msra.mxu1 %v5358_v62  ;;  %v5409_v62 = vld [vmem:[%s7010_s1 + $0x840] ss:$8 sps:$4 sm:$0xff]  }
  0xed   : > { %2805 = vmatprep.subr.bf16.mxu1 %v5366_v0 }
  0xee   : > { %2506 = vmatpush2.bf16.msra.mxu0 %v5343_v63  ;;  %v5414_v63 = vld [vmem:[%s7010_s1 + $0x834] ss:$8 sps:$4 sm:$0xff]  }
  0xef   : > { %2507 = vmatprep.subr.bf16.mxu0 %v5351_v1  ;;  %v800_v1 = vld [vmem:[#allocation3 + $0x8] sm:$0xfe] }
  0xf0   : > { %2806 = vmatpush2.bf16.msra.mxu1 %v5364_v2 }
  0xf1   : > { %2807 = vmatprep.subr.bf16.mxu1 %v5372_v4 }
  0xf2   : > { %2508 = vmatpush2.bf16.msra.mxu0 %v5349_v3 }
  0xf3   : > { %2509 = vmatprep.subr.bf16.mxu0 %v5357_v6 }
  0xf4   : > { %2808 = vmatpush2.bf16.msra.mxu1 %v5370_v7  ;;  %v5412_v7 = vld [vmem:[%s7010_s1 + $0x830] ss:$8 sps:$4 sm:$0xff]  }
  0xf5   : > { %2809 = vmatprep.subr.bf16.mxu1 %v5378_v9  ;;  %v801_v9 = vld [vmem:[#allocation3 + $0x20] sm:$0xfe] }
  0xf6   : > { %2510 = vmatpush2.bf16.msra.mxu0 %v5355_v8 }
  0xf7   : > { %2511 = vmatprep.subr.bf16.mxu0 %v5363_v10 }
  0xf8   : > { %2810 = vmatpush2.bf16.msra.mxu1 %v5376_v11  ;;  %v5417_v11 = vld [vmem:[%s7010_s1 + $0x824] ss:$8 sps:$4 sm:$0xff]  }
  0xf9   : > { %2811 = vmatprep.subr.bf16.mxu1 %v5384_v13 }
  0xfa   : > { %2512 = vmatpush2.bf16.msra.mxu0 %v5361_v12 }
  0xfb   : > { %2513 = vmatprep.subr.bf16.mxu0 %v5369_v14 }
  0xfc   : > { %2812 = vmatpush2.bf16.msra.mxu1 %v5382_v15 }
  0xfd   : > { %2813 = vmatprep.subr.bf16.mxu1 %v5390_v17  ;;  %v802_v17 = vld [vmem:[#allocation3 + $0x28] sm:$0xfe] }
  0xfe   : > { %2514 = vmatpush2.bf16.msra.mxu0 %v5367_v16 }
  0xff   : > { %2515 = vmatprep.subr.bf16.mxu0 %v5375_v18 }
 0x100   : > { %2814 = vmatpush2.bf16.msra.mxu1 %v5388_v19 }
 0x101   : > { %2815 = vmatprep.subr.bf16.mxu1 %v5393_v23 }
 0x102   : > { %2516 = vmatpush2.bf16.msra.mxu0 %v5373_v20 }
 0x103   : > { %2517 = vmatprep.subr.bf16.mxu0 %v5381_v24 }
 0x104   : > { %2816 = vmatpush2.bf16.msra.mxu1 %v5391_v25  ;;  %v5415_v25 = vld [vmem:[%s7010_s1 + $0x820] ss:$8 sps:$4 sm:$0xff]  }
 0x105   : > { %2817 = vmatprep.subr.bf16.mxu1 %v5399_v27  ;;  %v803_v27 = vld [vmem:[#allocation3 + $0x38] sm:$0xfe] }
 0x106   : > { %2518 = vmatpush2.bf16.msra.mxu0 %v5379_v26 }
 0x107   : > { %2519 = vmatprep.subr.bf16.mxu0 %v5387_v28 }
 0x108   : > { %2818 = vmatpush2.bf16.msra.mxu1 %v5397_v29  ;;  %v5420_v29 = vld [vmem:[%s7010_s1 + $0x814] ss:$8 sps:$4 sm:$0xff]  }
 0x109   : > { %2819 = vmatprep.subr.bf16.mxu1 %v5405_v31 }
 0x10a   : > { %2520 = vmatpush2.bf16.msra.mxu0 %v5385_v30 }
 0x10b   : > { %3065 = vmatprep.subr.bf16.mxu0 %v5396_v32 }
 0x10c   : > { %2820 = vmatpush2.bf16.msra.mxu1 %v5403_v34 }
 0x10d   : > { %v771_v38 = vpop.f32.mrf.mxu0  ;;  %2522 = vmatmul.mubr.bf16.vlgmr.msra.gmra.mxu0 %v5882_v5 }
 0x10e   : > { %v812_v40 = vrot.slane %v771_v38, 7  ;;  %3066 = vmatpush1.bf16.msra.mxu0 %v5394_v36  ;;  %2527 = vmatprep.mubr.bf16.mxu0 %v5921_v21  ;;  %v1071_v47 = vpop.f32.mrf.mxu1 }
 0x10f   : > { %v773_v42 = vpop.f32.mrf.mxu0  ;;  %3067 = vmatprep.subr.bf16.mxu0 %v5402_v37  ;;  %2822 = vmatmul.mubr.bf16.vlgmr.msra.gmra.mxu1 %v5882_v5 }
 0x110   : > { %v828_v45 = vadd.f32 %v812_v40, %v796_v39  ;;  %v813_v46 = vrot.slane %v773_v42, 7  ;;  %2827 = vmatprep.mubr.bf16.mxu1 %v5921_v21  ;;  %v1073_v54 = vpop.f32.mrf.mxu1  ;;  %v5423_v40 = vld [vmem:[%s7010_s1 + $0x804] ss:$8 sps:$4 sm:$0xff]  }
 0x111   : > { %v775_v48 = vpop.f32.mrf.mxu0 }
 0x112   : > { %836 = vst [vmem:[#allocation3 + $0x30] sm:$0xfe] %v828_v45  ;;  %v829_v50 = vadd.f32 %v813_v46, %v797_v43  ;;  %v814_v52 = vrot.slane %v775_v48, 7  ;;  %3068 = vmatpush1.bf16.msra.mxu0 %v5400_v41  ;;  %v1075_v60 = vpop.f32.mrf.mxu1  ;;  %v5421_v46 = vld [vmem:[%s7010_s1 + $0x800] ss:$8 sps:$4 sm:$0xff]  }
 0x113   : > { %v777_v55 = vpop.f32.mrf.mxu0  ;;  %3069 = vmatprep.subr.bf16.mxu0 %v5408_v44 }
 0x114   : > { %837 = vst [vmem:[#allocation3] sm:$0xfe] %v829_v50  ;;  %v830_v58 = vadd.f32 %v814_v52, %v798_v49  ;;  %v815_v59 = vrot.slane %v777_v55, 7  ;;  %v1077_v3 = vpop.f32.mrf.mxu1  ;;  %v5426_v49 = vld [vmem:[%s7010_s1 + $0x8f4] ss:$8 sps:$4 sm:$0xff]  }
 0x115   : > { %2528 = vmatmul.mubr.bf16.gmra.mxu0 %v5923_v22  ;;  %v781_v0 = vpop.f32.mrf.mxu0 }
 0x116   : > { %838 = vst [vmem:[#allocation3 + $0x18] sm:$0xfe] %v830_v58  ;;  %v831_v61 = vadd.f32 %v815_v59, %v799_v56  ;;  %3070 = vmatpush1.bf16.msra.mxu0 %v5406_v53  ;;  %2537 = vmatprep.mubr.bf16.mxu0 %v5950_v33  ;;  %v816_v4 = vrot.slane %v781_v0, 7  ;;  %v1081_v14 = vpop.f32.mrf.mxu1  ;;  %v5424_v56 = vld [vmem:[%s7010_s1 + $0x8f0] ss:$8 sps:$4 sm:$0xff]  }
 0x117   : > { %3071 = vmatprep.subr.bf16.mxu0 %v5411_v57  ;;  %2828 = vmatmul.mubr.bf16.gmra.mxu1 %v5923_v22  ;;  %v783_v8 = vpop.f32.mrf.mxu0  ;;  %v5429_v58 = vld [vmem:[%s7010_s1 + $0x8e4] ss:$8 sps:$4 sm:$0xff]   ;;  %v5433_v0 = vld [vmem:[%s7010_s1 + $0x8c0] ss:$8 sps:$4 sm:$0xff]  }
 0x118   : > { %839 = vst [vmem:[#allocation3 + $0x10] sm:$0xfe] %v831_v61  ;;  %2837 = vmatprep.mubr.bf16.mxu1 %v5950_v33  ;;  %v832_v12 = vadd.f32 %v816_v4, %v800_v1  ;;  %v817_v13 = vrot.slane %v783_v8, 7  ;;  %v1083_v23 = vpop.f32.mrf.mxu1  ;;  %v5432_v61 = vld [vmem:[%s7010_s1 + $0x8d4] ss:$8 sps:$4 sm:$0xff]  }
 0x119   : > { %v1096_v2 = vld [vmem:[#allocation3 + $0x30] sm:$0xff]  ;;  %v785_v16 = vpop.f32.mrf.mxu0  ;;  %v5439_v4 = vld [vmem:[%s7010_s1 + $0x8a0] ss:$8 sps:$4 sm:$0xff]   ;;  %v5447_v8 = vld [vmem:[%s7010_s1 + $0x884] ss:$8 sps:$4 sm:$0xff]  }
 0x11a   : > { %v1104_v6 = vadd.f32 %v1096_v2, %v1071_v47  ;;  %3072 = vmatpush1.bf16.msra.mxu0 %v5409_v62  ;;  %840 = vst [vmem:[#allocation3 + $0x8] sm:$0xfe] %v832_v12  ;;  %v833_v19 = vadd.f32 %v817_v13, %v801_v9  ;;  %v818_v20 = vrot.slane %v785_v16, 7  ;;  %v1085_v32 = vpop.f32.mrf.mxu1  ;;  %v5430_v62 = vld [vmem:[%s7010_s1 + $0x8d0] ss:$8 sps:$4 sm:$0xff]  }
 0x11b   : > { %v1097_v10 = vld [vmem:[#allocation3] sm:$0xff]  ;;  %3073 = vmatprep.subr.bf16.mxu0 %v5414_v63  ;;  %v787_v26 = vpop.f32.mrf.mxu0  ;;  %v5438_v1 = vld [vmem:[%s7010_s1 + $0x8b4] ss:$8 sps:$4 sm:$0xff]   ;;  %v5436_v2 = vld [vmem:[%s7010_s1 + $0x8b0] ss:$8 sps:$4 sm:$0xff]  }
 0x11c   : > { %1112 = vst [vmem:[#allocation3 + $0x30] sm:$0xff] %v1104_v6  ;;  %v1105_v15 = vadd.f32 %v1097_v10, %v1073_v54  ;;  %841 = vst [vmem:[#allocation3 + $0x20] sm:$0xfe] %v833_v19  ;;  %v834_v30 = vadd.f32 %v818_v20, %v802_v17  ;;  %v819_v31 = vrot.slane %v787_v26, 7  ;;  %v1087_v38 = vpop.f32.mrf.mxu1  ;;  %v5435_v63 = vld [vmem:[%s7010_s1 + $0x8c4] ss:$8 sps:$4 sm:$0xff]  }
 0x11d   : > { %v1098_v18 = vld [vmem:[#allocation3 + $0x18] sm:$0xff]  ;;  %2538 = vmatmul.mubr.bf16.gmra.mxu0 %v5957_v35  ;;  %v791_v36 = vpop.f32.mrf.mxu0  ;;  %v5445_v9 = vld [vmem:[%s7010_s1 + $0x880] ss:$8 sps:$4 sm:$0xff]  }
 0x11e   : > { %1113 = vst [vmem:[#allocation3] sm:$0xff] %v1105_v15  ;;  %v1106_v24 = vadd.f32 %v1098_v18, %v1075_v60  ;;  %3074 = vmatpush1.bf16.msra.mxu0 %v5412_v7  ;;  %3097 = vmatprep.mubr.bf16.mxu0 %v5827_v51  ;;  %842 = vst [vmem:[#allocation3 + $0x28] sm:$0xfe] %v834_v30  ;;  %v835_v37 = vadd.f32 %v819_v31, %v803_v27  ;;  %v5418_v51 = vld [vmem:[%s7010_s1 + $0x810] ss:$8 sps:$4 sm:$0xff]  }
 0x11f   : > { %v1099_v28 = vld [vmem:[#allocation3 + $0x10] sm:$0xff]  ;;  %3075 = vmatprep.subr.bf16.mxu0 %v5417_v11  ;;  %2838 = vmatmul.mubr.bf16.gmra.mxu1 %v5957_v35  ;;  %v792_v39 = vpop.f32.mrf.mxu0  ;;  %v5427_v60 = vld [vmem:[%s7010_s1 + $0x8e0] ss:$8 sps:$4 sm:$0xff]  }
 0x120   : > { %1114 = vst [vmem:[#allocation3 + $0x18] sm:$0xff] %v1106_v24  ;;  %v1107_v34 = vadd.f32 %v1099_v28, %v1077_v3  ;;  %843 = vst [vmem:[#allocation3 + $0x38] sm:$0xfe] %v835_v37  ;;  %v1091_v41 = vpop.f32.mrf.mxu1  ;;  %v5441_v3 = vld [vmem:[%s7010_s1 + $0x8a4] ss:$8 sps:$4 sm:$0xff]  }
 0x121   : > { %v1100_v42 = vld [vmem:[#allocation3 + $0x8] sm:$0xff]  ;;  %v793_v43 = vpop.f32.mrf.mxu0  ;;  %v5444_v6 = vld [vmem:[%s7010_s1 + $0x894] ss:$8 sps:$4 sm:$0xff]   ;;  %v5442_v7 = vld [vmem:[%s7010_s1 + $0x890] ss:$8 sps:$4 sm:$0xff]  }
 0x122   : > { %1115 = vst [vmem:[#allocation3 + $0x10] sm:$0xff] %v1107_v34  ;;  %3076 = vmatpush1.bf16.msra.mxu0 %v5415_v25  ;;  %v1108_v44 = vadd.f32 %v1100_v42, %v1081_v14  ;;  %v1092_v45 = vpop.f32.mrf.mxu1 }
 0x123   : > { %3077 = vmatprep.subr.bf16.mxu0 %v5420_v29  ;;  %v1101_v47 = vld [vmem:[#allocation3 + $0x20] sm:$0xff]  ;;  %v794_v48 = vpop.f32.mrf.mxu0  ;;  %v1372_v12 = vld [vmem:[#allocation3 + $0x30] sm:$0x7f] }
 0x124   : > { %1116 = vst [vmem:[#allocation3 + $0x8] sm:$0xff] %v1108_v44  ;;  %v1109_v50 = vadd.f32 %v1101_v47, %v1083_v23  ;;  %v1093_v52 = vpop.f32.mrf.mxu1 }
 0x125   : > { %v1102_v53 = vld [vmem:[#allocation3 + $0x28] sm:$0xff]  ;;  %v1373_v17 = vld [vmem:[#allocation3] sm:$0x7f] }
 0x126   : > { %3078 = vmatpush1.bf16.msra.mxu0 %v5418_v51  ;;  %1117 = vst [vmem:[#allocation3 + $0x20] sm:$0xff] %v1109_v50  ;;  %v1110_v54 = vadd.f32 %v1102_v53, %v1085_v32  ;;  %v1094_v55 = vpop.f32.mrf.mxu1 }
 0x127   : > { %3079 = vmatprep.subr.bf16.mxu0 %v5423_v40  ;;  %v1103_v57 = vld [vmem:[#allocation3 + $0x38] sm:$0xff] }
 0x128   : > { %1118 = vst [vmem:[#allocation3 + $0x28] sm:$0xff] %v1110_v54  ;;  %v1111_v59 = vadd.f32 %v1103_v57, %v1087_v38  ;;  %v1374_v24 = vld [vmem:[#allocation3 + $0x18] sm:$0x7f] }
 0x129   : > { %v1375_v28 = vld [vmem:[#allocation3 + $0x10] sm:$0x7f] }
 0x12a   : > { %3080 = vmatpush1.bf16.msra.mxu0 %v5421_v46  ;;  %1119 = vst [vmem:[#allocation3 + $0x38] sm:$0xff] %v1111_v59 }
 0x12b   : > { %3081 = vmatprep.subr.bf16.mxu0 %v5426_v49  ;;  %v1376_v34 = vld [vmem:[#allocation3 + $0x8] sm:$0x7f] }
 0x12d   : > { %v1377_v40 = vld [vmem:[#allocation3 + $0x20] sm:$0x7f] }
 0x12e   : > { %3082 = vmatpush2.bf16.msra.mxu0 %v5424_v56 }
 0x12f   : > { %3083 = vmatprep.subr.bf16.mxu0 %v5429_v58  ;;  %v1378_v47 = vld [vmem:[#allocation3 + $0x28] sm:$0x7f] }
 0x131   : > { %v1379_v55 = vld [vmem:[#allocation3 + $0x38] sm:$0x7f] }
 0x132   : > { %3084 = vmatpush2.bf16.msra.mxu0 %v5427_v60 }
 0x133   : > { %3085 = vmatprep.subr.bf16.mxu0 %v5432_v61 }
 0x136   : > { %3086 = vmatpush2.bf16.msra.mxu0 %v5430_v62 }
 0x137   : > { %3087 = vmatprep.subr.bf16.mxu0 %v5435_v63 }
 0x13a   : > { %3088 = vmatpush2.bf16.msra.mxu0 %v5433_v0 }
 0x13b   : > { %3089 = vmatprep.subr.bf16.mxu0 %v5438_v1 }
 0x13e   : > { %3090 = vmatpush2.bf16.msra.mxu0 %v5436_v2 }
 0x13f   : > { %3091 = vmatprep.subr.bf16.mxu0 %v5441_v3 }
 0x142   : > { %3092 = vmatpush2.bf16.msra.mxu0 %v5439_v4 }
 0x143   : > { %3093 = vmatprep.subr.bf16.mxu0 %v5444_v6 }
 0x146   : > { %3094 = vmatpush2.bf16.msra.mxu0 %v5442_v7 }
 0x147   : > { %3095 = vmatprep.subr.bf16.mxu0 %v5447_v8 }
 0x14a   : > { %3096 = vmatpush2.bf16.msra.mxu0 %v5445_v9 }
 0x14d   : > { %v1347_v10 = vpop.f32.mrf.mxu0  ;;  %3098 = vmatmul.mubr.bf16.vlgmr.msra.gmra.mxu0 %v5882_v5 }
 0x14e   : > { %v1388_v11 = vrot.slane %v1347_v10, 1  ;;  %3103 = vmatprep.mubr.bf16.mxu0 %v5921_v21 }
 0x14f   : > { %v1349_v13 = vpop.f32.mrf.mxu0  ;;  %v1647_v16 = vpop.f32.mrf.mxu1 }
 0x150   : > { %v1404_v14 = vadd.f32 %v1388_v11, %v1372_v12  ;;  %v1389_v15 = vrot.slane %v1349_v13, 1 }
 0x151   : > { %v1351_v18 = vpop.f32.mrf.mxu0  ;;  %v1648_v23 = vpop.f32.mrf.mxu1 }
 0x152   : > { %1412 = vst [vmem:[#allocation3 + $0x30] sm:$0x7f] %v1404_v14  ;;  %v1405_v19 = vadd.f32 %v1389_v15, %v1373_v17  ;;  %v1390_v20 = vrot.slane %v1351_v18, 1  ;;  %v5450_v18 = vld [vmem:[%s7013_s4 + $0x74] ss:$8 sps:$4 sm:$0xff]  }
 0x153   : > { %v1353_v25 = vpop.f32.mrf.mxu0  ;;  %v1649_v5 = vpop.f32.mrf.mxu1  ;;  %3468 = vmatprep.subr.bf16.mxu1 %v5450_v18  ;;  %v5451_v23 = vld [vmem:[%s7013_s4 + $0x170] ss:$8 sps:$4 sm:$0xff]  }
 0x154   : > { %1413 = vst [vmem:[#allocation3] sm:$0x7f] %v1405_v19  ;;  %v1406_v26 = vadd.f32 %v1390_v20, %v1374_v24  ;;  %v1391_v27 = vrot.slane %v1353_v25, 1  ;;  %v1688_v31 = vrot.slane %v1649_v5, 7  ;;  %v5448_v19 = vld [vmem:[%s7013_s4 + $0x70] ss:$8 sps:$4 sm:$0xff]  }
 0x155   : > { %v1357_v29 = vpop.f32.mrf.mxu0  ;;  %3104 = vmatmul.mubr.bf16.gmra.mxu0 %v5923_v22  ;;  %v1651_v32 = vpop.f32.mrf.mxu1  ;;  %v5453_v20 = vld [vmem:[%s7013_s4 + $0x174] ss:$8 sps:$4 sm:$0xff]   ;;  %3469 = vmatpush1.bf16.msra.mxu1 %v5448_v19  ;;  %v5454_v24 = vld [vmem:[%s7013_s4 + $0x60] ss:$8 sps:$4 sm:$0xff]   ;;  %v5456_v25 = vld [vmem:[%s7013_s4 + $0x64] ss:$8 sps:$4 sm:$0xff]  }
 0x156   : > { %1414 = vst [vmem:[#allocation3 + $0x18] sm:$0x7f] %v1406_v26  ;;  %v1407_v21 = vadd.f32 %v1391_v27, %v1375_v28  ;;  %v1392_v30 = vrot.slane %v1357_v29, 1  ;;  %3113 = vmatprep.mubr.bf16.mxu0 %v5950_v33  ;;  %v1689_v51 = vrot.slane %v1651_v32, 7  ;;  %3762 = vmatprep.subr.bf16.mxu0 %v5453_v20  ;;  %v5457_v26 = vld [vmem:[%s7013_s4 + $0x160] ss:$8 sps:$4 sm:$0xff]  }
 0x157   : > { %v1359_v36 = vpop.f32.mrf.mxu0  ;;  %v1655_v39 = vpop.f32.mrf.mxu1  ;;  %3763 = vmatpush1.bf16.msra.mxu0 %v5451_v23  ;;  %v5459_v27 = vld [vmem:[%s7013_s4 + $0x164] ss:$8 sps:$4 sm:$0xff]   ;;  %v5462_v5 = vld [vmem:[%s7013_s4 + $0x54] ss:$8 sps:$4 sm:$0xff]   ;;  %3470 = vmatprep.subr.bf16.mxu1 %v5456_v25  ;;  %v5460_v29 = vld [vmem:[%s7013_s4 + $0x50] ss:$8 sps:$4 sm:$0xff]  }
 0x158   : > { %1415 = vst [vmem:[#allocation3 + $0x10] sm:$0x7f] %v1407_v21  ;;  %v1408_v37 = vadd.f32 %v1392_v30, %v1376_v34  ;;  %v1393_v38 = vrot.slane %v1359_v36, 1  ;;  %v1690_v45 = vrot.slane %v1655_v39, 7  ;;  %v5465_v28 = vld [vmem:[%s7013_s4 + $0x154] ss:$8 sps:$4 sm:$0xff]   ;;  %3764 = vmatprep.subr.bf16.mxu0 %v5459_v27 }
 0x159   : > { %v1672_v41 = vld [vmem:[#allocation3 + $0x30] sm:$0xfe]  ;;  %v1361_v42 = vpop.f32.mrf.mxu0  ;;  %v1657_v46 = vpop.f32.mrf.mxu1  ;;  %3471 = vmatpush1.bf16.msra.mxu1 %v5454_v24  ;;  %v5468_v30 = vld [vmem:[%s7013_s4 + $0x44] ss:$8 sps:$4 sm:$0xff]   ;;  %v5466_v32 = vld [vmem:[%s7013_s4 + $0x40] ss:$8 sps:$4 sm:$0xff]  }
 0x15a   : > { %1416 = vst [vmem:[#allocation3 + $0x8] sm:$0x7f] %v1408_v37  ;;  %v1409_v43 = vadd.f32 %v1393_v38, %v1377_v40  ;;  %v1704_v22 = vadd.f32 %v1688_v31, %v1672_v41  ;;  %v1394_v44 = vrot.slane %v1361_v42, 1  ;;  %v1691_v53 = vrot.slane %v1657_v46, 7  ;;  %3472 = vmatprep.subr.bf16.mxu1 %v5462_v5  ;;  %v5463_v21 = vld [vmem:[%s7013_s4 + $0x150] ss:$8 sps:$4 sm:$0xff]  }
 0x15b   : > { %v1673_v48 = vld [vmem:[#allocation3] sm:$0xfe]  ;;  %v1363_v49 = vpop.f32.mrf.mxu0  ;;  %v1659_v54 = vpop.f32.mrf.mxu1  ;;  %3765 = vmatpush1.bf16.msra.mxu0 %v5457_v26  ;;  %v5474_v36 = vld [vmem:[%s7013_s4 + $0x34] ss:$8 sps:$4 sm:$0xff]   ;;  %v5472_v38 = vld [vmem:[%s7013_s4 + $0x30] ss:$8 sps:$4 sm:$0xff]  }
 0x15c   : > { %1417 = vst [vmem:[#allocation3 + $0x20] sm:$0x7f] %v1409_v43  ;;  %1712 = vst [vmem:[#allocation3 + $0x30] sm:$0xfe] %v1704_v22  ;;  %v1410_v33 = vadd.f32 %v1394_v44, %v1378_v47  ;;  %v1705_v50 = vadd.f32 %v1689_v51, %v1673_v48  ;;  %v1395_v52 = vrot.slane %v1363_v49, 1  ;;  %v1692_v60 = vrot.slane %v1659_v54, 7  ;;  %3766 = vmatprep.subr.bf16.mxu0 %v5465_v28 }
 0x15d   : > { %v1674_v56 = vld [vmem:[#allocation3 + $0x18] sm:$0xfe]  ;;  %3114 = vmatmul.mubr.bf16.gmra.mxu0 %v5957_v35  ;;  %v1367_v57 = vpop.f32.mrf.mxu0  ;;  %v1661_v61 = vpop.f32.mrf.mxu1  ;;  %v5471_v31 = vld [vmem:[%s7013_s4 + $0x144] ss:$8 sps:$4 sm:$0xff]   ;;  %3473 = vmatpush1.bf16.msra.mxu1 %v5460_v29  ;;  %v5469_v34 = vld [vmem:[%s7013_s4 + $0x140] ss:$8 sps:$4 sm:$0xff]  }
 0x15e   : > { %1418 = vst [vmem:[#allocation3 + $0x28] sm:$0x7f] %v1410_v33  ;;  %1713 = vst [vmem:[#allocation3] sm:$0xfe] %v1705_v50  ;;  %v1411_v58 = vadd.f32 %v1395_v52, %v1379_v55  ;;  %v1706_v59 = vadd.f32 %v1690_v45, %v1674_v56  ;;  %v1693_v1 = vrot.slane %v1661_v61, 7  ;;  %3474 = vmatprep.subr.bf16.mxu1 %v5468_v30 }
 0x15f   : > { %v1675_v62 = vld [vmem:[#allocation3 + $0x10] sm:$0xfe]  ;;  %v1368_v63 = vpop.f32.mrf.mxu0  ;;  %v1665_v2 = vpop.f32.mrf.mxu1  ;;  %3767 = vmatpush1.bf16.msra.mxu0 %v5463_v21  ;;  %v5480_v39 = vld [vmem:[%s7013_s4 + $0x24] ss:$8 sps:$4 sm:$0xff]   ;;  %v5478_v41 = vld [vmem:[%s7013_s4 + $0x20] ss:$8 sps:$4 sm:$0xff]  }
 0x160   : > { %1419 = vst [vmem:[#allocation3 + $0x38] sm:$0x7f] %v1411_v58  ;;  %1714 = vst [vmem:[#allocation3 + $0x18] sm:$0xfe] %v1706_v59  ;;  %v1707_v0 = vadd.f32 %v1691_v53, %v1675_v62  ;;  %v1694_v7 = vrot.slane %v1665_v2, 7  ;;  %3768 = vmatprep.subr.bf16.mxu0 %v5471_v31 }
 0x161   : > { %v1676_v3 = vld [vmem:[#allocation3 + $0x8] sm:$0xfe]  ;;  %v1369_v4 = vpop.f32.mrf.mxu0  ;;  %v1667_v35 = vpop.f32.mrf.mxu1  ;;  %v5477_v37 = vld [vmem:[%s7013_s4 + $0x134] ss:$8 sps:$4 sm:$0xff]   ;;  %3475 = vmatpush1.bf16.msra.mxu1 %v5466_v32  ;;  %v5475_v51 = vld [vmem:[%s7013_s4 + $0x130] ss:$8 sps:$4 sm:$0xff]  }
 0x162   : > { %1715 = vst [vmem:[#allocation3 + $0x10] sm:$0xfe] %v1707_v0  ;;  %v1708_v6 = vadd.f32 %v1692_v60, %v1676_v3  ;;  %v1695_v11 = vrot.slane %v1667_v35, 7  ;;  %3476 = vmatprep.subr.bf16.mxu1 %v5474_v36  ;;  %v5483_v40 = vld [vmem:[%s7013_s4 + $0x124] ss:$8 sps:$4 sm:$0xff]  }
 0x163   : > { %v1677_v8 = vld [vmem:[#allocation3 + $0x20] sm:$0xfe]  ;;  %v1370_v9 = vpop.f32.mrf.mxu0  ;;  %v1669_v12 = vpop.f32.mrf.mxu1  ;;  %3769 = vmatpush1.bf16.msra.mxu0 %v5469_v34  ;;  %v5486_v43 = vld [vmem:[%s7013_s4 + $0x14] ss:$8 sps:$4 sm:$0xff]   ;;  %v5484_v44 = vld [vmem:[%s7013_s4 + $0x10] ss:$8 sps:$4 sm:$0xff]  }
 0x164   : > { %1716 = vst [vmem:[#allocation3 + $0x8] sm:$0xfe] %v1708_v6  ;;  %v1709_v10 = vadd.f32 %v1693_v1, %v1677_v8  ;;  %3770 = vmatprep.subr.bf16.mxu0 %v5477_v37  ;;  %v5481_v42 = vld [vmem:[%s7013_s4 + $0x120] ss:$8 sps:$4 sm:$0xff]   ;;  %v5489_v22 = vld [vmem:[%s7013_s4 + $0x114] ss:$8 sps:$4 sm:$0xff]  }
 0x165   : > { %v1678_v13 = vld [vmem:[#allocation3 + $0x28] sm:$0xfe]  ;;  %v1670_v15 = vpop.f32.mrf.mxu1  ;;  %3477 = vmatpush1.bf16.msra.mxu1 %v5472_v38  ;;  %v5487_v45 = vld [vmem:[%s7013_s4 + $0x110] ss:$8 sps:$4 sm:$0xff]   ;;  %v5498_v50 = vld [vmem:[%s7013_s4 + $0xf4] ss:$8 sps:$4 sm:$0xff]  }
 0x166   : > { %1717 = vst [vmem:[#allocation3 + $0x20] sm:$0xfe] %v1709_v10  ;;  %v1710_v14 = vadd.f32 %v1694_v7, %v1678_v13  ;;  %3478 = vmatprep.subr.bf16.mxu1 %v5480_v39  ;;  %v5492_v46 = vld [vmem:[%s7013_s4 + $0x4] ss:$8 sps:$4 sm:$0xff]   ;;  %v5490_v47 = vld [vmem:[%s7013_s4] ss:$8 sps:$4 sm:$0xff]  }
 0x167   : > { %v1679_v16 = vld [vmem:[#allocation3 + $0x38] sm:$0xfe]  ;;  %3771 = vmatpush1.bf16.msra.mxu0 %v5475_v51  ;;  %v5495_v48 = vld [vmem:[%s7013_s4 + $0x104] ss:$8 sps:$4 sm:$0xff]   ;;  %v5493_v49 = vld [vmem:[%s7013_s4 + $0x100] ss:$8 sps:$4 sm:$0xff]  }
 0x168   : > { %1718 = vst [vmem:[#allocation3 + $0x28] sm:$0xfe] %v1710_v14  ;;  %v1711_v17 = vadd.f32 %v1695_v11, %v1679_v16  ;;  %3772 = vmatprep.subr.bf16.mxu0 %v5483_v40  ;;  %v5496_v53 = vld [vmem:[%s7013_s4 + $0xf0] ss:$8 sps:$4 sm:$0xff]   ;;  %v5501_v54 = vld [vmem:[%s7013_s4 + $0x1f4] ss:$8 sps:$4 sm:$0xff]  }
 0x169   : > { %3479 = vmatpush1.bf16.msra.mxu1 %v5478_v41  ;;  %v5499_v56 = vld [vmem:[%s7013_s4 + $0x1f0] ss:$8 sps:$4 sm:$0xff]   ;;  %v5504_v61 = vld [vmem:[%s7013_s4 + $0xe4] ss:$8 sps:$4 sm:$0xff]   ;;  %v5502_v0 = vld [vmem:[%s7013_s4 + $0xe0] ss:$8 sps:$4 sm:$0xff]  }
 0x16a   : > { %1719 = vst [vmem:[#allocation3 + $0x38] sm:$0xfe] %v1711_v17  ;;  %3480 = vmatprep.subr.bf16.mxu1 %v5486_v43  ;;  %v1972_v58 = vld [vmem:[#allocation3 + $0x30] sm:$0xff]  ;;  %v1973_v63 = vld [vmem:[#allocation3] sm:$0xff]  ;;  %v1974_v7 = vld [vmem:[#allocation3 + $0x18] sm:$0xff] }
 0x16b   : > { %3773 = vmatpush1.bf16.msra.mxu0 %v5481_v42  ;;  %v5507_v1 = vld [vmem:[%s7013_s4 + $0x1e4] ss:$8 sps:$4 sm:$0xff]   ;;  %v5505_v4 = vld [vmem:[%s7013_s4 + $0x1e0] ss:$8 sps:$4 sm:$0xff]   ;;  %v5510_v9 = vld [vmem:[%s7013_s4 + $0xd4] ss:$8 sps:$4 sm:$0xff]  }
 0x16c   : > { %3774 = vmatprep.subr.bf16.mxu0 %v5489_v22  ;;  %v1975_v11 = vld [vmem:[#allocation3 + $0x10] sm:$0xff]  ;;  %v1976_v19 = vld [vmem:[#allocation3 + $0x8] sm:$0xff] }
 0x16d   : > { %3481 = vmatpush1.bf16.msra.mxu1 %v5484_v44  ;;  %v5508_v12 = vld [vmem:[%s7013_s4 + $0xd0] ss:$8 sps:$4 sm:$0xff]   ;;  %v5513_v13 = vld [vmem:[%s7013_s4 + $0x1d4] ss:$8 sps:$4 sm:$0xff]   ;;  %v5516_v25 = vld [vmem:[%s7013_s4 + $0xc4] ss:$8 sps:$4 sm:$0xff]  }
 0x16e   : > { %3482 = vmatprep.subr.bf16.mxu1 %v5492_v46  ;;  %v5511_v17 = vld [vmem:[%s7013_s4 + $0x1d0] ss:$8 sps:$4 sm:$0xff]   ;;  %v1977_v5 = vld [vmem:[#allocation3 + $0x20] sm:$0xff]  ;;  %v5522_v42 = vld [vmem:[%s7013_s4 + $0xb4] ss:$8 sps:$4 sm:$0xff]  }
 0x16f   : > { %3775 = vmatpush1.bf16.msra.mxu0 %v5487_v45  ;;  %v5514_v28 = vld [vmem:[%s7013_s4 + $0xc0] ss:$8 sps:$4 sm:$0xff]   ;;  %v5519_v34 = vld [vmem:[%s7013_s4 + $0x1c4] ss:$8 sps:$4 sm:$0xff]   ;;  %v5520_v45 = vld [vmem:[%s7013_s4 + $0xb0] ss:$8 sps:$4 sm:$0xff]  }
 0x170   : > { %3776 = vmatprep.subr.bf16.mxu0 %v5495_v48  ;;  %v5517_v32 = vld [vmem:[%s7013_s4 + $0x1c0] ss:$8 sps:$4 sm:$0xff]  }
 0x171   : > { %3483 = vmatpush1.bf16.msra.mxu1 %v5490_v47  ;;  %v1978_v38 = vld [vmem:[#allocation3 + $0x28] sm:$0xff]  ;;  %v1979_v44 = vld [vmem:[#allocation3 + $0x38] sm:$0xff] }
 0x172   : > { %3484 = vmatprep.subr.bf16.mxu1 %v5498_v50  ;;  %v5525_v50 = vld [vmem:[%s7013_s4 + $0x1b4] ss:$8 sps:$4 sm:$0xff]  }
 0x173   : > { %3777 = vmatpush1.bf16.msra.mxu0 %v5493_v49 }
 0x174   : > { %3778 = vmatprep.subr.bf16.mxu0 %v5501_v54 }
 0x175   : > { %3485 = vmatpush2.bf16.msra.mxu1 %v5496_v53 }
 0x176   : > { %3486 = vmatprep.subr.bf16.mxu1 %v5504_v61 }
 0x177   : > { %3779 = vmatpush2.bf16.msra.mxu0 %v5499_v56 }
 0x178   : > { %3780 = vmatprep.subr.bf16.mxu0 %v5507_v1  ;;  %v5531_v1 = vld [vmem:[%s7013_s4 + $0x1a4] ss:$8 sps:$4 sm:$0xff]  }
 0x179   : > { %3487 = vmatpush2.bf16.msra.mxu1 %v5502_v0  ;;  %v5529_v0 = vld [vmem:[%s7013_s4 + $0x1a0] ss:$8 sps:$4 sm:$0xff]  }
 0x17a   : > { %3488 = vmatprep.subr.bf16.mxu1 %v5510_v9 }
 0x17b   : > { %3781 = vmatpush2.bf16.msra.mxu0 %v5505_v4 }
 0x17c   : > { %3782 = vmatprep.subr.bf16.mxu0 %v5513_v13  ;;  %v5538_v13 = vld [vmem:[%s7013_s4 + $0x80] ss:$8 sps:$4 sm:$0xff]  }
 0x17d   : > { %3489 = vmatpush2.bf16.msra.mxu1 %v5508_v12 }
 0x17e   : > { %3490 = vmatprep.subr.bf16.mxu1 %v5516_v25 }
 0x17f   : > { %3783 = vmatpush2.bf16.msra.mxu0 %v5511_v17  ;;  %v5541_v17 = vld [vmem:[%s7013_s4 + $0x180] ss:$8 sps:$4 sm:$0xff]  }
 0x180   : > { %3784 = vmatprep.subr.bf16.mxu0 %v5519_v34 }
 0x181   : > { %3491 = vmatpush2.bf16.msra.mxu1 %v5514_v28 }
 0x182   : > { %3492 = vmatprep.subr.bf16.mxu1 %v5522_v42 }
 0x183   : > { %3785 = vmatpush2.bf16.msra.mxu0 %v5517_v32 }
 0x184   : > { %3786 = vmatprep.subr.bf16.mxu0 %v5525_v50 }
 0x185   : > { %3493 = vmatpush2.bf16.msra.mxu1 %v5520_v45 }
 0x18d   : > { %v1947_v33 = vpop.f32.mrf.mxu0 }
 0x18e   : > { %v5523_v33 = vld [vmem:[%s7013_s4 + $0x1b0] ss:$8 sps:$4 sm:$0xff]  }
 0x18f   : > { %v1948_v52 = vpop.f32.mrf.mxu0  ;;  %v2223_v55 = vpop.f32.mrf.mxu1  ;;  %3787 = vmatpush2.bf16.msra.mxu0 %v5523_v33 }
 0x190   : > { %3788 = vmatprep.subr.bf16.mxu0 %v5531_v1 }
 0x191   : > { %v1949_v57 = vpop.f32.mrf.mxu0  ;;  %v2224_v60 = vpop.f32.mrf.mxu1 }
 0x192   : > { %v1980_v59 = vadd.f32 %v1972_v58, %v1949_v57  ;;  %v5528_v57 = vld [vmem:[%s7013_s4 + $0xa4] ss:$8 sps:$4 sm:$0xff]   ;;  %v5526_v60 = vld [vmem:[%s7013_s4 + $0xa0] ss:$8 sps:$4 sm:$0xff]  }
 0x193   : > { %v1951_v62 = vpop.f32.mrf.mxu0  ;;  %v2225_v3 = vpop.f32.mrf.mxu1  ;;  %3494 = vmatprep.subr.bf16.mxu1 %v5528_v57  ;;  %3789 = vmatpush2.bf16.msra.mxu0 %v5529_v0 }
 0x194   : > { %1988 = vst [vmem:[#allocation3 + $0x30] sm:$0xff] %v1980_v59  ;;  %v1981_v2 = vadd.f32 %v1973_v63, %v1951_v62  ;;  %v2264_v15 = vrot.slane %v2225_v3, 1  ;;  %3495 = vmatpush2.bf16.msra.mxu1 %v5526_v60 }
 0x195   : > { %v1955_v6 = vpop.f32.mrf.mxu0  ;;  %v2227_v8 = vpop.f32.mrf.mxu1 }
 0x196   : > { %1989 = vst [vmem:[#allocation3] sm:$0xff] %v1981_v2  ;;  %v1982_v35 = vadd.f32 %v1974_v7, %v1955_v6  ;;  %v2265_v23 = vrot.slane %v2227_v8, 1  ;;  %v5534_v7 = vld [vmem:[%s7013_s4 + $0x94] ss:$8 sps:$4 sm:$0xff]   ;;  %v5532_v8 = vld [vmem:[%s7013_s4 + $0x90] ss:$8 sps:$4 sm:$0xff]  }
 0x197   : > { %v1957_v10 = vpop.f32.mrf.mxu0  ;;  %v2231_v16 = vpop.f32.mrf.mxu1  ;;  %3496 = vmatprep.subr.bf16.mxu1 %v5534_v7 }
 0x198   : > { %1990 = vst [vmem:[#allocation3 + $0x18] sm:$0xff] %v1982_v35  ;;  %v1983_v14 = vadd.f32 %v1975_v11, %v1957_v10  ;;  %v2266_v30 = vrot.slane %v2231_v16, 1  ;;  %v5535_v10 = vld [vmem:[%s7013_s4 + $0x190] ss:$8 sps:$4 sm:$0xff]   ;;  %v5537_v11 = vld [vmem:[%s7013_s4 + $0x194] ss:$8 sps:$4 sm:$0xff]   ;;  %3497 = vmatpush2.bf16.msra.mxu1 %v5532_v8 }
 0x199   : > { %v1959_v18 = vpop.f32.mrf.mxu0  ;;  %v2233_v24 = vpop.f32.mrf.mxu1  ;;  %3790 = vmatprep.subr.bf16.mxu0 %v5537_v11  ;;  %v5543_v16 = vld [vmem:[%s7013_s4 + $0x184] ss:$8 sps:$4 sm:$0xff]  }
 0x19a   : > { %1991 = vst [vmem:[#allocation3 + $0x10] sm:$0xff] %v1983_v14  ;;  %v1984_v20 = vadd.f32 %v1976_v19, %v1959_v18  ;;  %v2267_v40 = vrot.slane %v2233_v24, 1  ;;  %v5540_v14 = vld [vmem:[%s7013_s4 + $0x84] ss:$8 sps:$4 sm:$0xff]   ;;  %3791 = vmatpush2.bf16.msra.mxu0 %v5535_v10  ;;  %v5546_v18 = vld [vmem:[%s7013_s4 + $0x274] ss:$8 sps:$4 sm:$0xff]  }
 0x19b   : > { %v2248_v26 = vld [vmem:[#allocation3 + $0x30] sm:$0x7f]  ;;  %v1961_v27 = vpop.f32.mrf.mxu0  ;;  %v2235_v31 = vpop.f32.mrf.mxu1  ;;  %3498 = vmatprep.subr.bf16.mxu1 %v5540_v14  ;;  %3792 = vmatprep.subr.bf16.mxu0 %v5543_v16 }
 0x19c   : > { %1992 = vst [vmem:[#allocation3 + $0x8] sm:$0xff] %v1984_v20  ;;  %v2280_v29 = vadd.f32 %v2264_v15, %v2248_v26  ;;  %v1985_v21 = vadd.f32 %v1977_v5, %v1961_v27  ;;  %v2268_v48 = vrot.slane %v2235_v31, 1  ;;  %3499 = vmatpush2.bf16.msra.mxu1 %v5538_v13 }
 0x19d   : > { %v2249_v36 = vld [vmem:[#allocation3] sm:$0x7f]  ;;  %v1965_v37 = vpop.f32.mrf.mxu0  ;;  %v2237_v41 = vpop.f32.mrf.mxu1  ;;  %4032 = vmatprep.subr.bf16.mxu1 %v5546_v18 }
 0x19e   : > { %2288 = vst [vmem:[#allocation3 + $0x30] sm:$0x7f] %v2280_v29  ;;  %1993 = vst [vmem:[#allocation3 + $0x20] sm:$0xff] %v1985_v21  ;;  %v2281_v51 = vadd.f32 %v2265_v23, %v2249_v36  ;;  %v1986_v39 = vadd.f32 %v1978_v38, %v1965_v37  ;;  %v2269_v55 = vrot.slane %v2237_v41, 1  ;;  %3793 = vmatpush2.bf16.msra.mxu0 %v5541_v17 }
 0x19f   : > { %v2250_v43 = vld [vmem:[#allocation3 + $0x18] sm:$0x7f]  ;;  %v1967_v22 = vpop.f32.mrf.mxu0  ;;  %v2241_v49 = vpop.f32.mrf.mxu1 }
 0x1a0   : > { %2289 = vst [vmem:[#allocation3] sm:$0x7f] %v2281_v51  ;;  %1994 = vst [vmem:[#allocation3 + $0x28] sm:$0xff] %v1986_v39  ;;  %v2282_v46 = vadd.f32 %v2266_v30, %v2250_v43  ;;  %v1987_v47 = vadd.f32 %v1979_v44, %v1967_v22  ;;  %v2270_v62 = vrot.slane %v2241_v49, 1 }
 0x1a1   : > { %v2251_v52 = vld [vmem:[#allocation3 + $0x10] sm:$0x7f]  ;;  %v1969_v53 = vpop.f32.mrf.mxu0  ;;  %v2243_v56 = vpop.f32.mrf.mxu1 }
 0x1a2   : > { %2290 = vst [vmem:[#allocation3 + $0x18] sm:$0x7f] %v2282_v46  ;;  %1995 = vst [vmem:[#allocation3 + $0x38] sm:$0xff] %v1987_v47  ;;  %v2283_v54 = vadd.f32 %v2267_v40, %v2251_v52  ;;  %v2271_v4 = vrot.slane %v2243_v56, 1 }
 0x1a3   : > { %v2252_v58 = vld [vmem:[#allocation3 + $0x8] sm:$0x7f]  ;;  %v1970_v59 = vpop.f32.mrf.mxu0  ;;  %v2245_v63 = vpop.f32.mrf.mxu1 }
 0x1a4   : > { %2291 = vst [vmem:[#allocation3 + $0x10] sm:$0x7f] %v2283_v54  ;;  %v2284_v61 = vadd.f32 %v2268_v48, %v2252_v58 }
 0x1a5   : > { %v2253_v2 = vld [vmem:[#allocation3 + $0x20] sm:$0x7f]  ;;  %v2246_v6 = vpop.f32.mrf.mxu1  ;;  %v2548_v21 = vld [vmem:[#allocation3 + $0x30] sm:$0xfe] }
 0x1a6   : > { %2292 = vst [vmem:[#allocation3 + $0x8] sm:$0x7f] %v2284_v61  ;;  %v2285_v3 = vadd.f32 %v2269_v55, %v2253_v2 }
 0x1a7   : > { %v2254_v35 = vld [vmem:[#allocation3 + $0x28] sm:$0x7f]  ;;  %v2549_v36 = vld [vmem:[#allocation3] sm:$0xfe] }
 0x1a8   : > { %2293 = vst [vmem:[#allocation3 + $0x20] sm:$0x7f] %v2285_v3  ;;  %v2286_v9 = vadd.f32 %v2270_v62, %v2254_v35 }
 0x1a9   : > { %v2255_v12 = vld [vmem:[#allocation3 + $0x38] sm:$0x7f] }
 0x1aa   : > { %2294 = vst [vmem:[#allocation3 + $0x28] sm:$0x7f] %v2286_v9  ;;  %v2287_v15 = vadd.f32 %v2271_v4, %v2255_v12  ;;  %v2550_v40 = vld [vmem:[#allocation3 + $0x18] sm:$0xfe] }
 0x1ab   : > { %v2551_v44 = vld [vmem:[#allocation3 + $0x10] sm:$0xfe] }
 0x1ac   : > { %2295 = vst [vmem:[#allocation3 + $0x38] sm:$0x7f] %v2287_v15 }
 0x1ad   : > { %v2552_v49 = vld [vmem:[#allocation3 + $0x8] sm:$0xfe] }
 0x1af   : > { %v2553_v53 = vld [vmem:[#allocation3 + $0x20] sm:$0xfe] }
 0x1b1   : > { %v2554_v60 = vld [vmem:[#allocation3 + $0x28] sm:$0xfe] }
 0x1b3   : > { %v2555_v2 = vld [vmem:[#allocation3 + $0x38] sm:$0xfe] }
 0x1cd   : > { %v2523_v19 = vpop.f32.mrf.mxu0 }
 0x1ce   : > { %v3252_v19 = vld [vmem:[%s6815_s17] sm:$0xff] }
 0x1cf   : > { %v2524_v20 = vpop.f32.mrf.mxu0  ;;  %v2823_v23 = vpop.f32.mrf.mxu1  ;;  %3260 = vst [vmem:[%s6820_s20] sm:$0xff] %v3252_v19 }
 0x1d1   : > { %v2525_v24 = vpop.f32.mrf.mxu0  ;;  %v2824_v25 = vpop.f32.mrf.mxu1 }
 0x1d3   : > { %v2526_v26 = vpop.f32.mrf.mxu0  ;;  %v2825_v27 = vpop.f32.mrf.mxu1 }
 0x1d4   : > { %v3182_v27 = vlaneseq }
 0x1d5   : > { %v2529_v5 = vpop.f32.mrf.mxu0  ;;  %v2826_v29 = vpop.f32.mrf.mxu1 }
 0x1d6   : > { %v2564_v28 = vrot.slane %v2529_v5, 7 }
 0x1d7   : > { %v2531_v30 = vpop.f32.mrf.mxu0  ;;  %v2829_v34 = vpop.f32.mrf.mxu1 }
 0x1d8   : > { %v2580_v31 = vadd.f32 %v2564_v28, %v2548_v21  ;;  %v2565_v32 = vrot.slane %v2531_v30, 7 }
 0x1d9   : > { %v2533_v37 = vpop.f32.mrf.mxu0  ;;  %v2831_v39 = vpop.f32.mrf.mxu1 }
 0x1da   : > { %2588 = vst [vmem:[#allocation3 + $0x30] sm:$0xfe] %v2580_v31  ;;  %v2581_v38 = vadd.f32 %v2565_v32, %v2549_v36  ;;  %v2566_v51 = vrot.slane %v2533_v37, 7 }
 0x1db   : > { %v2535_v41 = vpop.f32.mrf.mxu0  ;;  %v2833_v22 = vpop.f32.mrf.mxu1 }
 0x1dc   : > { %2589 = vst [vmem:[#allocation3] sm:$0xfe] %v2581_v38  ;;  %v2582_v42 = vadd.f32 %v2566_v51, %v2550_v40  ;;  %v2567_v43 = vrot.slane %v2535_v41, 7 }
 0x1dd   : > { %v2539_v45 = vpop.f32.mrf.mxu0  ;;  %v2835_v48 = vpop.f32.mrf.mxu1 }
 0x1de   : > { %2590 = vst [vmem:[#allocation3 + $0x18] sm:$0xfe] %v2582_v42  ;;  %v2583_v46 = vadd.f32 %v2567_v43, %v2551_v44  ;;  %v2568_v47 = vrot.slane %v2539_v45, 7 }
 0x1df   : > { %v2541_v33 = vpop.f32.mrf.mxu0  ;;  %v2839_v56 = vpop.f32.mrf.mxu1 }
 0x1e0   : > { %2591 = vst [vmem:[#allocation3 + $0x10] sm:$0xfe] %v2583_v46  ;;  %v2584_v50 = vadd.f32 %v2568_v47, %v2552_v49  ;;  %v2569_v52 = vrot.slane %v2541_v33, 7  ;;  %v3180_v46 = vld [vmem:[%s7011_s2] sm:$0x3] }
 0x1e1   : > { %v2543_v54 = vpop.f32.mrf.mxu0  ;;  %v2848_v55 = vld [vmem:[#allocation3 + $0x30] sm:$0xff]  ;;  %v2841_v4 = vpop.f32.mrf.mxu1 }
 0x1e2   : > { %2592 = vst [vmem:[#allocation3 + $0x8] sm:$0xfe] %v2584_v50  ;;  %v2585_v57 = vadd.f32 %v2569_v52, %v2553_v53  ;;  %v2570_v58 = vrot.slane %v2543_v54, 7  ;;  %v2856_v59 = vadd.f32 %v2848_v55, %v2829_v34  ;;  %v3183_v34 = vshrl.u32 %v3182_v27, 7 }
 0x1e3   : > { %v2545_v61 = vpop.f32.mrf.mxu0  ;;  %v2849_v62 = vld [vmem:[#allocation3] sm:$0xff]  ;;  %v2843_v10 = vpop.f32.mrf.mxu1 }
 0x1e4   : > { %2593 = vst [vmem:[#allocation3 + $0x20] sm:$0xfe] %v2585_v57  ;;  %v2586_v63 = vadd.f32 %v2570_v58, %v2554_v60  ;;  %2864 = vst [vmem:[#allocation3 + $0x30] sm:$0xff] %v2856_v59  ;;  %v2571_v0 = vrot.slane %v2545_v61, 7  ;;  %v2857_v1 = vadd.f32 %v2849_v62, %v2831_v39  ;;  %v3188_v41 = vsub.s32 1, %v3183_v34 }
 0x1e5   : > { %v2850_v3 = vld [vmem:[#allocation3 + $0x18] sm:$0xff]  ;;  %v2845_v15 = vpop.f32.mrf.mxu1  ;;  %v3200_v57 = vld [vmem:[%s7012_s3] sm:$0x3] }
 0x1e6   : > { %2594 = vst [vmem:[#allocation3 + $0x28] sm:$0xfe] %v2586_v63  ;;  %v2587_v6 = vadd.f32 %v2571_v0, %v2555_v2  ;;  %2865 = vst [vmem:[#allocation3] sm:$0xff] %v2857_v1  ;;  %v2858_v7 = vadd.f32 %v2850_v3, %v2833_v22  ;;  %v3184_v22 = vsub.s32 0, %v3183_v34  ;;  %v3189_v50 = vrot.slane %v3180_v46, %v3188_v41  ;;  %v5547_v34 = vld [vmem:[%s7013_s4 + $0x260] ss:$8 sps:$4 sm:$0xff]  }
 0x1e7   : > { %v2851_v35 = vld [vmem:[#allocation3 + $0x10] sm:$0xff]  ;;  %v3209_v1 = vrot.slane %v3200_v57, %v3188_v41 }
 0x1e8   : > { %2595 = vst [vmem:[#allocation3 + $0x38] sm:$0xfe] %v2587_v6  ;;  %2866 = vst [vmem:[#allocation3 + $0x18] sm:$0xff] %v2858_v7  ;;  %v2859_v8 = vadd.f32 %v2851_v35, %v2835_v48  ;;  %v3185_v54 = vrot.slane %v3180_v46, %v3184_v22  ;;  %v3205_v3 = vrot.slane %v3200_v57, %v3184_v22  ;;  %v5555_v22 = vld [vmem:[%s7013_s4 + $0x244] ss:$8 sps:$4 sm:$0xff]  }
 0x1e9   : > { %v2852_v9 = vld [vmem:[#allocation3 + $0x8] sm:$0xff]  ;;  %v5556_v46 = vld [vmem:[%s7013_s4 + $0x230] ss:$8 sps:$4 sm:$0xff]   ;;  %v5576_v57 = vld [vmem:[%s7013_s4 + $0x2d4] ss:$8 sps:$4 sm:$0xff]  }
 0x1ea   : > { %2867 = vst [vmem:[#allocation3 + $0x10] sm:$0xff] %v2859_v8  ;;  %v2860_v11 = vadd.f32 %v2852_v9, %v2839_v56 }
 0x1eb   : > { %v2853_v12 = vld [vmem:[#allocation3 + $0x20] sm:$0xff]  ;;  %v3124_v28 = vld [vmem:[#allocation3 + $0x30] sm:$0x7f] }
 0x1ec   : > { %2868 = vst [vmem:[#allocation3 + $0x8] sm:$0xff] %v2860_v11  ;;  %v2861_v13 = vadd.f32 %v2853_v12, %v2841_v4 }
 0x1ed   : > { %v2854_v14 = vld [vmem:[#allocation3 + $0x28] sm:$0xff]  ;;  %v3125_v31 = vld [vmem:[#allocation3] sm:$0x7f] }
 0x1ee   : > { %2869 = vst [vmem:[#allocation3 + $0x20] sm:$0xff] %v2861_v13  ;;  %v2862_v16 = vadd.f32 %v2854_v14, %v2843_v10 }
 0x1ef   : > { %v2855_v17 = vld [vmem:[#allocation3 + $0x38] sm:$0xff] }
 0x1f0   : > { %2870 = vst [vmem:[#allocation3 + $0x28] sm:$0xff] %v2862_v16  ;;  %v2863_v18 = vadd.f32 %v2855_v17, %v2845_v15  ;;  %v3126_v38 = vld [vmem:[#allocation3 + $0x18] sm:$0x7f] }
 0x1f1   : > { %v3127_v42 = vld [vmem:[#allocation3 + $0x10] sm:$0x7f] }
 0x1f2   : > { %2871 = vst [vmem:[#allocation3 + $0x38] sm:$0xff] %v2863_v18 }
 0x1f3   : > { %v3128_v47 = vld [vmem:[#allocation3 + $0x8] sm:$0x7f] }
 0x1f5   : > { %v3129_v52 = vld [vmem:[#allocation3 + $0x20] sm:$0x7f] }
 0x1f7   : > { %v3130_v59 = vld [vmem:[#allocation3 + $0x28] sm:$0x7f] }
 0x1f9   : > { %v3131_v2 = vld [vmem:[#allocation3 + $0x38] sm:$0x7f] }
 0x20d   : > { %v3099_v20 = vpop.f32.mrf.mxu0 }
 0x20f   : > { %v3100_v23 = vpop.f32.mrf.mxu0 }
 0x211   : > { %v3101_v24 = vpop.f32.mrf.mxu0 }
 0x213   : > { %v3102_v25 = vpop.f32.mrf.mxu0 }
 0x215   : > { %v3105_v26 = vpop.f32.mrf.mxu0 }
 0x216   : > { %v3140_v5 = vrot.slane %v3105_v26, 1  ;;  %v5544_v26 = vld [vmem:[%s7013_s4 + $0x270] ss:$8 sps:$4 sm:$0xff]  }
 0x217   : > { %v3107_v29 = vpop.f32.mrf.mxu0 }
 0x218   : > { %v3156_v21 = vadd.f32 %v3140_v5, %v3124_v28  ;;  %v3141_v30 = vrot.slane %v3107_v29, 1  ;;  %v5549_v28 = vld [vmem:[%s7013_s4 + $0x264] ss:$8 sps:$4 sm:$0xff]  }
 0x219   : > { %v3109_v32 = vpop.f32.mrf.mxu0 }
 0x21a   : > { %3164 = vst [vmem:[#allocation3 + $0x30] sm:$0x7f] %v3156_v21  ;;  %v3157_v36 = vadd.f32 %v3141_v30, %v3125_v31  ;;  %v3142_v37 = vrot.slane %v3109_v32, 1 }
 0x21b   : > { %v3111_v51 = vpop.f32.mrf.mxu0 }
 0x21c   : > { %3165 = vst [vmem:[#allocation3] sm:$0x7f] %v3157_v36  ;;  %v3158_v39 = vadd.f32 %v3142_v37, %v3126_v38  ;;  %v3143_v40 = vrot.slane %v3111_v51, 1  ;;  %v5552_v37 = vld [vmem:[%s7013_s4 + $0x254] ss:$8 sps:$4 sm:$0xff]  }
 0x21d   : > { %v3115_v43 = vpop.f32.mrf.mxu0 }
 0x21e   : > { %3166 = vst [vmem:[#allocation3 + $0x18] sm:$0x7f] %v3158_v39  ;;  %v3159_v44 = vadd.f32 %v3143_v40, %v3127_v42  ;;  %v3144_v45 = vrot.slane %v3115_v43, 1  ;;  %v5550_v42 = vld [vmem:[%s7013_s4 + $0x250] ss:$8 sps:$4 sm:$0xff]  }
 0x21f   : > { %v3117_v48 = vpop.f32.mrf.mxu0 }
 0x220   : > { %3167 = vst [vmem:[#allocation3 + $0x10] sm:$0x7f] %v3159_v44  ;;  %v3160_v49 = vadd.f32 %v3144_v45, %v3128_v47  ;;  %v3145_v33 = vrot.slane %v3117_v48, 1  ;;  %v5553_v44 = vld [vmem:[%s7013_s4 + $0x240] ss:$8 sps:$4 sm:$0xff]  }
 0x221   : > { %v3119_v53 = vpop.f32.mrf.mxu0  ;;  %v3172_v58 = vld [vmem:[#allocation3 + $0x30] sm:$0xff]  ;;  %v5561_v47 = vld [vmem:[%s7013_s4 + $0x224] ss:$8 sps:$4 sm:$0xff]   ;;  %v5559_v48 = vld [vmem:[%s7013_s4 + $0x220] ss:$8 sps:$4 sm:$0xff]  }
 0x222   : > { %3168 = vst [vmem:[#allocation3 + $0x8] sm:$0x7f] %v3160_v49  ;;  %v3161_v55 = vadd.f32 %v3145_v33, %v3129_v52  ;;  %v3146_v56 = vrot.slane %v3119_v53, 1  ;;  %v3192_v6 = vmul.f32 %v3185_v54, %v3172_v58  ;;  %v5558_v45 = vld [vmem:[%s7013_s4 + $0x234] ss:$8 sps:$4 sm:$0xff]  }
 0x223   : > { %v3121_v60 = vpop.f32.mrf.mxu0  ;;  %v3173_v61 = vld [vmem:[#allocation3] sm:$0xff]  ;;  %v5564_v49 = vld [vmem:[%s7013_s4 + $0x214] ss:$8 sps:$4 sm:$0xff]   ;;  %v5562_v33 = vld [vmem:[%s7013_s4 + $0x210] ss:$8 sps:$4 sm:$0xff]  }
 0x224   : > { %3169 = vst [vmem:[#allocation3 + $0x20] sm:$0x7f] %v3161_v55  ;;  %v3162_v62 = vadd.f32 %v3146_v56, %v3130_v59  ;;  %v3147_v63 = vrot.slane %v3121_v60, 1  ;;  %v3193_v0 = vmul.f32 %v3189_v50, %v3173_v61  ;;  %v3212_v12 = vadd.f32 %v3205_v3, %v3192_v6  ;;  %v5565_v52 = vld [vmem:[%s7013_s4 + $0x200] ss:$8 sps:$4 sm:$0xff]  }
 0x225   : > { %v3174_v4 = vld [vmem:[#allocation3 + $0x18] sm:$0xff]  ;;  %v5573_v55 = vld [vmem:[%s7013_s4 + $0x2e4] ss:$8 sps:$4 sm:$0xff]   ;;  %v5571_v56 = vld [vmem:[%s7013_s4 + $0x2e0] ss:$8 sps:$4 sm:$0xff]  }
 0x226   : > { %3170 = vst [vmem:[#allocation3 + $0x28] sm:$0x7f] %v3162_v62  ;;  %v3163_v7 = vadd.f32 %v3147_v63, %v3131_v2  ;;  %v3194_v35 = vmul.f32 %v3185_v54, %v3174_v4  ;;  %v3213_v10 = vadd.f32 %v3209_v1, %v3193_v0  ;;  %v3220_v20 = vmax.f32 %v3212_v12, 0.0  ;;  %v5570_v53 = vld [vmem:[%s7013_s4 + $0x2f4] ss:$8 sps:$4 sm:$0xff]   ;;  %v3253_v6 = vld [vmem:[%s6815_s17 + $0x8] sm:$0xff] }
 0x227   : > { %v3175_v8 = vld [vmem:[#allocation3 + $0x10] sm:$0xff]  ;;  %v5579_v59 = vld [vmem:[%s7013_s4 + $0x2c4] ss:$8 sps:$4 sm:$0xff]   ;;  %v5577_v60 = vld [vmem:[%s7013_s4 + $0x2c0] ss:$8 sps:$4 sm:$0xff]   ;;  %3261 = vst [vmem:[%s6820_s20 + $0x8] sm:$0xff] %v3253_v6 }
 0x228   : > { %3171 = vst [vmem:[#allocation3 + $0x38] sm:$0x7f] %v3163_v7  ;;  %v3195_v9 = vmul.f32 %v3189_v50, %v3175_v8  ;;  %v3214_v11 = vadd.f32 %v3205_v3, %v3194_v35  ;;  %v3221_v17 = vmax.f32 %v3213_v10, 0.0  ;;  %v5574_v58 = vld [vmem:[%s7013_s4 + $0x2d0] ss:$8 sps:$4 sm:$0xff]   ;;  %v3256_v8 = vld [vmem:[%s6815_s17 + $0x20] sm:$0xff] }
 0x229   : > { %v3176_v14 = vld [vmem:[#allocation3 + $0x8] sm:$0xff]  ;;  %v5582_v61 = vld [vmem:[%s7013_s4 + $0x2b4] ss:$8 sps:$4 sm:$0xff]   ;;  %v5580_v62 = vld [vmem:[%s7013_s4 + $0x2b0] ss:$8 sps:$4 sm:$0xff]   ;;  %3264 = vst [vmem:[%s6820_s20 + $0x20] sm:$0xff] %v3256_v8 }
 0x22a   : > { %v3215_v13 = vadd.f32 %v3209_v1, %v3195_v9  ;;  %v3222_v15 = vmax.f32 %v3214_v11, 0.0  ;;  %v3196_v24 = vmul.f32 %v3185_v54, %v3176_v14  ;;  %v5585_v63 = vld [vmem:[%s7013_s4 + $0x2a4] ss:$8 sps:$4 sm:$0xff]   ;;  %v5583_v0 = vld [vmem:[%s7013_s4 + $0x2a0] ss:$8 sps:$4 sm:$0xff]   ;;  %v3254_v7 = vld [vmem:[%s6815_s17 + $0x10] sm:$0xff] }
 0x22b   : > { %v3177_v16 = vld [vmem:[#allocation3 + $0x20] sm:$0xff]  ;;  %v5586_v2 = vld [vmem:[%s7013_s4 + $0x290] ss:$8 sps:$4 sm:$0xff]   ;;  %3262 = vst [vmem:[%s6820_s20 + $0x10] sm:$0xff] %v3254_v7  ;;  %v3257_v9 = vld [vmem:[%s6815_s17 + $0x28] sm:$0xff] }
 0x22c   : > { %v3223_v18 = vmax.f32 %v3215_v13, 0.0  ;;  %v3197_v19 = vmul.f32 %v3189_v50, %v3177_v16  ;;  %v6833_v5 = vpack.c.bf16 %v3222_v15, %v3220_v20  ;;  %v3216_v32 = vadd.f32 %v3205_v3, %v3196_v24  ;;  %v5589_v4 = vld [vmem:[%s7013_s4 + $0x280] ss:$8 sps:$4 sm:$0xff]   ;;  %v3255_v35 = vld [vmem:[%s6815_s17 + $0x18] sm:$0xff]  ;;  %3265 = vst [vmem:[%s6820_s20 + $0x28] sm:$0xff] %v3257_v9  ;;  %v3258_v10 = vld [vmem:[%s6815_s17 + $0x30] sm:$0xff] }
 0x22d   : > { %v3178_v23 = vld [vmem:[#allocation3 + $0x28] sm:$0xff]  ;;  %3263 = vst [vmem:[%s6820_s20 + $0x18] sm:$0xff] %v3255_v35  ;;  %3266 = vst [vmem:[%s6820_s20 + $0x30] sm:$0xff] %v3258_v10  ;;  %v3259_v11 = vld [vmem:[%s6815_s17 + $0x38] sm:$0xff] }
 0x22e   : > { %v4988_v25 = vpack.c.bf16 %v3223_v18, %v3221_v17  ;;  %v3198_v27 = vmul.f32 %v3185_v54, %v3178_v23  ;;  %v3217_v30 = vadd.f32 %v3209_v1, %v3197_v19  ;;  %v3224_v40 = vmax.f32 %v3216_v32, 0.0  ;;  %v5568_v54 = vld [vmem:[%s7013_s4 + $0x2f0] ss:$8 sps:$4 sm:$0xff]   ;;  %3267 = vst [vmem:[%s6820_s20 + $0x38] sm:$0xff] %v3259_v11  ;;  %v3521_v13 = vld [vmem:[%s6820_s20] sm:$0xfe] }
 0x22f   : > { %v3179_v29 = vld [vmem:[#allocation3 + $0x38] sm:$0xff]  ;;  %v3522_v17 = vld [vmem:[%s6820_s20 + $0x8] sm:$0xfe] }
 0x230   : > { %3500 = vmatprep.mubr.bf16.mxu1 %v4988_v25  ;;  %3794 = vmatprep.mubr.bf16.mxu0 %v4988_v25  ;;  %v3199_v21 = vmul.f32 %v3189_v50, %v3179_v29  ;;  %v3218_v31 = vadd.f32 %v3205_v3, %v3198_v27  ;;  %v3225_v51 = vmax.f32 %v3217_v30, 0.0  ;;  %v5567_v50 = vld [vmem:[%s7013_s4 + $0x204] ss:$8 sps:$4 sm:$0xff]  }
 0x231   : > { %3501 = vmatmul.mubr.bf16.vlgmr.msra.gmra.mxu1 %v6833_v5  ;;  %3795 = vmatmul.mubr.bf16.vlgmr.msra.gmra.mxu0 %v6833_v5  ;;  %v5591_v3 = vld [vmem:[%s7013_s4 + $0x284] ss:$8 sps:$4 sm:$0xff]  }
 0x232   : > { %4033 = vmatpush1.bf16.msra.mxu1 %v5544_v26  ;;  %v3219_v36 = vadd.f32 %v3209_v1, %v3199_v21  ;;  %v3226_v38 = vmax.f32 %v3218_v31, 0.0  ;;  %v5588_v1 = vld [vmem:[%s7013_s4 + $0x294] ss:$8 sps:$4 sm:$0xff]   ;;  %v3525_v31 = vld [vmem:[%s6820_s20 + $0x20] sm:$0xfe] }
 0x233   : > { %4034 = vmatprep.subr.bf16.mxu1 %v5549_v28  ;;  %v3523_v24 = vld [vmem:[%s6820_s20 + $0x10] sm:$0xfe] }
 0x234   : > { %v3227_v39 = vmax.f32 %v3219_v36, 0.0  ;;  %v6851_v43 = vpack.c.bf16 %v3226_v38, %v3224_v40  ;;  %v3524_v28 = vld [vmem:[%s6820_s20 + $0x18] sm:$0xfe]  ;;  %v3526_v38 = vld [vmem:[%s6820_s20 + $0x28] sm:$0xfe] }
 0x236   : > { %4035 = vmatpush1.bf16.msra.mxu1 %v5547_v34  ;;  %v6846_v41 = vpack.c.bf16 %v3227_v39, %v3225_v51 }
 0x237   : > { %4036 = vmatprep.subr.bf16.mxu1 %v5552_v37 }
 0x238   : > { %3510 = vmatprep.mubr.bf16.mxu1 %v6846_v41  ;;  %3804 = vmatprep.mubr.bf16.mxu0 %v6846_v41 }
 0x239   : > { %3511 = vmatmul.mubr.bf16.gmra.mxu1 %v6851_v43  ;;  %3805 = vmatmul.mubr.bf16.gmra.mxu0 %v6851_v43 }
 0x23a   : > { %4037 = vmatpush1.bf16.msra.mxu1 %v5550_v42  ;;  %4064 = vmatprep.mubr.bf16.mxu1 %v4988_v25  ;;  %v3527_v42 = vld [vmem:[%s6820_s20 + $0x30] sm:$0xfe] }
 0x23b   : > { %4038 = vmatprep.subr.bf16.mxu1 %v5555_v22 }
 0x23e   : > { %4039 = vmatpush1.bf16.msra.mxu1 %v5553_v44 }
 0x23f   : > { %4040 = vmatprep.subr.bf16.mxu1 %v5558_v45 }
 0x242   : > { %4041 = vmatpush1.bf16.msra.mxu1 %v5556_v46 }
 0x243   : > { %4042 = vmatprep.subr.bf16.mxu1 %v5561_v47 }
 0x246   : > { %4043 = vmatpush1.bf16.msra.mxu1 %v5559_v48  ;;  %v3528_v48 = vld [vmem:[%s6820_s20 + $0x38] sm:$0xfe] }
 0x247   : > { %4044 = vmatprep.subr.bf16.mxu1 %v5564_v49 }
 0x24a   : > { %4045 = vmatpush1.bf16.msra.mxu1 %v5562_v33 }
 0x24b   : > { %4046 = vmatprep.subr.bf16.mxu1 %v5567_v50 }
 0x24e   : > { %4047 = vmatpush1.bf16.msra.mxu1 %v5565_v52 }
 0x24f   : > { %4048 = vmatprep.subr.bf16.mxu1 %v5570_v53 }
 0x252   : > { %4049 = vmatpush2.bf16.msra.mxu1 %v5568_v54 }
 0x253   : > { %4050 = vmatprep.subr.bf16.mxu1 %v5573_v55 }
 0x256   : > { %4051 = vmatpush2.bf16.msra.mxu1 %v5571_v56 }
 0x257   : > { %4052 = vmatprep.subr.bf16.mxu1 %v5576_v57 }
 0x25a   : > { %4053 = vmatpush2.bf16.msra.mxu1 %v5574_v58 }
 0x25b   : > { %4054 = vmatprep.subr.bf16.mxu1 %v5579_v59 }
 0x25e   : > { %4055 = vmatpush2.bf16.msra.mxu1 %v5577_v60 }
 0x25f   : > { %4056 = vmatprep.subr.bf16.mxu1 %v5582_v61 }
 0x262   : > { %4057 = vmatpush2.bf16.msra.mxu1 %v5580_v62 }
 0x263   : > { %4058 = vmatprep.subr.bf16.mxu1 %v5585_v63 }
 0x266   : > { %4059 = vmatpush2.bf16.msra.mxu1 %v5583_v0 }
 0x267   : > { %4060 = vmatprep.subr.bf16.mxu1 %v5588_v1 }
 0x26a   : > { %4061 = vmatpush2.bf16.msra.mxu1 %v5586_v2 }
 0x26b   : > { %4062 = vmatprep.subr.bf16.mxu1 %v5591_v3 }
 0x26e   : > { %4063 = vmatpush2.bf16.msra.mxu1 %v5589_v4 }
 0x271   : > { %4065 = vmatmul.mubr.bf16.vlgmr.msra.gmra.mxu1 %v6833_v5 }
 0x272   : > { %4074 = vmatprep.mubr.bf16.mxu1 %v6846_v41 }
 0x279   : > { %4075 = vmatmul.mubr.bf16.gmra.mxu1 %v6851_v43 }
 0x2f1   : > { %v3502_v12 = vpop.f32.mrf.mxu1  ;;  %v3796_v14 = vpop.f32.mrf.mxu0 }
 0x2f2   : > { %v3537_v15 = vrot.slane %v3502_v12, 7 }
 0x2f3   : > { %v3504_v16 = vpop.f32.mrf.mxu1  ;;  %v3798_v18 = vpop.f32.mrf.mxu0 }
 0x2f4   : > { %v3553_v19 = vadd.f32 %v3537_v15, %v3521_v13  ;;  %v3538_v20 = vrot.slane %v3504_v16, 7 }
 0x2f5   : > { %v3506_v23 = vpop.f32.mrf.mxu1  ;;  %v3800_v27 = vpop.f32.mrf.mxu0 }
 0x2f6   : > { %3561 = vst [vmem:[%s6820_s20] sm:$0xfe] %v3553_v19  ;;  %v3554_v25 = vadd.f32 %v3538_v20, %v3522_v17  ;;  %v3539_v26 = vrot.slane %v3506_v23, 7 }
 0x2f7   : > { %v3508_v5 = vpop.f32.mrf.mxu1  ;;  %v3802_v36 = vpop.f32.mrf.mxu0 }
 0x2f8   : > { %3562 = vst [vmem:[%s6820_s20 + $0x8] sm:$0xfe] %v3554_v25  ;;  %v3555_v29 = vadd.f32 %v3539_v26, %v3523_v24  ;;  %v3540_v21 = vrot.slane %v3508_v5, 7 }
 0x2f9   : > { %v3512_v30 = vpop.f32.mrf.mxu1  ;;  %v3806_v46 = vpop.f32.mrf.mxu0 }
 0x2fa   : > { %3563 = vst [vmem:[%s6820_s20 + $0x10] sm:$0xfe] %v3555_v29  ;;  %v3556_v32 = vadd.f32 %v3540_v21, %v3524_v28  ;;  %v3541_v34 = vrot.slane %v3512_v30, 7 }
 0x2fb   : > { %v3514_v37 = vpop.f32.mrf.mxu1  ;;  %v3808_v56 = vpop.f32.mrf.mxu0 }
 0x2fc   : > { %3564 = vst [vmem:[%s6820_s20 + $0x18] sm:$0xfe] %v3556_v32  ;;  %v3557_v51 = vadd.f32 %v3541_v34, %v3525_v31  ;;  %v3542_v39 = vrot.slane %v3514_v37, 7 }
 0x2fd   : > { %v3815_v40 = vld [vmem:[%s6820_s20] sm:$0xff]  ;;  %v3516_v41 = vpop.f32.mrf.mxu1  ;;  %v3810_v61 = vpop.f32.mrf.mxu0 }
 0x2fe   : > { %v3823_v43 = vadd.f32 %v3815_v40, %v3796_v14  ;;  %3565 = vst [vmem:[%s6820_s20 + $0x20] sm:$0xfe] %v3557_v51  ;;  %v3558_v22 = vadd.f32 %v3542_v39, %v3526_v38  ;;  %v3543_v44 = vrot.slane %v3516_v41, 7 }
 0x2ff   : > { %v3816_v45 = vld [vmem:[%s6820_s20 + $0x8] sm:$0xff]  ;;  %v3518_v47 = vpop.f32.mrf.mxu1  ;;  %v3812_v1 = vpop.f32.mrf.mxu0 }
 0x300   : > { %3831 = vst [vmem:[%s6820_s20] sm:$0xff] %v3823_v43  ;;  %v3824_v49 = vadd.f32 %v3816_v45, %v3798_v18  ;;  %3566 = vst [vmem:[%s6820_s20 + $0x28] sm:$0xfe] %v3558_v22  ;;  %v3559_v33 = vadd.f32 %v3543_v44, %v3527_v42  ;;  %v3544_v50 = vrot.slane %v3518_v47, 7 }
 0x301   : > { %v3817_v52 = vld [vmem:[%s6820_s20 + $0x10] sm:$0xff] }
 0x302   : > { %3832 = vst [vmem:[%s6820_s20 + $0x8] sm:$0xff] %v3824_v49  ;;  %v3825_v53 = vadd.f32 %v3817_v52, %v3800_v27  ;;  %3567 = vst [vmem:[%s6820_s20 + $0x30] sm:$0xfe] %v3559_v33  ;;  %v3560_v54 = vadd.f32 %v3544_v50, %v3528_v48 }
 0x303   : > { %v3818_v55 = vld [vmem:[%s6820_s20 + $0x18] sm:$0xff] }
 0x304   : > { %3833 = vst [vmem:[%s6820_s20 + $0x10] sm:$0xff] %v3825_v53  ;;  %v3826_v57 = vadd.f32 %v3818_v55, %v3802_v36  ;;  %3568 = vst [vmem:[%s6820_s20 + $0x38] sm:$0xfe] %v3560_v54 }
 0x305   : > { %v3819_v58 = vld [vmem:[%s6820_s20 + $0x20] sm:$0xff] }
 0x306   : > { %3834 = vst [vmem:[%s6820_s20 + $0x18] sm:$0xff] %v3826_v57  ;;  %v3827_v59 = vadd.f32 %v3819_v58, %v3806_v46 }
 0x307   : > { %v3820_v60 = vld [vmem:[%s6820_s20 + $0x28] sm:$0xff]  ;;  %v4085_v7 = vld [vmem:[%s6820_s20] sm:$0x7f] }
 0x308   : > { %3835 = vst [vmem:[%s6820_s20 + $0x20] sm:$0xff] %v3827_v59  ;;  %v3828_v62 = vadd.f32 %v3820_v60, %v3808_v56 }
 0x309   : > { %v3821_v63 = vld [vmem:[%s6820_s20 + $0x30] sm:$0xff]  ;;  %v4086_v10 = vld [vmem:[%s6820_s20 + $0x8] sm:$0x7f] }
 0x30a   : > { %3836 = vst [vmem:[%s6820_s20 + $0x28] sm:$0xff] %v3828_v62  ;;  %v3829_v0 = vadd.f32 %v3821_v63, %v3810_v61 }
 0x30b   : > { %v3822_v2 = vld [vmem:[%s6820_s20 + $0x38] sm:$0xff]  ;;  %v4087_v14 = vld [vmem:[%s6820_s20 + $0x10] sm:$0x7f] }
 0x30c   : > { %3837 = vst [vmem:[%s6820_s20 + $0x30] sm:$0xff] %v3829_v0  ;;  %v3830_v3 = vadd.f32 %v3822_v2, %v3812_v1 }
 0x30d   : > { %v4088_v18 = vld [vmem:[%s6820_s20 + $0x18] sm:$0x7f] }
 0x30e   : > { %3838 = vst [vmem:[%s6820_s20 + $0x38] sm:$0xff] %v3830_v3 }
 0x30f   : > { %v4089_v24 = vld [vmem:[%s6820_s20 + $0x20] sm:$0x7f] }
 0x311   : > { %v4090_v5 = vld [vmem:[%s6820_s20 + $0x28] sm:$0x7f] }
 0x313   : > { %v4091_v30 = vld [vmem:[%s6820_s20 + $0x30] sm:$0x7f] }
 0x315   : > { %v4092_v36 = vld [vmem:[%s6820_s20 + $0x38] sm:$0x7f] }
 0x331   : > { %v4066_v4 = vpop.f32.mrf.mxu1 }
 0x332   : > { %v4101_v6 = vrot.slane %v4066_v4, 1 }
 0x333   : > { %v4068_v35 = vpop.f32.mrf.mxu1 }
 0x334   : > { %v4117_v8 = vadd.f32 %v4101_v6, %v4085_v7  ;;  %v4102_v9 = vrot.slane %v4068_v35, 1 }
 0x335   : > { %v4070_v11 = vpop.f32.mrf.mxu1 }
 0x336   : > { %4125 = vst [vmem:[%s6820_s20] sm:$0x7f] %v4117_v8  ;;  %v4118_v12 = vadd.f32 %v4102_v9, %v4086_v10  ;;  %v4103_v13 = vrot.slane %v4070_v11, 1 }
 0x337   : > { %v4072_v15 = vpop.f32.mrf.mxu1 }
 0x338   : > { %4126 = vst [vmem:[%s6820_s20 + $0x8] sm:$0x7f] %v4118_v12  ;;  %v4119_v16 = vadd.f32 %v4103_v13, %v4087_v14  ;;  %v4104_v17 = vrot.slane %v4072_v15, 1 }
 0x339   : > { %v4076_v19 = vpop.f32.mrf.mxu1 }
 0x33a   : > { %4127 = vst [vmem:[%s6820_s20 + $0x10] sm:$0x7f] %v4119_v16  ;;  %v4120_v20 = vadd.f32 %v4104_v17, %v4088_v18  ;;  %v4105_v23 = vrot.slane %v4076_v19, 1 }
 0x33b   : > { %v4078_v25 = vpop.f32.mrf.mxu1 }
 0x33c   : > { %4128 = vst [vmem:[%s6820_s20 + $0x18] sm:$0x7f] %v4120_v20  ;;  %v4121_v26 = vadd.f32 %v4105_v23, %v4089_v24  ;;  %v4106_v27 = vrot.slane %v4078_v25, 1 }
 0x33d   : > { %v4080_v28 = vpop.f32.mrf.mxu1 }
 0x33e   : > { %4129 = vst [vmem:[%s6820_s20 + $0x20] sm:$0x7f] %v4121_v26  ;;  %v4122_v29 = vadd.f32 %v4106_v27, %v4090_v5  ;;  %v4107_v21 = vrot.slane %v4080_v28, 1 }
 0x33f   : > { %v4082_v31 = vpop.f32.mrf.mxu1 }
 0x340   : > { %4130 = vst [vmem:[%s6820_s20 + $0x28] sm:$0x7f] %v4122_v29  ;;  %v4123_v32 = vadd.f32 %v4107_v21, %v4091_v30  ;;  %v4108_v34 = vrot.slane %v4082_v31, 1 }
 0x342   : > { %4131 = vst [vmem:[%s6820_s20 + $0x30] sm:$0x7f] %v4123_v32  ;;  %v4124_v37 = vadd.f32 %v4108_v34, %v4092_v36 }
 0x344   : > { %4132 = vst [vmem:[%s6820_s20 + $0x38] sm:$0x7f] %v4124_v37 }
 0x345 PF: > { %s16_s23 = sadd.s32 1, %s5614_s23   ;;  %s7016_s21 = smov %s5610_s22 }
 0x346   : > { %p13_p5 = scmp.ge.s32.totalorder %s16_s23, 4   ;;  %s7017_s22 = smov %s7019_s24 }
 0x348   :  { %15 = sbr.rel (!%p13_p5) target bundleno = 2 (0x2), region = 98 }

</bundles_post_ra>
